<compile_context>
chip_gen: v5e
topology: v5e:2x2
jax: 0.10.0
libtpu: 0.0.40
codegen_flags: <defaults>
</compile_context>

<pallas_src>
import functools

import jax
import jax.numpy as jnp
from jax.experimental import pallas as pl
from jax.experimental.pallas import tpu as pltpu

DIM_TAG = 194
DIM_COM = 49
HIDDEN = 32
NUM_LAYERS = 2

SUBLANE = 8
DIM_TAG_PAD = 256            # 194 padded up to a multiple of 128 for aligned K
COM_PAD = 64                 # 49 padded so 2*HIDDEN + COM_PAD == 128 (head input)
ATTN_GATE_PAD = 128          # attention-LSTM gate width (4) padded to one lane tile


# ---------------------------------------------------------------------------
# Fused forward kernel
# ---------------------------------------------------------------------------
def _bilstm_attn_kernel(
    x_ref, xcom_ref,
    w0_ref, b0_ref, whh0_ref,
    wih1_ref, b1_ref, whh1_ref,
    wah_ref, bah_ref, wac_ref, bac_ref,
    wia_ref, wha_ref, ba_ref,
    pw1_ref, pb1_ref, pw2_ref, pb2_ref, pw3_ref, pb3_ref,
    out_ref, *, T, BP, B, H,
):
    f32 = jnp.float32
    G = 4 * H                                   # per-direction gate width (128)

    # Hoisted masks (kept outside the unrolled loops; broadcasts are not CSE'd).
    lane = jax.lax.broadcasted_iota(jnp.int32, (2 * BP, G), 1)
    g_is_tanh = (lane >= 2 * H) & (lane < 3 * H)        # PyTorch gate order: i, f, g, o
    row = jax.lax.broadcasted_iota(jnp.int32, (2 * BP, 2 * H), 0)
    col = jax.lax.broadcasted_iota(jnp.int32, (2 * BP, 2 * H), 1)
    row_fwd = (row < BP).astype(f32)
    col_fwd = (col < H).astype(f32)
    # Block-diagonal state mask: fwd rows keep cols [0,H), bwd rows keep cols [H,2H).
    dir_mask = row_fwd * col_fwd + (1.0 - row_fwd) * (1.0 - col_fwd)

    def bilstm_layer(gates_x, whh_bd):
        """One bidirectional LSTM layer, both directions stacked on the row axis.

        gates_x: (T*BP, 2*G) time-major hoisted input projections (+ biases);
                 cols [0,G) forward direction, [G,2G) backward direction.
        whh_bd:  (2H, G) = vstack(W_hh_fwd, W_hh_bwd); with the stacked state kept
                 block-diagonal ([h_f | 0] on fwd rows, [0 | h_b] on bwd rows) a
                 single matmul per step drives both recurrences.
        Returns (y, h_n_bwd, c_n_bwd): y is (T*BP, 2H) time-major [fwd|bwd] outputs,
        h_n/c_n are the backward direction's final state (== PyTorch hn[-1]/cn[-1]
        when this is the last layer).
        """
        h = jnp.zeros((2 * BP, H), f32)
        h_bd = jnp.zeros((2 * BP, 2 * H), f32)
        c = jnp.zeros((2 * BP, H), f32)
        y_f = [None] * T
        y_b = [None] * T
        for s in range(T):                      # fully unrolled (T is static)
            tf = s                              # forward-direction time index
            tb = T - 1 - s                      # backward-direction time index
            gx = jnp.concatenate(
                [gates_x[tf * BP:(tf + 1) * BP, 0:G],
                 gates_x[tb * BP:(tb + 1) * BP, G:2 * G]], axis=0)      # (2BP, G)
            gates = gx + jnp.dot(h_bd, whh_bd, preferred_element_type=f32)
            # Full-width activation pass: tanh on the g-gate lanes, sigmoid elsewhere.
            act = jnp.where(g_is_tanh, jnp.tanh(gates), jax.nn.sigmoid(gates))
            i_g = act[:, 0:H]
            f_g = act[:, H:2 * H]
            g_g = act[:, 2 * H:3 * H]
            o_g = act[:, 3 * H:4 * H]
            c = f_g * c + i_g * g_g
            h = o_g * jnp.tanh(c)
            h_bd = jnp.concatenate([h, h], axis=1) * dir_mask           # (2BP, 2H)
            y_f[tf] = h[0:BP, :]
            y_b[tb] = h[BP:2 * BP, :]
        y = jnp.concatenate(
            [jnp.concatenate(y_f, axis=0), jnp.concatenate(y_b, axis=0)], axis=1)
        return y, h[BP:2 * BP, :], c[BP:2 * BP, :]

    # ---- bi-LSTM layer 0 (pre-linear folded into the hoisted input projection) ----
    gx0 = jnp.dot(x_ref[...], w0_ref[...], preferred_element_type=f32) + b0_ref[...]
    y0, _, _ = bilstm_layer(gx0, whh0_ref[...])

    # ---- bi-LSTM layer 1 (inter-layer dropout p=0.1 == identity at inference) ----
    gx1 = jnp.dot(y0, wih1_ref[...], preferred_element_type=f32) + b1_ref[...]
    y1, hn_b, cn_b = bilstm_layer(gx1, whh1_ref[...])

    # ---- attention scorer: LSTM(64 -> 1), init state = dense(h_n), dense(c_n) ----
    # PyTorch hn[-1]/cn[-1] == final state of the last layer's backward direction.
    h_att = jnp.sum(hn_b * wah_ref[...], axis=1, keepdims=True) + bah_ref[...]   # (BP,1)
    c_att = jnp.sum(cn_b * wac_ref[...], axis=1, keepdims=True) + bac_ref[...]   # (BP,1)
    gxa = jnp.dot(y1, wia_ref[...], preferred_element_type=f32) + ba_ref[...]    # (T*BP,128); lanes 0:4 used
    wha = wha_ref[...]                                                           # (1,128);  lanes 0:4 used
    logits = []
    for t in range(T):                          # fully unrolled
        g = gxa[t * BP:(t + 1) * BP, :] + h_att * wha
        i_g = jax.nn.sigmoid(g[:, 0:1])
        f_g = jax.nn.sigmoid(g[:, 1:2])
        g_g = jnp.tanh(g[:, 2:3])
        o_g = jax.nn.sigmoid(g[:, 3:4])
        c_att = f_g * c_att + i_g * g_g
        h_att = o_g * jnp.tanh(c_att)
        logits.append(h_att)                    # (BP, 1)
    scores = jnp.concatenate(logits, axis=1)    # (BP, T)

    # softmax over time, then attention-weighted sum of the bi-LSTM output sequence
    m = jnp.max(scores, axis=1, keepdims=True)
    e = jnp.exp(scores - m)
    attn = e / jnp.sum(e, axis=1, keepdims=True)                                 # (BP, T)
    h_sum = jnp.zeros((BP, 2 * H), f32)
    for t in range(T):
        h_sum = h_sum + attn[:, t:t + 1] * y1[t * BP:(t + 1) * BP, :]

    # ---- MLP head (dropout p=0.2 == identity at inference) ----
    hcat = jnp.concatenate([h_sum, xcom_ref[...]], axis=1)                       # (BP, 128)
    h1 = jnp.maximum(
        jnp.dot(hcat, pw1_ref[...], preferred_element_type=f32) + pb1_ref[...], 0.0)
    h2 = jnp.maximum(
        jnp.dot(h1, pw2_ref[...], preferred_element_type=f32) + pb2_ref[...], 0.0)
    out = jax.nn.sigmoid(
        jnp.dot(h2, pw3_ref[...], preferred_element_type=f32) + pb3_ref[...])    # (BP, 16)
    out_ref[...] = out[0:B, :].astype(out_ref.dtype)


# ---------------------------------------------------------------------------
# Parameter init (deterministic, synthetic) — shapes mirror the PyTorch module,
# with all Linear / LSTM input-projection weights stored transposed (in, out).
# ---------------------------------------------------------------------------
def init_params(key):
    H = HIDDEN

    def uni(k, shape, fan):
        bound = 1.0 / jnp.sqrt(jnp.float32(fan))
        return jax.random.uniform(k, shape, jnp.float32, -bound, bound)

    keys = iter(jax.random.split(key, 48))
    params = {
        "pre_w": uni(next(keys), (DIM_TAG, H), DIM_TAG),
        "pre_b": uni(next(keys), (H,), DIM_TAG),
        "lstm": [],
        # attention dense layers (Linear(32 -> 1))
        "attn_h_w": uni(next(keys), (H,), H),
        "attn_h_b": uni(next(keys), (1,), H),
        "attn_c_w": uni(next(keys), (H,), H),
        "attn_c_b": uni(next(keys), (1,), H),
        # attention LSTM(64 -> 1); PyTorch init bound = 1/sqrt(hidden_size=1)
        "attn_rnn_wih": uni(next(keys), (2 * H, 4), 1),
        "attn_rnn_whh": uni(next(keys), (1, 4), 1),
        "attn_rnn_b": uni(next(keys), (4,), 1) + uni(next(keys), (4,), 1),  # b_ih + b_hh
        # post MLP head
        "post_w1": uni(next(keys), (2 * H + DIM_COM, 128), 2 * H + DIM_COM),
        "post_b1": uni(next(keys), (128,), 2 * H + DIM_COM),
        "post_w2": uni(next(keys), (128, 128), 128),
        "post_b2": uni(next(keys), (128,), 128),
        "post_w3": uni(next(keys), (128, 16), 128),
        "post_b3": uni(next(keys), (16,), 128),
    }
    for layer in range(NUM_LAYERS):
        d_in = H if layer == 0 else 2 * H
        lp = {}
        for d in ("f", "b"):
            # NOTE: fan = HIDDEN (not d_in) on purpose — matches PyTorch's
            # 1/sqrt(hidden_size) LSTM init convention.
            lp[f"wih_{d}"] = uni(next(keys), (d_in, 4 * H), H)
            lp[f"whh_{d}"] = uni(next(keys), (H, 4 * H), H)
            lp[f"b_{d}"] = uni(next(keys), (4 * H,), H) + uni(next(keys), (4 * H,), H)
        params["lstm"].append(lp)
    return params


# ---------------------------------------------------------------------------
# One-time weight preparation: fold the pre-linear into layer-0's input
# projection, concatenate per-direction weights, and pad to lane-aligned widths.
# ---------------------------------------------------------------------------
def prepare_weights(params):
    H = HIDDEN
    l0, l1 = params["lstm"]

    # layer 0: fused (pre + input projection) for both directions
    wih0 = jnp.concatenate([l0["wih_f"], l0["wih_b"]], axis=1)                 # (32, 256)
    w0 = jnp.pad(params["pre_w"] @ wih0, ((0, DIM_TAG_PAD - DIM_TAG), (0, 0)))  # (256, 256)
    b0 = (params["pre_b"] @ wih0
          + jnp.concatenate([l0["b_f"], l0["b_b"]])).reshape(1, 8 * H)         # (1, 256)
    whh0 = jnp.concatenate([l0["whh_f"], l0["whh_b"]], axis=0)                 # (64, 128)

    # layer 1
    wih1 = jnp.concatenate([l1["wih_f"], l1["wih_b"]], axis=1)                 # (64, 256)
    b1 = jnp.concatenate([l1["b_f"], l1["b_b"]]).reshape(1, 8 * H)             # (1, 256)
    whh1 = jnp.concatenate([l1["whh_f"], l1["whh_b"]], axis=0)                 # (64, 128)

    # attention dense layers (used as row vectors -> VPU mul + lane reduce in-kernel)
    wah = params["attn_h_w"].reshape(1, H)
    bah = params["attn_h_b"].reshape(1, 1)
    wac = params["attn_c_w"].reshape(1, H)
    bac = params["attn_c_b"].reshape(1, 1)

    # attention LSTM weights, gate width padded 4 -> 128 for lane-dense matmuls
    wia = jnp.pad(params["attn_rnn_wih"], ((0, 0), (0, ATTN_GATE_PAD - 4)))    # (64, 128)
    wha = jnp.pad(params["attn_rnn_whh"], ((0, 0), (0, ATTN_GATE_PAD - 4)))    # (1, 128)
    ba = jnp.pad(params["attn_rnn_b"], (0, ATTN_GATE_PAD - 4)).reshape(1, ATTN_GATE_PAD)

    # MLP head; w1 rows padded 113 -> 128 to match the zero-padded x_com columns
    pw1 = jnp.pad(params["post_w1"], ((0, COM_PAD - DIM_COM), (0, 0)))         # (128, 128)
    pb1 = params["post_b1"].reshape(1, 128)
    pw2 = params["post_w2"]
    pb2 = params["post_b2"].reshape(1, 128)
    pw3 = params["post_w3"]
    pb3 = params["post_b3"].reshape(1, 16)

    return (w0, b0, whh0, wih1, b1, whh1,
            wah, bah, wac, bac, wia, wha, ba,
            pw1, pb1, pw2, pb2, pw3, pb3)


# ---------------------------------------------------------------------------
# Full forward pass: one pallas_call
# ---------------------------------------------------------------------------
def bilstm_attn_forward(weights, x_tag, x_com):
    B, T, _ = x_tag.shape
    bp = (B + SUBLANE - 1) // SUBLANE * SUBLANE    # pad batch to a full sublane tile

    # Time-major layout + padding so every in-kernel slice is (8,128)-aligned.
    x_tm = jnp.transpose(x_tag, (1, 0, 2))                                     # (T, B, 194)
    x_tm = jnp.pad(x_tm, ((0, 0), (0, bp - B), (0, DIM_TAG_PAD - DIM_TAG)))
    x_tm = x_tm.reshape(T * bp, DIM_TAG_PAD)                                   # (T*bp, 256)
    xcom = jnp.pad(x_com, ((0, bp - B), (0, COM_PAD - DIM_COM)))               # (bp, 64)

    kernel = functools.partial(_bilstm_attn_kernel, T=T, BP=bp, B=B, H=HIDDEN)
    return pl.pallas_call(
        kernel,
        out_shape=jax.ShapeDtypeStruct((B, 16), jnp.float32),
        in_specs=[pl.BlockSpec(memory_space=pltpu.MemorySpace.VMEM)] * (2 + len(weights)),
        out_specs=pl.BlockSpec(memory_space=pltpu.MemorySpace.VMEM),
    )(x_tm, xcom, *weights)


if __name__ == "__main__":
    key = jax.random.PRNGKey(0)
    k_params, k_tag, k_com = jax.random.split(key, 3)

    B, T = 2, 8
    params = init_params(k_params)
    weights = prepare_weights(params)            # folded / padded once, outside jit
    x_tag = jax.random.normal(k_tag, (B, T, DIM_TAG), jnp.float32)
    x_com = jax.random.normal(k_com, (B, DIM_COM), jnp.float32)

    fwd = jax.jit(bilstm_attn_forward)
    out = jax.block_until_ready(fwd(weights, x_tag, x_com))
    assert out.shape == (B, 16)
    assert bool(jnp.all(jnp.isfinite(out)))
    print("KERNEL_OK")
</pallas_src>

<mosaic_0001>
module attributes {stable_mosaic.version = 11 : i64} {
  func.func @_bilstm_attn_kernel(%arg0: memref<64x256xf32, #tpu.memory_space<vmem>>, %arg1: memref<8x64xf32, #tpu.memory_space<vmem>>, %arg2: memref<256x256xf32, #tpu.memory_space<vmem>>, %arg3: memref<1x256xf32, #tpu.memory_space<vmem>>, %arg4: memref<64x128xf32, #tpu.memory_space<vmem>>, %arg5: memref<64x256xf32, #tpu.memory_space<vmem>>, %arg6: memref<1x256xf32, #tpu.memory_space<vmem>>, %arg7: memref<64x128xf32, #tpu.memory_space<vmem>>, %arg8: memref<1x32xf32, #tpu.memory_space<vmem>>, %arg9: memref<1x1xf32, #tpu.memory_space<vmem>>, %arg10: memref<1x32xf32, #tpu.memory_space<vmem>>, %arg11: memref<1x1xf32, #tpu.memory_space<vmem>>, %arg12: memref<64x128xf32, #tpu.memory_space<vmem>>, %arg13: memref<1x128xf32, #tpu.memory_space<vmem>>, %arg14: memref<1x128xf32, #tpu.memory_space<vmem>>, %arg15: memref<128x128xf32, #tpu.memory_space<vmem>>, %arg16: memref<1x128xf32, #tpu.memory_space<vmem>>, %arg17: memref<128x128xf32, #tpu.memory_space<vmem>>, %arg18: memref<1x128xf32, #tpu.memory_space<vmem>>, %arg19: memref<128x16xf32, #tpu.memory_space<vmem>>, %arg20: memref<1x16xf32, #tpu.memory_space<vmem>>, %arg21: memref<2x16xf32, #tpu.memory_space<vmem>>) attributes {dimension_semantics = [], scalar_prefetch = 0 : i64, scratch_operands = 0 : i64, tpu.core_type = #tpu.core_type<tc>} {
    %0 = tpu.iota {dimensions = array<i32: 1>} : vector<16x128xi32>
    %c64_i32 = arith.constant 64 : i32
    %1 = vector.broadcast %c64_i32 : i32 to vector<16x128xi32>
    %2 = arith.cmpi sge, %0, %1 : vector<16x128xi32>
    %c96_i32 = arith.constant 96 : i32
    %3 = vector.broadcast %c96_i32 : i32 to vector<16x128xi32>
    %4 = arith.cmpi slt, %0, %3 : vector<16x128xi32>
    %5 = arith.andi %2, %4 : vector<16x128xi1>
    %6 = tpu.iota {dimensions = array<i32: 0>} : vector<16x64xi32>
    %7 = tpu.iota {dimensions = array<i32: 1>} : vector<16x64xi32>
    %c8_i32 = arith.constant 8 : i32
    %8 = vector.broadcast %c8_i32 : i32 to vector<16x64xi32>
    %9 = arith.cmpi slt, %6, %8 : vector<16x64xi32>
    %10 = arith.extui %9 : vector<16x64xi1> to vector<16x64xi32>
    %11 = arith.sitofp %10 : vector<16x64xi32> to vector<16x64xf32>
    %c32_i32 = arith.constant 32 : i32
    %12 = vector.broadcast %c32_i32 : i32 to vector<16x64xi32>
    %13 = arith.cmpi slt, %7, %12 : vector<16x64xi32>
    %14 = arith.extui %13 : vector<16x64xi1> to vector<16x64xi32>
    %15 = arith.sitofp %14 : vector<16x64xi32> to vector<16x64xf32>
    %16 = arith.mulf %11, %15 : vector<16x64xf32>
    %cst = arith.constant 1.000000e+00 : f32
    %17 = vector.broadcast %cst : f32 to vector<16x64xf32>
    %18 = arith.subf %17, %11 : vector<16x64xf32>
    %cst_0 = arith.constant 1.000000e+00 : f32
    %19 = vector.broadcast %cst_0 : f32 to vector<16x64xf32>
    %20 = arith.subf %19, %15 : vector<16x64xf32>
    %21 = arith.mulf %18, %20 : vector<16x64xf32>
    %22 = arith.addf %16, %21 : vector<16x64xf32>
    %c0 = arith.constant 0 : index
    %c0_1 = arith.constant 0 : index
    %23 = vector.load %arg0[%c0, %c0_1] : memref<64x256xf32, #tpu.memory_space<vmem>>, vector<64x256xf32>
    %c0_2 = arith.constant 0 : index
    %c0_3 = arith.constant 0 : index
    %24 = vector.load %arg2[%c0_2, %c0_3] : memref<256x256xf32, #tpu.memory_space<vmem>>, vector<256x256xf32>
    %cst_4 = arith.constant dense<0.000000e+00> : vector<64x256xf32>
    %25 = tpu.matmul %23, %24, %cst_4 {dimension_numbers = #tpu.dot_dimension_numbers<[1], [0], [0], [1], [0, 0, 1, 1], [], []>} : vector<64x256xf32>, vector<256x256xf32>, vector<64x256xf32> -> vector<64x256xf32>
    %c0_5 = arith.constant 0 : index
    %c0_6 = arith.constant 0 : index
    %26 = vector.load %arg3[%c0_5, %c0_6] : memref<1x256xf32, #tpu.memory_space<vmem>>, vector<1x256xf32>
    %27 = vector.broadcast %26 : vector<1x256xf32> to vector<64x256xf32>
    %28 = arith.addf %25, %27 : vector<64x256xf32>
    %c0_7 = arith.constant 0 : index
    %c0_8 = arith.constant 0 : index
    %29 = vector.load %arg4[%c0_7, %c0_8] : memref<64x128xf32, #tpu.memory_space<vmem>>, vector<64x128xf32>
    %cst_9 = arith.constant 0.000000e+00 : f32
    %30 = vector.broadcast %cst_9 : f32 to vector<16x64xf32>
    %cst_10 = arith.constant 0.000000e+00 : f32
    %31 = vector.broadcast %cst_10 : f32 to vector<16x32xf32>
    %32 = vector.extract_strided_slice %28 {offsets = [0, 0], sizes = [8, 128], strides = [1, 1]} : vector<64x256xf32> to vector<8x128xf32>
    %33 = vector.extract_strided_slice %28 {offsets = [56, 128], sizes = [8, 128], strides = [1, 1]} : vector<64x256xf32> to vector<8x128xf32>
    %34 = tpu.concatenate %32, %33 in 0 : vector<8x128xf32>, vector<8x128xf32> -> vector<16x128xf32>
    %cst_11 = arith.constant dense<0.000000e+00> : vector<16x128xf32>
    %35 = tpu.matmul %30, %29, %cst_11 {dimension_numbers = #tpu.dot_dimension_numbers<[1], [0], [0], [1], [0, 0, 1, 1], [], []>} : vector<16x64xf32>, vector<64x128xf32>, vector<16x128xf32> -> vector<16x128xf32>
    %36 = arith.addf %34, %35 : vector<16x128xf32>
    %37 = math.tanh %36 : vector<16x128xf32>
    %38 = arith.negf %36 : vector<16x128xf32>
    %39 = math.exp %38 : vector<16x128xf32>
    %cst_12 = arith.constant 1.000000e+00 : f32
    %40 = vector.broadcast %cst_12 : f32 to vector<16x128xf32>
    %41 = arith.addf %40, %39 : vector<16x128xf32>
    %42 = arith.divf %40, %41 : vector<16x128xf32>
    %43 = arith.select %5, %37, %42 : vector<16x128xi1>, vector<16x128xf32>
    %44 = vector.extract_strided_slice %43 {offsets = [0, 0], sizes = [16, 32], strides = [1, 1]} : vector<16x128xf32> to vector<16x32xf32>
    %45 = vector.extract_strided_slice %43 {offsets = [0, 32], sizes = [16, 32], strides = [1, 1]} : vector<16x128xf32> to vector<16x32xf32>
    %46 = vector.extract_strided_slice %43 {offsets = [0, 64], sizes = [16, 32], strides = [1, 1]} : vector<16x128xf32> to vector<16x32xf32>
    %47 = vector.extract_strided_slice %43 {offsets = [0, 96], sizes = [16, 32], strides = [1, 1]} : vector<16x128xf32> to vector<16x32xf32>
    %48 = arith.mulf %45, %31 : vector<16x32xf32>
    %49 = arith.mulf %44, %46 : vector<16x32xf32>
    %50 = arith.addf %48, %49 : vector<16x32xf32>
    %51 = math.tanh %50 : vector<16x32xf32>
    %52 = arith.mulf %47, %51 : vector<16x32xf32>
    %53 = tpu.concatenate %52, %52 in 1 : vector<16x32xf32>, vector<16x32xf32> -> vector<16x64xf32>
    %54 = arith.mulf %53, %22 : vector<16x64xf32>
    %55 = vector.extract_strided_slice %52 {offsets = [0, 0], sizes = [8, 32], strides = [1, 1]} : vector<16x32xf32> to vector<8x32xf32>
    %56 = vector.extract_strided_slice %52 {offsets = [8, 0], sizes = [8, 32], strides = [1, 1]} : vector<16x32xf32> to vector<8x32xf32>
    %57 = vector.extract_strided_slice %28 {offsets = [8, 0], sizes = [8, 128], strides = [1, 1]} : vector<64x256xf32> to vector<8x128xf32>
    %58 = vector.extract_strided_slice %28 {offsets = [48, 128], sizes = [8, 128], strides = [1, 1]} : vector<64x256xf32> to vector<8x128xf32>
    %59 = tpu.concatenate %57, %58 in 0 : vector<8x128xf32>, vector<8x128xf32> -> vector<16x128xf32>
    %cst_13 = arith.constant dense<0.000000e+00> : vector<16x128xf32>
    %60 = tpu.matmul %54, %29, %cst_13 {dimension_numbers = #tpu.dot_dimension_numbers<[1], [0], [0], [1], [0, 0, 1, 1], [], []>} : vector<16x64xf32>, vector<64x128xf32>, vector<16x128xf32> -> vector<16x128xf32>
    %61 = arith.addf %59, %60 : vector<16x128xf32>
    %62 = math.tanh %61 : vector<16x128xf32>
    %63 = arith.negf %61 : vector<16x128xf32>
    %64 = math.exp %63 : vector<16x128xf32>
    %cst_14 = arith.constant 1.000000e+00 : f32
    %65 = vector.broadcast %cst_14 : f32 to vector<16x128xf32>
    %66 = arith.addf %65, %64 : vector<16x128xf32>
    %67 = arith.divf %65, %66 : vector<16x128xf32>
    %68 = arith.select %5, %62, %67 : vector<16x128xi1>, vector<16x128xf32>
    %69 = vector.extract_strided_slice %68 {offsets = [0, 0], sizes = [16, 32], strides = [1, 1]} : vector<16x128xf32> to vector<16x32xf32>
    %70 = vector.extract_strided_slice %68 {offsets = [0, 32], sizes = [16, 32], strides = [1, 1]} : vector<16x128xf32> to vector<16x32xf32>
    %71 = vector.extract_strided_slice %68 {offsets = [0, 64], sizes = [16, 32], strides = [1, 1]} : vector<16x128xf32> to vector<16x32xf32>
    %72 = vector.extract_strided_slice %68 {offsets = [0, 96], sizes = [16, 32], strides = [1, 1]} : vector<16x128xf32> to vector<16x32xf32>
    %73 = arith.mulf %70, %50 : vector<16x32xf32>
    %74 = arith.mulf %69, %71 : vector<16x32xf32>
    %75 = arith.addf %73, %74 : vector<16x32xf32>
    %76 = math.tanh %75 : vector<16x32xf32>
    %77 = arith.mulf %72, %76 : vector<16x32xf32>
    %78 = tpu.concatenate %77, %77 in 1 : vector<16x32xf32>, vector<16x32xf32> -> vector<16x64xf32>
    %79 = arith.mulf %78, %22 : vector<16x64xf32>
    %80 = vector.extract_strided_slice %77 {offsets = [0, 0], sizes = [8, 32], strides = [1, 1]} : vector<16x32xf32> to vector<8x32xf32>
    %81 = vector.extract_strided_slice %77 {offsets = [8, 0], sizes = [8, 32], strides = [1, 1]} : vector<16x32xf32> to vector<8x32xf32>
    %82 = vector.extract_strided_slice %28 {offsets = [16, 0], sizes = [8, 128], strides = [1, 1]} : vector<64x256xf32> to vector<8x128xf32>
    %83 = vector.extract_strided_slice %28 {offsets = [40, 128], sizes = [8, 128], strides = [1, 1]} : vector<64x256xf32> to vector<8x128xf32>
    %84 = tpu.concatenate %82, %83 in 0 : vector<8x128xf32>, vector<8x128xf32> -> vector<16x128xf32>
    %cst_15 = arith.constant dense<0.000000e+00> : vector<16x128xf32>
    %85 = tpu.matmul %79, %29, %cst_15 {dimension_numbers = #tpu.dot_dimension_numbers<[1], [0], [0], [1], [0, 0, 1, 1], [], []>} : vector<16x64xf32>, vector<64x128xf32>, vector<16x128xf32> -> vector<16x128xf32>
    %86 = arith.addf %84, %85 : vector<16x128xf32>
    %87 = math.tanh %86 : vector<16x128xf32>
    %88 = arith.negf %86 : vector<16x128xf32>
    %89 = math.exp %88 : vector<16x128xf32>
    %cst_16 = arith.constant 1.000000e+00 : f32
    %90 = vector.broadcast %cst_16 : f32 to vector<16x128xf32>
    %91 = arith.addf %90, %89 : vector<16x128xf32>
    %92 = arith.divf %90, %91 : vector<16x128xf32>
    %93 = arith.select %5, %87, %92 : vector<16x128xi1>, vector<16x128xf32>
    %94 = vector.extract_strided_slice %93 {offsets = [0, 0], sizes = [16, 32], strides = [1, 1]} : vector<16x128xf32> to vector<16x32xf32>
    %95 = vector.extract_strided_slice %93 {offsets = [0, 32], sizes = [16, 32], strides = [1, 1]} : vector<16x128xf32> to vector<16x32xf32>
    %96 = vector.extract_strided_slice %93 {offsets = [0, 64], sizes = [16, 32], strides = [1, 1]} : vector<16x128xf32> to vector<16x32xf32>
    %97 = vector.extract_strided_slice %93 {offsets = [0, 96], sizes = [16, 32], strides = [1, 1]} : vector<16x128xf32> to vector<16x32xf32>
    %98 = arith.mulf %95, %75 : vector<16x32xf32>
    %99 = arith.mulf %94, %96 : vector<16x32xf32>
    %100 = arith.addf %98, %99 : vector<16x32xf32>
    %101 = math.tanh %100 : vector<16x32xf32>
    %102 = arith.mulf %97, %101 : vector<16x32xf32>
    %103 = tpu.concatenate %102, %102 in 1 : vector<16x32xf32>, vector<16x32xf32> -> vector<16x64xf32>
    %104 = arith.mulf %103, %22 : vector<16x64xf32>
    %105 = vector.extract_strided_slice %102 {offsets = [0, 0], sizes = [8, 32], strides = [1, 1]} : vector<16x32xf32> to vector<8x32xf32>
    %106 = vector.extract_strided_slice %102 {offsets = [8, 0], sizes = [8, 32], strides = [1, 1]} : vector<16x32xf32> to vector<8x32xf32>
    %107 = vector.extract_strided_slice %28 {offsets = [24, 0], sizes = [8, 128], strides = [1, 1]} : vector<64x256xf32> to vector<8x128xf32>
    %108 = vector.extract_strided_slice %28 {offsets = [32, 128], sizes = [8, 128], strides = [1, 1]} : vector<64x256xf32> to vector<8x128xf32>
    %109 = tpu.concatenate %107, %108 in 0 : vector<8x128xf32>, vector<8x128xf32> -> vector<16x128xf32>
    %cst_17 = arith.constant dense<0.000000e+00> : vector<16x128xf32>
    %110 = tpu.matmul %104, %29, %cst_17 {dimension_numbers = #tpu.dot_dimension_numbers<[1], [0], [0], [1], [0, 0, 1, 1], [], []>} : vector<16x64xf32>, vector<64x128xf32>, vector<16x128xf32> -> vector<16x128xf32>
    %111 = arith.addf %109, %110 : vector<16x128xf32>
    %112 = math.tanh %111 : vector<16x128xf32>
    %113 = arith.negf %111 : vector<16x128xf32>
    %114 = math.exp %113 : vector<16x128xf32>
    %cst_18 = arith.constant 1.000000e+00 : f32
    %115 = vector.broadcast %cst_18 : f32 to vector<16x128xf32>
    %116 = arith.addf %115, %114 : vector<16x128xf32>
    %117 = arith.divf %115, %116 : vector<16x128xf32>
    %118 = arith.select %5, %112, %117 : vector<16x128xi1>, vector<16x128xf32>
    %119 = vector.extract_strided_slice %118 {offsets = [0, 0], sizes = [16, 32], strides = [1, 1]} : vector<16x128xf32> to vector<16x32xf32>
    %120 = vector.extract_strided_slice %118 {offsets = [0, 32], sizes = [16, 32], strides = [1, 1]} : vector<16x128xf32> to vector<16x32xf32>
    %121 = vector.extract_strided_slice %118 {offsets = [0, 64], sizes = [16, 32], strides = [1, 1]} : vector<16x128xf32> to vector<16x32xf32>
    %122 = vector.extract_strided_slice %118 {offsets = [0, 96], sizes = [16, 32], strides = [1, 1]} : vector<16x128xf32> to vector<16x32xf32>
    %123 = arith.mulf %120, %100 : vector<16x32xf32>
    %124 = arith.mulf %119, %121 : vector<16x32xf32>
    %125 = arith.addf %123, %124 : vector<16x32xf32>
    %126 = math.tanh %125 : vector<16x32xf32>
    %127 = arith.mulf %122, %126 : vector<16x32xf32>
    %128 = tpu.concatenate %127, %127 in 1 : vector<16x32xf32>, vector<16x32xf32> -> vector<16x64xf32>
    %129 = arith.mulf %128, %22 : vector<16x64xf32>
    %130 = vector.extract_strided_slice %127 {offsets = [0, 0], sizes = [8, 32], strides = [1, 1]} : vector<16x32xf32> to vector<8x32xf32>
    %131 = vector.extract_strided_slice %127 {offsets = [8, 0], sizes = [8, 32], strides = [1, 1]} : vector<16x32xf32> to vector<8x32xf32>
    %132 = vector.extract_strided_slice %28 {offsets = [32, 0], sizes = [8, 128], strides = [1, 1]} : vector<64x256xf32> to vector<8x128xf32>
    %133 = vector.extract_strided_slice %28 {offsets = [24, 128], sizes = [8, 128], strides = [1, 1]} : vector<64x256xf32> to vector<8x128xf32>
    %134 = tpu.concatenate %132, %133 in 0 : vector<8x128xf32>, vector<8x128xf32> -> vector<16x128xf32>
    %cst_19 = arith.constant dense<0.000000e+00> : vector<16x128xf32>
    %135 = tpu.matmul %129, %29, %cst_19 {dimension_numbers = #tpu.dot_dimension_numbers<[1], [0], [0], [1], [0, 0, 1, 1], [], []>} : vector<16x64xf32>, vector<64x128xf32>, vector<16x128xf32> -> vector<16x128xf32>
    %136 = arith.addf %134, %135 : vector<16x128xf32>
    %137 = math.tanh %136 : vector<16x128xf32>
    %138 = arith.negf %136 : vector<16x128xf32>
    %139 = math.exp %138 : vector<16x128xf32>
    %cst_20 = arith.constant 1.000000e+00 : f32
    %140 = vector.broadcast %cst_20 : f32 to vector<16x128xf32>
    %141 = arith.addf %140, %139 : vector<16x128xf32>
    %142 = arith.divf %140, %141 : vector<16x128xf32>
    %143 = arith.select %5, %137, %142 : vector<16x128xi1>, vector<16x128xf32>
    %144 = vector.extract_strided_slice %143 {offsets = [0, 0], sizes = [16, 32], strides = [1, 1]} : vector<16x128xf32> to vector<16x32xf32>
    %145 = vector.extract_strided_slice %143 {offsets = [0, 32], sizes = [16, 32], strides = [1, 1]} : vector<16x128xf32> to vector<16x32xf32>
    %146 = vector.extract_strided_slice %143 {offsets = [0, 64], sizes = [16, 32], strides = [1, 1]} : vector<16x128xf32> to vector<16x32xf32>
    %147 = vector.extract_strided_slice %143 {offsets = [0, 96], sizes = [16, 32], strides = [1, 1]} : vector<16x128xf32> to vector<16x32xf32>
    %148 = arith.mulf %145, %125 : vector<16x32xf32>
    %149 = arith.mulf %144, %146 : vector<16x32xf32>
    %150 = arith.addf %148, %149 : vector<16x32xf32>
    %151 = math.tanh %150 : vector<16x32xf32>
    %152 = arith.mulf %147, %151 : vector<16x32xf32>
    %153 = tpu.concatenate %152, %152 in 1 : vector<16x32xf32>, vector<16x32xf32> -> vector<16x64xf32>
    %154 = arith.mulf %153, %22 : vector<16x64xf32>
    %155 = vector.extract_strided_slice %152 {offsets = [0, 0], sizes = [8, 32], strides = [1, 1]} : vector<16x32xf32> to vector<8x32xf32>
    %156 = vector.extract_strided_slice %152 {offsets = [8, 0], sizes = [8, 32], strides = [1, 1]} : vector<16x32xf32> to vector<8x32xf32>
    %157 = vector.extract_strided_slice %28 {offsets = [40, 0], sizes = [8, 128], strides = [1, 1]} : vector<64x256xf32> to vector<8x128xf32>
    %158 = vector.extract_strided_slice %28 {offsets = [16, 128], sizes = [8, 128], strides = [1, 1]} : vector<64x256xf32> to vector<8x128xf32>
    %159 = tpu.concatenate %157, %158 in 0 : vector<8x128xf32>, vector<8x128xf32> -> vector<16x128xf32>
    %cst_21 = arith.constant dense<0.000000e+00> : vector<16x128xf32>
    %160 = tpu.matmul %154, %29, %cst_21 {dimension_numbers = #tpu.dot_dimension_numbers<[1], [0], [0], [1], [0, 0, 1, 1], [], []>} : vector<16x64xf32>, vector<64x128xf32>, vector<16x128xf32> -> vector<16x128xf32>
    %161 = arith.addf %159, %160 : vector<16x128xf32>
    %162 = math.tanh %161 : vector<16x128xf32>
    %163 = arith.negf %161 : vector<16x128xf32>
    %164 = math.exp %163 : vector<16x128xf32>
    %cst_22 = arith.constant 1.000000e+00 : f32
    %165 = vector.broadcast %cst_22 : f32 to vector<16x128xf32>
    %166 = arith.addf %165, %164 : vector<16x128xf32>
    %167 = arith.divf %165, %166 : vector<16x128xf32>
    %168 = arith.select %5, %162, %167 : vector<16x128xi1>, vector<16x128xf32>
    %169 = vector.extract_strided_slice %168 {offsets = [0, 0], sizes = [16, 32], strides = [1, 1]} : vector<16x128xf32> to vector<16x32xf32>
    %170 = vector.extract_strided_slice %168 {offsets = [0, 32], sizes = [16, 32], strides = [1, 1]} : vector<16x128xf32> to vector<16x32xf32>
    %171 = vector.extract_strided_slice %168 {offsets = [0, 64], sizes = [16, 32], strides = [1, 1]} : vector<16x128xf32> to vector<16x32xf32>
    %172 = vector.extract_strided_slice %168 {offsets = [0, 96], sizes = [16, 32], strides = [1, 1]} : vector<16x128xf32> to vector<16x32xf32>
    %173 = arith.mulf %170, %150 : vector<16x32xf32>
    %174 = arith.mulf %169, %171 : vector<16x32xf32>
    %175 = arith.addf %173, %174 : vector<16x32xf32>
    %176 = math.tanh %175 : vector<16x32xf32>
    %177 = arith.mulf %172, %176 : vector<16x32xf32>
    %178 = tpu.concatenate %177, %177 in 1 : vector<16x32xf32>, vector<16x32xf32> -> vector<16x64xf32>
    %179 = arith.mulf %178, %22 : vector<16x64xf32>
    %180 = vector.extract_strided_slice %177 {offsets = [0, 0], sizes = [8, 32], strides = [1, 1]} : vector<16x32xf32> to vector<8x32xf32>
    %181 = vector.extract_strided_slice %177 {offsets = [8, 0], sizes = [8, 32], strides = [1, 1]} : vector<16x32xf32> to vector<8x32xf32>
    %182 = vector.extract_strided_slice %28 {offsets = [48, 0], sizes = [8, 128], strides = [1, 1]} : vector<64x256xf32> to vector<8x128xf32>
    %183 = vector.extract_strided_slice %28 {offsets = [8, 128], sizes = [8, 128], strides = [1, 1]} : vector<64x256xf32> to vector<8x128xf32>
    %184 = tpu.concatenate %182, %183 in 0 : vector<8x128xf32>, vector<8x128xf32> -> vector<16x128xf32>
    %cst_23 = arith.constant dense<0.000000e+00> : vector<16x128xf32>
    %185 = tpu.matmul %179, %29, %cst_23 {dimension_numbers = #tpu.dot_dimension_numbers<[1], [0], [0], [1], [0, 0, 1, 1], [], []>} : vector<16x64xf32>, vector<64x128xf32>, vector<16x128xf32> -> vector<16x128xf32>
    %186 = arith.addf %184, %185 : vector<16x128xf32>
    %187 = math.tanh %186 : vector<16x128xf32>
    %188 = arith.negf %186 : vector<16x128xf32>
    %189 = math.exp %188 : vector<16x128xf32>
    %cst_24 = arith.constant 1.000000e+00 : f32
    %190 = vector.broadcast %cst_24 : f32 to vector<16x128xf32>
    %191 = arith.addf %190, %189 : vector<16x128xf32>
    %192 = arith.divf %190, %191 : vector<16x128xf32>
    %193 = arith.select %5, %187, %192 : vector<16x128xi1>, vector<16x128xf32>
    %194 = vector.extract_strided_slice %193 {offsets = [0, 0], sizes = [16, 32], strides = [1, 1]} : vector<16x128xf32> to vector<16x32xf32>
    %195 = vector.extract_strided_slice %193 {offsets = [0, 32], sizes = [16, 32], strides = [1, 1]} : vector<16x128xf32> to vector<16x32xf32>
    %196 = vector.extract_strided_slice %193 {offsets = [0, 64], sizes = [16, 32], strides = [1, 1]} : vector<16x128xf32> to vector<16x32xf32>
    %197 = vector.extract_strided_slice %193 {offsets = [0, 96], sizes = [16, 32], strides = [1, 1]} : vector<16x128xf32> to vector<16x32xf32>
    %198 = arith.mulf %195, %175 : vector<16x32xf32>
    %199 = arith.mulf %194, %196 : vector<16x32xf32>
    %200 = arith.addf %198, %199 : vector<16x32xf32>
    %201 = math.tanh %200 : vector<16x32xf32>
    %202 = arith.mulf %197, %201 : vector<16x32xf32>
    %203 = tpu.concatenate %202, %202 in 1 : vector<16x32xf32>, vector<16x32xf32> -> vector<16x64xf32>
    %204 = arith.mulf %203, %22 : vector<16x64xf32>
    %205 = vector.extract_strided_slice %202 {offsets = [0, 0], sizes = [8, 32], strides = [1, 1]} : vector<16x32xf32> to vector<8x32xf32>
    %206 = vector.extract_strided_slice %202 {offsets = [8, 0], sizes = [8, 32], strides = [1, 1]} : vector<16x32xf32> to vector<8x32xf32>
    %207 = vector.extract_strided_slice %28 {offsets = [56, 0], sizes = [8, 128], strides = [1, 1]} : vector<64x256xf32> to vector<8x128xf32>
    %208 = vector.extract_strided_slice %28 {offsets = [0, 128], sizes = [8, 128], strides = [1, 1]} : vector<64x256xf32> to vector<8x128xf32>
    %209 = tpu.concatenate %207, %208 in 0 : vector<8x128xf32>, vector<8x128xf32> -> vector<16x128xf32>
    %cst_25 = arith.constant dense<0.000000e+00> : vector<16x128xf32>
    %210 = tpu.matmul %204, %29, %cst_25 {dimension_numbers = #tpu.dot_dimension_numbers<[1], [0], [0], [1], [0, 0, 1, 1], [], []>} : vector<16x64xf32>, vector<64x128xf32>, vector<16x128xf32> -> vector<16x128xf32>
    %211 = arith.addf %209, %210 : vector<16x128xf32>
    %212 = math.tanh %211 : vector<16x128xf32>
    %213 = arith.negf %211 : vector<16x128xf32>
    %214 = math.exp %213 : vector<16x128xf32>
    %cst_26 = arith.constant 1.000000e+00 : f32
    %215 = vector.broadcast %cst_26 : f32 to vector<16x128xf32>
    %216 = arith.addf %215, %214 : vector<16x128xf32>
    %217 = arith.divf %215, %216 : vector<16x128xf32>
    %218 = arith.select %5, %212, %217 : vector<16x128xi1>, vector<16x128xf32>
    %219 = vector.extract_strided_slice %218 {offsets = [0, 0], sizes = [16, 32], strides = [1, 1]} : vector<16x128xf32> to vector<16x32xf32>
    %220 = vector.extract_strided_slice %218 {offsets = [0, 32], sizes = [16, 32], strides = [1, 1]} : vector<16x128xf32> to vector<16x32xf32>
    %221 = vector.extract_strided_slice %218 {offsets = [0, 64], sizes = [16, 32], strides = [1, 1]} : vector<16x128xf32> to vector<16x32xf32>
    %222 = vector.extract_strided_slice %218 {offsets = [0, 96], sizes = [16, 32], strides = [1, 1]} : vector<16x128xf32> to vector<16x32xf32>
    %223 = arith.mulf %220, %200 : vector<16x32xf32>
    %224 = arith.mulf %219, %221 : vector<16x32xf32>
    %225 = arith.addf %223, %224 : vector<16x32xf32>
    %226 = math.tanh %225 : vector<16x32xf32>
    %227 = arith.mulf %222, %226 : vector<16x32xf32>
    %228 = vector.extract_strided_slice %227 {offsets = [0, 0], sizes = [8, 32], strides = [1, 1]} : vector<16x32xf32> to vector<8x32xf32>
    %229 = vector.extract_strided_slice %227 {offsets = [8, 0], sizes = [8, 32], strides = [1, 1]} : vector<16x32xf32> to vector<8x32xf32>
    %230 = tpu.concatenate %55, %80, %105, %130, %155, %180, %205, %228 in 0 : vector<8x32xf32>, vector<8x32xf32>, vector<8x32xf32>, vector<8x32xf32>, vector<8x32xf32>, vector<8x32xf32>, vector<8x32xf32>, vector<8x32xf32> -> vector<64x32xf32>
    %231 = tpu.concatenate %229, %206, %181, %156, %131, %106, %81, %56 in 0 : vector<8x32xf32>, vector<8x32xf32>, vector<8x32xf32>, vector<8x32xf32>, vector<8x32xf32>, vector<8x32xf32>, vector<8x32xf32>, vector<8x32xf32> -> vector<64x32xf32>
    %232 = tpu.concatenate %230, %231 in 1 : vector<64x32xf32>, vector<64x32xf32> -> vector<64x64xf32>
    %c0_27 = arith.constant 0 : index
    %c0_28 = arith.constant 0 : index
    %233 = vector.load %arg5[%c0_27, %c0_28] : memref<64x256xf32, #tpu.memory_space<vmem>>, vector<64x256xf32>
    %cst_29 = arith.constant dense<0.000000e+00> : vector<64x256xf32>
    %234 = tpu.matmul %232, %233, %cst_29 {dimension_numbers = #tpu.dot_dimension_numbers<[1], [0], [0], [1], [0, 0, 1, 1], [], []>} : vector<64x64xf32>, vector<64x256xf32>, vector<64x256xf32> -> vector<64x256xf32>
    %c0_30 = arith.constant 0 : index
    %c0_31 = arith.constant 0 : index
    %235 = vector.load %arg6[%c0_30, %c0_31] : memref<1x256xf32, #tpu.memory_space<vmem>>, vector<1x256xf32>
    %236 = vector.broadcast %235 : vector<1x256xf32> to vector<64x256xf32>
    %237 = arith.addf %234, %236 : vector<64x256xf32>
    %c0_32 = arith.constant 0 : index
    %c0_33 = arith.constant 0 : index
    %238 = vector.load %arg7[%c0_32, %c0_33] : memref<64x128xf32, #tpu.memory_space<vmem>>, vector<64x128xf32>
    %cst_34 = arith.constant 0.000000e+00 : f32
    %239 = vector.broadcast %cst_34 : f32 to vector<16x64xf32>
    %cst_35 = arith.constant 0.000000e+00 : f32
    %240 = vector.broadcast %cst_35 : f32 to vector<16x32xf32>
    %241 = vector.extract_strided_slice %237 {offsets = [0, 0], sizes = [8, 128], strides = [1, 1]} : vector<64x256xf32> to vector<8x128xf32>
    %242 = vector.extract_strided_slice %237 {offsets = [56, 128], sizes = [8, 128], strides = [1, 1]} : vector<64x256xf32> to vector<8x128xf32>
    %243 = tpu.concatenate %241, %242 in 0 : vector<8x128xf32>, vector<8x128xf32> -> vector<16x128xf32>
    %cst_36 = arith.constant dense<0.000000e+00> : vector<16x128xf32>
    %244 = tpu.matmul %239, %238, %cst_36 {dimension_numbers = #tpu.dot_dimension_numbers<[1], [0], [0], [1], [0, 0, 1, 1], [], []>} : vector<16x64xf32>, vector<64x128xf32>, vector<16x128xf32> -> vector<16x128xf32>
    %245 = arith.addf %243, %244 : vector<16x128xf32>
    %246 = math.tanh %245 : vector<16x128xf32>
    %247 = arith.negf %245 : vector<16x128xf32>
    %248 = math.exp %247 : vector<16x128xf32>
    %cst_37 = arith.constant 1.000000e+00 : f32
    %249 = vector.broadcast %cst_37 : f32 to vector<16x128xf32>
    %250 = arith.addf %249, %248 : vector<16x128xf32>
    %251 = arith.divf %249, %250 : vector<16x128xf32>
    %252 = arith.select %5, %246, %251 : vector<16x128xi1>, vector<16x128xf32>
    %253 = vector.extract_strided_slice %252 {offsets = [0, 0], sizes = [16, 32], strides = [1, 1]} : vector<16x128xf32> to vector<16x32xf32>
    %254 = vector.extract_strided_slice %252 {offsets = [0, 32], sizes = [16, 32], strides = [1, 1]} : vector<16x128xf32> to vector<16x32xf32>
    %255 = vector.extract_strided_slice %252 {offsets = [0, 64], sizes = [16, 32], strides = [1, 1]} : vector<16x128xf32> to vector<16x32xf32>
    %256 = vector.extract_strided_slice %252 {offsets = [0, 96], sizes = [16, 32], strides = [1, 1]} : vector<16x128xf32> to vector<16x32xf32>
    %257 = arith.mulf %254, %240 : vector<16x32xf32>
    %258 = arith.mulf %253, %255 : vector<16x32xf32>
    %259 = arith.addf %257, %258 : vector<16x32xf32>
    %260 = math.tanh %259 : vector<16x32xf32>
    %261 = arith.mulf %256, %260 : vector<16x32xf32>
    %262 = tpu.concatenate %261, %261 in 1 : vector<16x32xf32>, vector<16x32xf32> -> vector<16x64xf32>
    %263 = arith.mulf %262, %22 : vector<16x64xf32>
    %264 = vector.extract_strided_slice %261 {offsets = [0, 0], sizes = [8, 32], strides = [1, 1]} : vector<16x32xf32> to vector<8x32xf32>
    %265 = vector.extract_strided_slice %261 {offsets = [8, 0], sizes = [8, 32], strides = [1, 1]} : vector<16x32xf32> to vector<8x32xf32>
    %266 = vector.extract_strided_slice %237 {offsets = [8, 0], sizes = [8, 128], strides = [1, 1]} : vector<64x256xf32> to vector<8x128xf32>
    %267 = vector.extract_strided_slice %237 {offsets = [48, 128], sizes = [8, 128], strides = [1, 1]} : vector<64x256xf32> to vector<8x128xf32>
    %268 = tpu.concatenate %266, %267 in 0 : vector<8x128xf32>, vector<8x128xf32> -> vector<16x128xf32>
    %cst_38 = arith.constant dense<0.000000e+00> : vector<16x128xf32>
    %269 = tpu.matmul %263, %238, %cst_38 {dimension_numbers = #tpu.dot_dimension_numbers<[1], [0], [0], [1], [0, 0, 1, 1], [], []>} : vector<16x64xf32>, vector<64x128xf32>, vector<16x128xf32> -> vector<16x128xf32>
    %270 = arith.addf %268, %269 : vector<16x128xf32>
    %271 = math.tanh %270 : vector<16x128xf32>
    %272 = arith.negf %270 : vector<16x128xf32>
    %273 = math.exp %272 : vector<16x128xf32>
    %cst_39 = arith.constant 1.000000e+00 : f32
    %274 = vector.broadcast %cst_39 : f32 to vector<16x128xf32>
    %275 = arith.addf %274, %273 : vector<16x128xf32>
    %276 = arith.divf %274, %275 : vector<16x128xf32>
    %277 = arith.select %5, %271, %276 : vector<16x128xi1>, vector<16x128xf32>
    %278 = vector.extract_strided_slice %277 {offsets = [0, 0], sizes = [16, 32], strides = [1, 1]} : vector<16x128xf32> to vector<16x32xf32>
    %279 = vector.extract_strided_slice %277 {offsets = [0, 32], sizes = [16, 32], strides = [1, 1]} : vector<16x128xf32> to vector<16x32xf32>
    %280 = vector.extract_strided_slice %277 {offsets = [0, 64], sizes = [16, 32], strides = [1, 1]} : vector<16x128xf32> to vector<16x32xf32>
    %281 = vector.extract_strided_slice %277 {offsets = [0, 96], sizes = [16, 32], strides = [1, 1]} : vector<16x128xf32> to vector<16x32xf32>
    %282 = arith.mulf %279, %259 : vector<16x32xf32>
    %283 = arith.mulf %278, %280 : vector<16x32xf32>
    %284 = arith.addf %282, %283 : vector<16x32xf32>
    %285 = math.tanh %284 : vector<16x32xf32>
    %286 = arith.mulf %281, %285 : vector<16x32xf32>
    %287 = tpu.concatenate %286, %286 in 1 : vector<16x32xf32>, vector<16x32xf32> -> vector<16x64xf32>
    %288 = arith.mulf %287, %22 : vector<16x64xf32>
    %289 = vector.extract_strided_slice %286 {offsets = [0, 0], sizes = [8, 32], strides = [1, 1]} : vector<16x32xf32> to vector<8x32xf32>
    %290 = vector.extract_strided_slice %286 {offsets = [8, 0], sizes = [8, 32], strides = [1, 1]} : vector<16x32xf32> to vector<8x32xf32>
    %291 = vector.extract_strided_slice %237 {offsets = [16, 0], sizes = [8, 128], strides = [1, 1]} : vector<64x256xf32> to vector<8x128xf32>
    %292 = vector.extract_strided_slice %237 {offsets = [40, 128], sizes = [8, 128], strides = [1, 1]} : vector<64x256xf32> to vector<8x128xf32>
    %293 = tpu.concatenate %291, %292 in 0 : vector<8x128xf32>, vector<8x128xf32> -> vector<16x128xf32>
    %cst_40 = arith.constant dense<0.000000e+00> : vector<16x128xf32>
    %294 = tpu.matmul %288, %238, %cst_40 {dimension_numbers = #tpu.dot_dimension_numbers<[1], [0], [0], [1], [0, 0, 1, 1], [], []>} : vector<16x64xf32>, vector<64x128xf32>, vector<16x128xf32> -> vector<16x128xf32>
    %295 = arith.addf %293, %294 : vector<16x128xf32>
    %296 = math.tanh %295 : vector<16x128xf32>
    %297 = arith.negf %295 : vector<16x128xf32>
    %298 = math.exp %297 : vector<16x128xf32>
    %cst_41 = arith.constant 1.000000e+00 : f32
    %299 = vector.broadcast %cst_41 : f32 to vector<16x128xf32>
    %300 = arith.addf %299, %298 : vector<16x128xf32>
    %301 = arith.divf %299, %300 : vector<16x128xf32>
    %302 = arith.select %5, %296, %301 : vector<16x128xi1>, vector<16x128xf32>
    %303 = vector.extract_strided_slice %302 {offsets = [0, 0], sizes = [16, 32], strides = [1, 1]} : vector<16x128xf32> to vector<16x32xf32>
    %304 = vector.extract_strided_slice %302 {offsets = [0, 32], sizes = [16, 32], strides = [1, 1]} : vector<16x128xf32> to vector<16x32xf32>
    %305 = vector.extract_strided_slice %302 {offsets = [0, 64], sizes = [16, 32], strides = [1, 1]} : vector<16x128xf32> to vector<16x32xf32>
    %306 = vector.extract_strided_slice %302 {offsets = [0, 96], sizes = [16, 32], strides = [1, 1]} : vector<16x128xf32> to vector<16x32xf32>
    %307 = arith.mulf %304, %284 : vector<16x32xf32>
    %308 = arith.mulf %303, %305 : vector<16x32xf32>
    %309 = arith.addf %307, %308 : vector<16x32xf32>
    %310 = math.tanh %309 : vector<16x32xf32>
    %311 = arith.mulf %306, %310 : vector<16x32xf32>
    %312 = tpu.concatenate %311, %311 in 1 : vector<16x32xf32>, vector<16x32xf32> -> vector<16x64xf32>
    %313 = arith.mulf %312, %22 : vector<16x64xf32>
    %314 = vector.extract_strided_slice %311 {offsets = [0, 0], sizes = [8, 32], strides = [1, 1]} : vector<16x32xf32> to vector<8x32xf32>
    %315 = vector.extract_strided_slice %311 {offsets = [8, 0], sizes = [8, 32], strides = [1, 1]} : vector<16x32xf32> to vector<8x32xf32>
    %316 = vector.extract_strided_slice %237 {offsets = [24, 0], sizes = [8, 128], strides = [1, 1]} : vector<64x256xf32> to vector<8x128xf32>
    %317 = vector.extract_strided_slice %237 {offsets = [32, 128], sizes = [8, 128], strides = [1, 1]} : vector<64x256xf32> to vector<8x128xf32>
    %318 = tpu.concatenate %316, %317 in 0 : vector<8x128xf32>, vector<8x128xf32> -> vector<16x128xf32>
    %cst_42 = arith.constant dense<0.000000e+00> : vector<16x128xf32>
    %319 = tpu.matmul %313, %238, %cst_42 {dimension_numbers = #tpu.dot_dimension_numbers<[1], [0], [0], [1], [0, 0, 1, 1], [], []>} : vector<16x64xf32>, vector<64x128xf32>, vector<16x128xf32> -> vector<16x128xf32>
    %320 = arith.addf %318, %319 : vector<16x128xf32>
    %321 = math.tanh %320 : vector<16x128xf32>
    %322 = arith.negf %320 : vector<16x128xf32>
    %323 = math.exp %322 : vector<16x128xf32>
    %cst_43 = arith.constant 1.000000e+00 : f32
    %324 = vector.broadcast %cst_43 : f32 to vector<16x128xf32>
    %325 = arith.addf %324, %323 : vector<16x128xf32>
    %326 = arith.divf %324, %325 : vector<16x128xf32>
    %327 = arith.select %5, %321, %326 : vector<16x128xi1>, vector<16x128xf32>
    %328 = vector.extract_strided_slice %327 {offsets = [0, 0], sizes = [16, 32], strides = [1, 1]} : vector<16x128xf32> to vector<16x32xf32>
    %329 = vector.extract_strided_slice %327 {offsets = [0, 32], sizes = [16, 32], strides = [1, 1]} : vector<16x128xf32> to vector<16x32xf32>
    %330 = vector.extract_strided_slice %327 {offsets = [0, 64], sizes = [16, 32], strides = [1, 1]} : vector<16x128xf32> to vector<16x32xf32>
    %331 = vector.extract_strided_slice %327 {offsets = [0, 96], sizes = [16, 32], strides = [1, 1]} : vector<16x128xf32> to vector<16x32xf32>
    %332 = arith.mulf %329, %309 : vector<16x32xf32>
    %333 = arith.mulf %328, %330 : vector<16x32xf32>
    %334 = arith.addf %332, %333 : vector<16x32xf32>
    %335 = math.tanh %334 : vector<16x32xf32>
    %336 = arith.mulf %331, %335 : vector<16x32xf32>
    %337 = tpu.concatenate %336, %336 in 1 : vector<16x32xf32>, vector<16x32xf32> -> vector<16x64xf32>
    %338 = arith.mulf %337, %22 : vector<16x64xf32>
    %339 = vector.extract_strided_slice %336 {offsets = [0, 0], sizes = [8, 32], strides = [1, 1]} : vector<16x32xf32> to vector<8x32xf32>
    %340 = vector.extract_strided_slice %336 {offsets = [8, 0], sizes = [8, 32], strides = [1, 1]} : vector<16x32xf32> to vector<8x32xf32>
    %341 = vector.extract_strided_slice %237 {offsets = [32, 0], sizes = [8, 128], strides = [1, 1]} : vector<64x256xf32> to vector<8x128xf32>
    %342 = vector.extract_strided_slice %237 {offsets = [24, 128], sizes = [8, 128], strides = [1, 1]} : vector<64x256xf32> to vector<8x128xf32>
    %343 = tpu.concatenate %341, %342 in 0 : vector<8x128xf32>, vector<8x128xf32> -> vector<16x128xf32>
    %cst_44 = arith.constant dense<0.000000e+00> : vector<16x128xf32>
    %344 = tpu.matmul %338, %238, %cst_44 {dimension_numbers = #tpu.dot_dimension_numbers<[1], [0], [0], [1], [0, 0, 1, 1], [], []>} : vector<16x64xf32>, vector<64x128xf32>, vector<16x128xf32> -> vector<16x128xf32>
    %345 = arith.addf %343, %344 : vector<16x128xf32>
    %346 = math.tanh %345 : vector<16x128xf32>
    %347 = arith.negf %345 : vector<16x128xf32>
    %348 = math.exp %347 : vector<16x128xf32>
    %cst_45 = arith.constant 1.000000e+00 : f32
    %349 = vector.broadcast %cst_45 : f32 to vector<16x128xf32>
    %350 = arith.addf %349, %348 : vector<16x128xf32>
    %351 = arith.divf %349, %350 : vector<16x128xf32>
    %352 = arith.select %5, %346, %351 : vector<16x128xi1>, vector<16x128xf32>
    %353 = vector.extract_strided_slice %352 {offsets = [0, 0], sizes = [16, 32], strides = [1, 1]} : vector<16x128xf32> to vector<16x32xf32>
    %354 = vector.extract_strided_slice %352 {offsets = [0, 32], sizes = [16, 32], strides = [1, 1]} : vector<16x128xf32> to vector<16x32xf32>
    %355 = vector.extract_strided_slice %352 {offsets = [0, 64], sizes = [16, 32], strides = [1, 1]} : vector<16x128xf32> to vector<16x32xf32>
    %356 = vector.extract_strided_slice %352 {offsets = [0, 96], sizes = [16, 32], strides = [1, 1]} : vector<16x128xf32> to vector<16x32xf32>
    %357 = arith.mulf %354, %334 : vector<16x32xf32>
    %358 = arith.mulf %353, %355 : vector<16x32xf32>
    %359 = arith.addf %357, %358 : vector<16x32xf32>
    %360 = math.tanh %359 : vector<16x32xf32>
    %361 = arith.mulf %356, %360 : vector<16x32xf32>
    %362 = tpu.concatenate %361, %361 in 1 : vector<16x32xf32>, vector<16x32xf32> -> vector<16x64xf32>
    %363 = arith.mulf %362, %22 : vector<16x64xf32>
    %364 = vector.extract_strided_slice %361 {offsets = [0, 0], sizes = [8, 32], strides = [1, 1]} : vector<16x32xf32> to vector<8x32xf32>
    %365 = vector.extract_strided_slice %361 {offsets = [8, 0], sizes = [8, 32], strides = [1, 1]} : vector<16x32xf32> to vector<8x32xf32>
    %366 = vector.extract_strided_slice %237 {offsets = [40, 0], sizes = [8, 128], strides = [1, 1]} : vector<64x256xf32> to vector<8x128xf32>
    %367 = vector.extract_strided_slice %237 {offsets = [16, 128], sizes = [8, 128], strides = [1, 1]} : vector<64x256xf32> to vector<8x128xf32>
    %368 = tpu.concatenate %366, %367 in 0 : vector<8x128xf32>, vector<8x128xf32> -> vector<16x128xf32>
    %cst_46 = arith.constant dense<0.000000e+00> : vector<16x128xf32>
    %369 = tpu.matmul %363, %238, %cst_46 {dimension_numbers = #tpu.dot_dimension_numbers<[1], [0], [0], [1], [0, 0, 1, 1], [], []>} : vector<16x64xf32>, vector<64x128xf32>, vector<16x128xf32> -> vector<16x128xf32>
    %370 = arith.addf %368, %369 : vector<16x128xf32>
    %371 = math.tanh %370 : vector<16x128xf32>
    %372 = arith.negf %370 : vector<16x128xf32>
    %373 = math.exp %372 : vector<16x128xf32>
    %cst_47 = arith.constant 1.000000e+00 : f32
    %374 = vector.broadcast %cst_47 : f32 to vector<16x128xf32>
    %375 = arith.addf %374, %373 : vector<16x128xf32>
    %376 = arith.divf %374, %375 : vector<16x128xf32>
    %377 = arith.select %5, %371, %376 : vector<16x128xi1>, vector<16x128xf32>
    %378 = vector.extract_strided_slice %377 {offsets = [0, 0], sizes = [16, 32], strides = [1, 1]} : vector<16x128xf32> to vector<16x32xf32>
    %379 = vector.extract_strided_slice %377 {offsets = [0, 32], sizes = [16, 32], strides = [1, 1]} : vector<16x128xf32> to vector<16x32xf32>
    %380 = vector.extract_strided_slice %377 {offsets = [0, 64], sizes = [16, 32], strides = [1, 1]} : vector<16x128xf32> to vector<16x32xf32>
    %381 = vector.extract_strided_slice %377 {offsets = [0, 96], sizes = [16, 32], strides = [1, 1]} : vector<16x128xf32> to vector<16x32xf32>
    %382 = arith.mulf %379, %359 : vector<16x32xf32>
    %383 = arith.mulf %378, %380 : vector<16x32xf32>
    %384 = arith.addf %382, %383 : vector<16x32xf32>
    %385 = math.tanh %384 : vector<16x32xf32>
    %386 = arith.mulf %381, %385 : vector<16x32xf32>
    %387 = tpu.concatenate %386, %386 in 1 : vector<16x32xf32>, vector<16x32xf32> -> vector<16x64xf32>
    %388 = arith.mulf %387, %22 : vector<16x64xf32>
    %389 = vector.extract_strided_slice %386 {offsets = [0, 0], sizes = [8, 32], strides = [1, 1]} : vector<16x32xf32> to vector<8x32xf32>
    %390 = vector.extract_strided_slice %386 {offsets = [8, 0], sizes = [8, 32], strides = [1, 1]} : vector<16x32xf32> to vector<8x32xf32>
    %391 = vector.extract_strided_slice %237 {offsets = [48, 0], sizes = [8, 128], strides = [1, 1]} : vector<64x256xf32> to vector<8x128xf32>
    %392 = vector.extract_strided_slice %237 {offsets = [8, 128], sizes = [8, 128], strides = [1, 1]} : vector<64x256xf32> to vector<8x128xf32>
    %393 = tpu.concatenate %391, %392 in 0 : vector<8x128xf32>, vector<8x128xf32> -> vector<16x128xf32>
    %cst_48 = arith.constant dense<0.000000e+00> : vector<16x128xf32>
    %394 = tpu.matmul %388, %238, %cst_48 {dimension_numbers = #tpu.dot_dimension_numbers<[1], [0], [0], [1], [0, 0, 1, 1], [], []>} : vector<16x64xf32>, vector<64x128xf32>, vector<16x128xf32> -> vector<16x128xf32>
    %395 = arith.addf %393, %394 : vector<16x128xf32>
    %396 = math.tanh %395 : vector<16x128xf32>
    %397 = arith.negf %395 : vector<16x128xf32>
    %398 = math.exp %397 : vector<16x128xf32>
    %cst_49 = arith.constant 1.000000e+00 : f32
    %399 = vector.broadcast %cst_49 : f32 to vector<16x128xf32>
    %400 = arith.addf %399, %398 : vector<16x128xf32>
    %401 = arith.divf %399, %400 : vector<16x128xf32>
    %402 = arith.select %5, %396, %401 : vector<16x128xi1>, vector<16x128xf32>
    %403 = vector.extract_strided_slice %402 {offsets = [0, 0], sizes = [16, 32], strides = [1, 1]} : vector<16x128xf32> to vector<16x32xf32>
    %404 = vector.extract_strided_slice %402 {offsets = [0, 32], sizes = [16, 32], strides = [1, 1]} : vector<16x128xf32> to vector<16x32xf32>
    %405 = vector.extract_strided_slice %402 {offsets = [0, 64], sizes = [16, 32], strides = [1, 1]} : vector<16x128xf32> to vector<16x32xf32>
    %406 = vector.extract_strided_slice %402 {offsets = [0, 96], sizes = [16, 32], strides = [1, 1]} : vector<16x128xf32> to vector<16x32xf32>
    %407 = arith.mulf %404, %384 : vector<16x32xf32>
    %408 = arith.mulf %403, %405 : vector<16x32xf32>
    %409 = arith.addf %407, %408 : vector<16x32xf32>
    %410 = math.tanh %409 : vector<16x32xf32>
    %411 = arith.mulf %406, %410 : vector<16x32xf32>
    %412 = tpu.concatenate %411, %411 in 1 : vector<16x32xf32>, vector<16x32xf32> -> vector<16x64xf32>
    %413 = arith.mulf %412, %22 : vector<16x64xf32>
    %414 = vector.extract_strided_slice %411 {offsets = [0, 0], sizes = [8, 32], strides = [1, 1]} : vector<16x32xf32> to vector<8x32xf32>
    %415 = vector.extract_strided_slice %411 {offsets = [8, 0], sizes = [8, 32], strides = [1, 1]} : vector<16x32xf32> to vector<8x32xf32>
    %416 = vector.extract_strided_slice %237 {offsets = [56, 0], sizes = [8, 128], strides = [1, 1]} : vector<64x256xf32> to vector<8x128xf32>
    %417 = vector.extract_strided_slice %237 {offsets = [0, 128], sizes = [8, 128], strides = [1, 1]} : vector<64x256xf32> to vector<8x128xf32>
    %418 = tpu.concatenate %416, %417 in 0 : vector<8x128xf32>, vector<8x128xf32> -> vector<16x128xf32>
    %cst_50 = arith.constant dense<0.000000e+00> : vector<16x128xf32>
    %419 = tpu.matmul %413, %238, %cst_50 {dimension_numbers = #tpu.dot_dimension_numbers<[1], [0], [0], [1], [0, 0, 1, 1], [], []>} : vector<16x64xf32>, vector<64x128xf32>, vector<16x128xf32> -> vector<16x128xf32>
    %420 = arith.addf %418, %419 : vector<16x128xf32>
    %421 = math.tanh %420 : vector<16x128xf32>
    %422 = arith.negf %420 : vector<16x128xf32>
    %423 = math.exp %422 : vector<16x128xf32>
    %cst_51 = arith.constant 1.000000e+00 : f32
    %424 = vector.broadcast %cst_51 : f32 to vector<16x128xf32>
    %425 = arith.addf %424, %423 : vector<16x128xf32>
    %426 = arith.divf %424, %425 : vector<16x128xf32>
    %427 = arith.select %5, %421, %426 : vector<16x128xi1>, vector<16x128xf32>
    %428 = vector.extract_strided_slice %427 {offsets = [0, 0], sizes = [16, 32], strides = [1, 1]} : vector<16x128xf32> to vector<16x32xf32>
    %429 = vector.extract_strided_slice %427 {offsets = [0, 32], sizes = [16, 32], strides = [1, 1]} : vector<16x128xf32> to vector<16x32xf32>
    %430 = vector.extract_strided_slice %427 {offsets = [0, 64], sizes = [16, 32], strides = [1, 1]} : vector<16x128xf32> to vector<16x32xf32>
    %431 = vector.extract_strided_slice %427 {offsets = [0, 96], sizes = [16, 32], strides = [1, 1]} : vector<16x128xf32> to vector<16x32xf32>
    %432 = arith.mulf %429, %409 : vector<16x32xf32>
    %433 = arith.mulf %428, %430 : vector<16x32xf32>
    %434 = arith.addf %432, %433 : vector<16x32xf32>
    %435 = math.tanh %434 : vector<16x32xf32>
    %436 = arith.mulf %431, %435 : vector<16x32xf32>
    %437 = vector.extract_strided_slice %436 {offsets = [0, 0], sizes = [8, 32], strides = [1, 1]} : vector<16x32xf32> to vector<8x32xf32>
    %438 = vector.extract_strided_slice %436 {offsets = [8, 0], sizes = [8, 32], strides = [1, 1]} : vector<16x32xf32> to vector<8x32xf32>
    %439 = tpu.concatenate %264, %289, %314, %339, %364, %389, %414, %437 in 0 : vector<8x32xf32>, vector<8x32xf32>, vector<8x32xf32>, vector<8x32xf32>, vector<8x32xf32>, vector<8x32xf32>, vector<8x32xf32>, vector<8x32xf32> -> vector<64x32xf32>
    %440 = tpu.concatenate %438, %415, %390, %365, %340, %315, %290, %265 in 0 : vector<8x32xf32>, vector<8x32xf32>, vector<8x32xf32>, vector<8x32xf32>, vector<8x32xf32>, vector<8x32xf32>, vector<8x32xf32>, vector<8x32xf32> -> vector<64x32xf32>
    %441 = tpu.concatenate %439, %440 in 1 : vector<64x32xf32>, vector<64x32xf32> -> vector<64x64xf32>
    %442 = vector.extract_strided_slice %436 {offsets = [8, 0], sizes = [8, 32], strides = [1, 1]} : vector<16x32xf32> to vector<8x32xf32>
    %443 = vector.extract_strided_slice %434 {offsets = [8, 0], sizes = [8, 32], strides = [1, 1]} : vector<16x32xf32> to vector<8x32xf32>
    %c0_52 = arith.constant 0 : index
    %c0_53 = arith.constant 0 : index
    %444 = vector.load %arg8[%c0_52, %c0_53] : memref<1x32xf32, #tpu.memory_space<vmem>>, vector<1x32xf32>
    %445 = vector.broadcast %444 : vector<1x32xf32> to vector<8x32xf32>
    %446 = arith.mulf %442, %445 : vector<8x32xf32>
    %cst_54 = arith.constant dense<0.000000e+00> : vector<8xf32>
    %447 = vector.multi_reduction <add>, %446, %cst_54 [1] : vector<8x32xf32> to vector<8xf32>
    %448 = vector.shape_cast %447 : vector<8xf32> to vector<8x1xf32>
    %c0_55 = arith.constant 0 : index
    %c0_56 = arith.constant 0 : index
    %449 = vector.load %arg9[%c0_55, %c0_56] : memref<1x1xf32, #tpu.memory_space<vmem>>, vector<1x1xf32>
    %450 = vector.broadcast %449 : vector<1x1xf32> to vector<8x1xf32>
    %451 = arith.addf %448, %450 : vector<8x1xf32>
    %c0_57 = arith.constant 0 : index
    %c0_58 = arith.constant 0 : index
    %452 = vector.load %arg10[%c0_57, %c0_58] : memref<1x32xf32, #tpu.memory_space<vmem>>, vector<1x32xf32>
    %453 = vector.broadcast %452 : vector<1x32xf32> to vector<8x32xf32>
    %454 = arith.mulf %443, %453 : vector<8x32xf32>
    %cst_59 = arith.constant dense<0.000000e+00> : vector<8xf32>
    %455 = vector.multi_reduction <add>, %454, %cst_59 [1] : vector<8x32xf32> to vector<8xf32>
    %456 = vector.shape_cast %455 : vector<8xf32> to vector<8x1xf32>
    %c0_60 = arith.constant 0 : index
    %c0_61 = arith.constant 0 : index
    %457 = vector.load %arg11[%c0_60, %c0_61] : memref<1x1xf32, #tpu.memory_space<vmem>>, vector<1x1xf32>
    %458 = vector.broadcast %457 : vector<1x1xf32> to vector<8x1xf32>
    %459 = arith.addf %456, %458 : vector<8x1xf32>
    %c0_62 = arith.constant 0 : index
    %c0_63 = arith.constant 0 : index
    %460 = vector.load %arg12[%c0_62, %c0_63] : memref<64x128xf32, #tpu.memory_space<vmem>>, vector<64x128xf32>
    %cst_64 = arith.constant dense<0.000000e+00> : vector<64x128xf32>
    %461 = tpu.matmul %441, %460, %cst_64 {dimension_numbers = #tpu.dot_dimension_numbers<[1], [0], [0], [1], [0, 0, 1, 1], [], []>} : vector<64x64xf32>, vector<64x128xf32>, vector<64x128xf32> -> vector<64x128xf32>
    %c0_65 = arith.constant 0 : index
    %c0_66 = arith.constant 0 : index
    %462 = vector.load %arg14[%c0_65, %c0_66] : memref<1x128xf32, #tpu.memory_space<vmem>>, vector<1x128xf32>
    %463 = vector.broadcast %462 : vector<1x128xf32> to vector<64x128xf32>
    %464 = arith.addf %461, %463 : vector<64x128xf32>
    %c0_67 = arith.constant 0 : index
    %c0_68 = arith.constant 0 : index
    %465 = vector.load %arg13[%c0_67, %c0_68] : memref<1x128xf32, #tpu.memory_space<vmem>>, vector<1x128xf32>
    %466 = vector.extract_strided_slice %464 {offsets = [0, 0], sizes = [8, 128], strides = [1, 1]} : vector<64x128xf32> to vector<8x128xf32>
    %467 = vector.broadcast %451 : vector<8x1xf32> to vector<8x128xf32>
    %468 = vector.broadcast %465 : vector<1x128xf32> to vector<8x128xf32>
    %469 = arith.mulf %467, %468 : vector<8x128xf32>
    %470 = arith.addf %466, %469 : vector<8x128xf32>
    %471 = vector.extract_strided_slice %470 {offsets = [0, 0], sizes = [8, 1], strides = [1, 1]} : vector<8x128xf32> to vector<8x1xf32>
    %472 = arith.negf %471 : vector<8x1xf32>
    %473 = math.exp %472 : vector<8x1xf32>
    %cst_69 = arith.constant 1.000000e+00 : f32
    %474 = vector.broadcast %cst_69 : f32 to vector<8x1xf32>
    %475 = arith.addf %474, %473 : vector<8x1xf32>
    %476 = arith.divf %474, %475 : vector<8x1xf32>
    %477 = vector.extract_strided_slice %470 {offsets = [0, 1], sizes = [8, 1], strides = [1, 1]} : vector<8x128xf32> to vector<8x1xf32>
    %478 = arith.negf %477 : vector<8x1xf32>
    %479 = math.exp %478 : vector<8x1xf32>
    %cst_70 = arith.constant 1.000000e+00 : f32
    %480 = vector.broadcast %cst_70 : f32 to vector<8x1xf32>
    %481 = arith.addf %480, %479 : vector<8x1xf32>
    %482 = arith.divf %480, %481 : vector<8x1xf32>
    %483 = vector.extract_strided_slice %470 {offsets = [0, 2], sizes = [8, 1], strides = [1, 1]} : vector<8x128xf32> to vector<8x1xf32>
    %484 = math.tanh %483 : vector<8x1xf32>
    %485 = vector.extract_strided_slice %470 {offsets = [0, 3], sizes = [8, 1], strides = [1, 1]} : vector<8x128xf32> to vector<8x1xf32>
    %486 = arith.negf %485 : vector<8x1xf32>
    %487 = math.exp %486 : vector<8x1xf32>
    %cst_71 = arith.constant 1.000000e+00 : f32
    %488 = vector.broadcast %cst_71 : f32 to vector<8x1xf32>
    %489 = arith.addf %488, %487 : vector<8x1xf32>
    %490 = arith.divf %488, %489 : vector<8x1xf32>
    %491 = arith.mulf %482, %459 : vector<8x1xf32>
    %492 = arith.mulf %476, %484 : vector<8x1xf32>
    %493 = arith.addf %491, %492 : vector<8x1xf32>
    %494 = math.tanh %493 : vector<8x1xf32>
    %495 = arith.mulf %490, %494 : vector<8x1xf32>
    %496 = vector.extract_strided_slice %464 {offsets = [8, 0], sizes = [8, 128], strides = [1, 1]} : vector<64x128xf32> to vector<8x128xf32>
    %497 = vector.broadcast %495 : vector<8x1xf32> to vector<8x128xf32>
    %498 = vector.broadcast %465 : vector<1x128xf32> to vector<8x128xf32>
    %499 = arith.mulf %497, %498 : vector<8x128xf32>
    %500 = arith.addf %496, %499 : vector<8x128xf32>
    %501 = vector.extract_strided_slice %500 {offsets = [0, 0], sizes = [8, 1], strides = [1, 1]} : vector<8x128xf32> to vector<8x1xf32>
    %502 = arith.negf %501 : vector<8x1xf32>
    %503 = math.exp %502 : vector<8x1xf32>
    %cst_72 = arith.constant 1.000000e+00 : f32
    %504 = vector.broadcast %cst_72 : f32 to vector<8x1xf32>
    %505 = arith.addf %504, %503 : vector<8x1xf32>
    %506 = arith.divf %504, %505 : vector<8x1xf32>
    %507 = vector.extract_strided_slice %500 {offsets = [0, 1], sizes = [8, 1], strides = [1, 1]} : vector<8x128xf32> to vector<8x1xf32>
    %508 = arith.negf %507 : vector<8x1xf32>
    %509 = math.exp %508 : vector<8x1xf32>
    %cst_73 = arith.constant 1.000000e+00 : f32
    %510 = vector.broadcast %cst_73 : f32 to vector<8x1xf32>
    %511 = arith.addf %510, %509 : vector<8x1xf32>
    %512 = arith.divf %510, %511 : vector<8x1xf32>
    %513 = vector.extract_strided_slice %500 {offsets = [0, 2], sizes = [8, 1], strides = [1, 1]} : vector<8x128xf32> to vector<8x1xf32>
    %514 = math.tanh %513 : vector<8x1xf32>
    %515 = vector.extract_strided_slice %500 {offsets = [0, 3], sizes = [8, 1], strides = [1, 1]} : vector<8x128xf32> to vector<8x1xf32>
    %516 = arith.negf %515 : vector<8x1xf32>
    %517 = math.exp %516 : vector<8x1xf32>
    %cst_74 = arith.constant 1.000000e+00 : f32
    %518 = vector.broadcast %cst_74 : f32 to vector<8x1xf32>
    %519 = arith.addf %518, %517 : vector<8x1xf32>
    %520 = arith.divf %518, %519 : vector<8x1xf32>
    %521 = arith.mulf %512, %493 : vector<8x1xf32>
    %522 = arith.mulf %506, %514 : vector<8x1xf32>
    %523 = arith.addf %521, %522 : vector<8x1xf32>
    %524 = math.tanh %523 : vector<8x1xf32>
    %525 = arith.mulf %520, %524 : vector<8x1xf32>
    %526 = vector.extract_strided_slice %464 {offsets = [16, 0], sizes = [8, 128], strides = [1, 1]} : vector<64x128xf32> to vector<8x128xf32>
    %527 = vector.broadcast %525 : vector<8x1xf32> to vector<8x128xf32>
    %528 = vector.broadcast %465 : vector<1x128xf32> to vector<8x128xf32>
    %529 = arith.mulf %527, %528 : vector<8x128xf32>
    %530 = arith.addf %526, %529 : vector<8x128xf32>
    %531 = vector.extract_strided_slice %530 {offsets = [0, 0], sizes = [8, 1], strides = [1, 1]} : vector<8x128xf32> to vector<8x1xf32>
    %532 = arith.negf %531 : vector<8x1xf32>
    %533 = math.exp %532 : vector<8x1xf32>
    %cst_75 = arith.constant 1.000000e+00 : f32
    %534 = vector.broadcast %cst_75 : f32 to vector<8x1xf32>
    %535 = arith.addf %534, %533 : vector<8x1xf32>
    %536 = arith.divf %534, %535 : vector<8x1xf32>
    %537 = vector.extract_strided_slice %530 {offsets = [0, 1], sizes = [8, 1], strides = [1, 1]} : vector<8x128xf32> to vector<8x1xf32>
    %538 = arith.negf %537 : vector<8x1xf32>
    %539 = math.exp %538 : vector<8x1xf32>
    %cst_76 = arith.constant 1.000000e+00 : f32
    %540 = vector.broadcast %cst_76 : f32 to vector<8x1xf32>
    %541 = arith.addf %540, %539 : vector<8x1xf32>
    %542 = arith.divf %540, %541 : vector<8x1xf32>
    %543 = vector.extract_strided_slice %530 {offsets = [0, 2], sizes = [8, 1], strides = [1, 1]} : vector<8x128xf32> to vector<8x1xf32>
    %544 = math.tanh %543 : vector<8x1xf32>
    %545 = vector.extract_strided_slice %530 {offsets = [0, 3], sizes = [8, 1], strides = [1, 1]} : vector<8x128xf32> to vector<8x1xf32>
    %546 = arith.negf %545 : vector<8x1xf32>
    %547 = math.exp %546 : vector<8x1xf32>
    %cst_77 = arith.constant 1.000000e+00 : f32
    %548 = vector.broadcast %cst_77 : f32 to vector<8x1xf32>
    %549 = arith.addf %548, %547 : vector<8x1xf32>
    %550 = arith.divf %548, %549 : vector<8x1xf32>
    %551 = arith.mulf %542, %523 : vector<8x1xf32>
    %552 = arith.mulf %536, %544 : vector<8x1xf32>
    %553 = arith.addf %551, %552 : vector<8x1xf32>
    %554 = math.tanh %553 : vector<8x1xf32>
    %555 = arith.mulf %550, %554 : vector<8x1xf32>
    %556 = vector.extract_strided_slice %464 {offsets = [24, 0], sizes = [8, 128], strides = [1, 1]} : vector<64x128xf32> to vector<8x128xf32>
    %557 = vector.broadcast %555 : vector<8x1xf32> to vector<8x128xf32>
    %558 = vector.broadcast %465 : vector<1x128xf32> to vector<8x128xf32>
    %559 = arith.mulf %557, %558 : vector<8x128xf32>
    %560 = arith.addf %556, %559 : vector<8x128xf32>
    %561 = vector.extract_strided_slice %560 {offsets = [0, 0], sizes = [8, 1], strides = [1, 1]} : vector<8x128xf32> to vector<8x1xf32>
    %562 = arith.negf %561 : vector<8x1xf32>
    %563 = math.exp %562 : vector<8x1xf32>
    %cst_78 = arith.constant 1.000000e+00 : f32
    %564 = vector.broadcast %cst_78 : f32 to vector<8x1xf32>
    %565 = arith.addf %564, %563 : vector<8x1xf32>
    %566 = arith.divf %564, %565 : vector<8x1xf32>
    %567 = vector.extract_strided_slice %560 {offsets = [0, 1], sizes = [8, 1], strides = [1, 1]} : vector<8x128xf32> to vector<8x1xf32>
    %568 = arith.negf %567 : vector<8x1xf32>
    %569 = math.exp %568 : vector<8x1xf32>
    %cst_79 = arith.constant 1.000000e+00 : f32
    %570 = vector.broadcast %cst_79 : f32 to vector<8x1xf32>
    %571 = arith.addf %570, %569 : vector<8x1xf32>
    %572 = arith.divf %570, %571 : vector<8x1xf32>
    %573 = vector.extract_strided_slice %560 {offsets = [0, 2], sizes = [8, 1], strides = [1, 1]} : vector<8x128xf32> to vector<8x1xf32>
    %574 = math.tanh %573 : vector<8x1xf32>
    %575 = vector.extract_strided_slice %560 {offsets = [0, 3], sizes = [8, 1], strides = [1, 1]} : vector<8x128xf32> to vector<8x1xf32>
    %576 = arith.negf %575 : vector<8x1xf32>
    %577 = math.exp %576 : vector<8x1xf32>
    %cst_80 = arith.constant 1.000000e+00 : f32
    %578 = vector.broadcast %cst_80 : f32 to vector<8x1xf32>
    %579 = arith.addf %578, %577 : vector<8x1xf32>
    %580 = arith.divf %578, %579 : vector<8x1xf32>
    %581 = arith.mulf %572, %553 : vector<8x1xf32>
    %582 = arith.mulf %566, %574 : vector<8x1xf32>
    %583 = arith.addf %581, %582 : vector<8x1xf32>
    %584 = math.tanh %583 : vector<8x1xf32>
    %585 = arith.mulf %580, %584 : vector<8x1xf32>
    %586 = vector.extract_strided_slice %464 {offsets = [32, 0], sizes = [8, 128], strides = [1, 1]} : vector<64x128xf32> to vector<8x128xf32>
    %587 = vector.broadcast %585 : vector<8x1xf32> to vector<8x128xf32>
    %588 = vector.broadcast %465 : vector<1x128xf32> to vector<8x128xf32>
    %589 = arith.mulf %587, %588 : vector<8x128xf32>
    %590 = arith.addf %586, %589 : vector<8x128xf32>
    %591 = vector.extract_strided_slice %590 {offsets = [0, 0], sizes = [8, 1], strides = [1, 1]} : vector<8x128xf32> to vector<8x1xf32>
    %592 = arith.negf %591 : vector<8x1xf32>
    %593 = math.exp %592 : vector<8x1xf32>
    %cst_81 = arith.constant 1.000000e+00 : f32
    %594 = vector.broadcast %cst_81 : f32 to vector<8x1xf32>
    %595 = arith.addf %594, %593 : vector<8x1xf32>
    %596 = arith.divf %594, %595 : vector<8x1xf32>
    %597 = vector.extract_strided_slice %590 {offsets = [0, 1], sizes = [8, 1], strides = [1, 1]} : vector<8x128xf32> to vector<8x1xf32>
    %598 = arith.negf %597 : vector<8x1xf32>
    %599 = math.exp %598 : vector<8x1xf32>
    %cst_82 = arith.constant 1.000000e+00 : f32
    %600 = vector.broadcast %cst_82 : f32 to vector<8x1xf32>
    %601 = arith.addf %600, %599 : vector<8x1xf32>
    %602 = arith.divf %600, %601 : vector<8x1xf32>
    %603 = vector.extract_strided_slice %590 {offsets = [0, 2], sizes = [8, 1], strides = [1, 1]} : vector<8x128xf32> to vector<8x1xf32>
    %604 = math.tanh %603 : vector<8x1xf32>
    %605 = vector.extract_strided_slice %590 {offsets = [0, 3], sizes = [8, 1], strides = [1, 1]} : vector<8x128xf32> to vector<8x1xf32>
    %606 = arith.negf %605 : vector<8x1xf32>
    %607 = math.exp %606 : vector<8x1xf32>
    %cst_83 = arith.constant 1.000000e+00 : f32
    %608 = vector.broadcast %cst_83 : f32 to vector<8x1xf32>
    %609 = arith.addf %608, %607 : vector<8x1xf32>
    %610 = arith.divf %608, %609 : vector<8x1xf32>
    %611 = arith.mulf %602, %583 : vector<8x1xf32>
    %612 = arith.mulf %596, %604 : vector<8x1xf32>
    %613 = arith.addf %611, %612 : vector<8x1xf32>
    %614 = math.tanh %613 : vector<8x1xf32>
    %615 = arith.mulf %610, %614 : vector<8x1xf32>
    %616 = vector.extract_strided_slice %464 {offsets = [40, 0], sizes = [8, 128], strides = [1, 1]} : vector<64x128xf32> to vector<8x128xf32>
    %617 = vector.broadcast %615 : vector<8x1xf32> to vector<8x128xf32>
    %618 = vector.broadcast %465 : vector<1x128xf32> to vector<8x128xf32>
    %619 = arith.mulf %617, %618 : vector<8x128xf32>
    %620 = arith.addf %616, %619 : vector<8x128xf32>
    %621 = vector.extract_strided_slice %620 {offsets = [0, 0], sizes = [8, 1], strides = [1, 1]} : vector<8x128xf32> to vector<8x1xf32>
    %622 = arith.negf %621 : vector<8x1xf32>
    %623 = math.exp %622 : vector<8x1xf32>
    %cst_84 = arith.constant 1.000000e+00 : f32
    %624 = vector.broadcast %cst_84 : f32 to vector<8x1xf32>
    %625 = arith.addf %624, %623 : vector<8x1xf32>
    %626 = arith.divf %624, %625 : vector<8x1xf32>
    %627 = vector.extract_strided_slice %620 {offsets = [0, 1], sizes = [8, 1], strides = [1, 1]} : vector<8x128xf32> to vector<8x1xf32>
    %628 = arith.negf %627 : vector<8x1xf32>
    %629 = math.exp %628 : vector<8x1xf32>
    %cst_85 = arith.constant 1.000000e+00 : f32
    %630 = vector.broadcast %cst_85 : f32 to vector<8x1xf32>
    %631 = arith.addf %630, %629 : vector<8x1xf32>
    %632 = arith.divf %630, %631 : vector<8x1xf32>
    %633 = vector.extract_strided_slice %620 {offsets = [0, 2], sizes = [8, 1], strides = [1, 1]} : vector<8x128xf32> to vector<8x1xf32>
    %634 = math.tanh %633 : vector<8x1xf32>
    %635 = vector.extract_strided_slice %620 {offsets = [0, 3], sizes = [8, 1], strides = [1, 1]} : vector<8x128xf32> to vector<8x1xf32>
    %636 = arith.negf %635 : vector<8x1xf32>
    %637 = math.exp %636 : vector<8x1xf32>
    %cst_86 = arith.constant 1.000000e+00 : f32
    %638 = vector.broadcast %cst_86 : f32 to vector<8x1xf32>
    %639 = arith.addf %638, %637 : vector<8x1xf32>
    %640 = arith.divf %638, %639 : vector<8x1xf32>
    %641 = arith.mulf %632, %613 : vector<8x1xf32>
    %642 = arith.mulf %626, %634 : vector<8x1xf32>
    %643 = arith.addf %641, %642 : vector<8x1xf32>
    %644 = math.tanh %643 : vector<8x1xf32>
    %645 = arith.mulf %640, %644 : vector<8x1xf32>
    %646 = vector.extract_strided_slice %464 {offsets = [48, 0], sizes = [8, 128], strides = [1, 1]} : vector<64x128xf32> to vector<8x128xf32>
    %647 = vector.broadcast %645 : vector<8x1xf32> to vector<8x128xf32>
    %648 = vector.broadcast %465 : vector<1x128xf32> to vector<8x128xf32>
    %649 = arith.mulf %647, %648 : vector<8x128xf32>
    %650 = arith.addf %646, %649 : vector<8x128xf32>
    %651 = vector.extract_strided_slice %650 {offsets = [0, 0], sizes = [8, 1], strides = [1, 1]} : vector<8x128xf32> to vector<8x1xf32>
    %652 = arith.negf %651 : vector<8x1xf32>
    %653 = math.exp %652 : vector<8x1xf32>
    %cst_87 = arith.constant 1.000000e+00 : f32
    %654 = vector.broadcast %cst_87 : f32 to vector<8x1xf32>
    %655 = arith.addf %654, %653 : vector<8x1xf32>
    %656 = arith.divf %654, %655 : vector<8x1xf32>
    %657 = vector.extract_strided_slice %650 {offsets = [0, 1], sizes = [8, 1], strides = [1, 1]} : vector<8x128xf32> to vector<8x1xf32>
    %658 = arith.negf %657 : vector<8x1xf32>
    %659 = math.exp %658 : vector<8x1xf32>
    %cst_88 = arith.constant 1.000000e+00 : f32
    %660 = vector.broadcast %cst_88 : f32 to vector<8x1xf32>
    %661 = arith.addf %660, %659 : vector<8x1xf32>
    %662 = arith.divf %660, %661 : vector<8x1xf32>
    %663 = vector.extract_strided_slice %650 {offsets = [0, 2], sizes = [8, 1], strides = [1, 1]} : vector<8x128xf32> to vector<8x1xf32>
    %664 = math.tanh %663 : vector<8x1xf32>
    %665 = vector.extract_strided_slice %650 {offsets = [0, 3], sizes = [8, 1], strides = [1, 1]} : vector<8x128xf32> to vector<8x1xf32>
    %666 = arith.negf %665 : vector<8x1xf32>
    %667 = math.exp %666 : vector<8x1xf32>
    %cst_89 = arith.constant 1.000000e+00 : f32
    %668 = vector.broadcast %cst_89 : f32 to vector<8x1xf32>
    %669 = arith.addf %668, %667 : vector<8x1xf32>
    %670 = arith.divf %668, %669 : vector<8x1xf32>
    %671 = arith.mulf %662, %643 : vector<8x1xf32>
    %672 = arith.mulf %656, %664 : vector<8x1xf32>
    %673 = arith.addf %671, %672 : vector<8x1xf32>
    %674 = math.tanh %673 : vector<8x1xf32>
    %675 = arith.mulf %670, %674 : vector<8x1xf32>
    %676 = vector.extract_strided_slice %464 {offsets = [56, 0], sizes = [8, 128], strides = [1, 1]} : vector<64x128xf32> to vector<8x128xf32>
    %677 = vector.broadcast %675 : vector<8x1xf32> to vector<8x128xf32>
    %678 = vector.broadcast %465 : vector<1x128xf32> to vector<8x128xf32>
    %679 = arith.mulf %677, %678 : vector<8x128xf32>
    %680 = arith.addf %676, %679 : vector<8x128xf32>
    %681 = vector.extract_strided_slice %680 {offsets = [0, 0], sizes = [8, 1], strides = [1, 1]} : vector<8x128xf32> to vector<8x1xf32>
    %682 = arith.negf %681 : vector<8x1xf32>
    %683 = math.exp %682 : vector<8x1xf32>
    %cst_90 = arith.constant 1.000000e+00 : f32
    %684 = vector.broadcast %cst_90 : f32 to vector<8x1xf32>
    %685 = arith.addf %684, %683 : vector<8x1xf32>
    %686 = arith.divf %684, %685 : vector<8x1xf32>
    %687 = vector.extract_strided_slice %680 {offsets = [0, 1], sizes = [8, 1], strides = [1, 1]} : vector<8x128xf32> to vector<8x1xf32>
    %688 = arith.negf %687 : vector<8x1xf32>
    %689 = math.exp %688 : vector<8x1xf32>
    %cst_91 = arith.constant 1.000000e+00 : f32
    %690 = vector.broadcast %cst_91 : f32 to vector<8x1xf32>
    %691 = arith.addf %690, %689 : vector<8x1xf32>
    %692 = arith.divf %690, %691 : vector<8x1xf32>
    %693 = vector.extract_strided_slice %680 {offsets = [0, 2], sizes = [8, 1], strides = [1, 1]} : vector<8x128xf32> to vector<8x1xf32>
    %694 = math.tanh %693 : vector<8x1xf32>
    %695 = vector.extract_strided_slice %680 {offsets = [0, 3], sizes = [8, 1], strides = [1, 1]} : vector<8x128xf32> to vector<8x1xf32>
    %696 = arith.negf %695 : vector<8x1xf32>
    %697 = math.exp %696 : vector<8x1xf32>
    %cst_92 = arith.constant 1.000000e+00 : f32
    %698 = vector.broadcast %cst_92 : f32 to vector<8x1xf32>
    %699 = arith.addf %698, %697 : vector<8x1xf32>
    %700 = arith.divf %698, %699 : vector<8x1xf32>
    %701 = arith.mulf %692, %673 : vector<8x1xf32>
    %702 = arith.mulf %686, %694 : vector<8x1xf32>
    %703 = arith.addf %701, %702 : vector<8x1xf32>
    %704 = math.tanh %703 : vector<8x1xf32>
    %705 = arith.mulf %700, %704 : vector<8x1xf32>
    %706 = tpu.concatenate %495, %525, %555, %585, %615, %645, %675, %705 in 1 : vector<8x1xf32>, vector<8x1xf32>, vector<8x1xf32>, vector<8x1xf32>, vector<8x1xf32>, vector<8x1xf32>, vector<8x1xf32>, vector<8x1xf32> -> vector<8x8xf32>
    %cst_93 = arith.constant dense<0xFF800000> : vector<8xf32>
    %707 = vector.multi_reduction <maximumf>, %706, %cst_93 [1] : vector<8x8xf32> to vector<8xf32>
    %708 = vector.shape_cast %707 : vector<8xf32> to vector<8x1xf32>
    %709 = vector.broadcast %708 : vector<8x1xf32> to vector<8x8xf32>
    %710 = arith.subf %706, %709 : vector<8x8xf32>
    %711 = math.exp %710 : vector<8x8xf32>
    %cst_94 = arith.constant dense<0.000000e+00> : vector<8xf32>
    %712 = vector.multi_reduction <add>, %711, %cst_94 [1] : vector<8x8xf32> to vector<8xf32>
    %713 = vector.shape_cast %712 : vector<8xf32> to vector<8x1xf32>
    %714 = vector.broadcast %713 : vector<8x1xf32> to vector<8x8xf32>
    %715 = arith.divf %711, %714 : vector<8x8xf32>
    %cst_95 = arith.constant 0.000000e+00 : f32
    %716 = vector.broadcast %cst_95 : f32 to vector<8x64xf32>
    %717 = vector.extract_strided_slice %715 {offsets = [0, 0], sizes = [8, 1], strides = [1, 1]} : vector<8x8xf32> to vector<8x1xf32>
    %718 = vector.extract_strided_slice %441 {offsets = [0, 0], sizes = [8, 64], strides = [1, 1]} : vector<64x64xf32> to vector<8x64xf32>
    %719 = vector.broadcast %717 : vector<8x1xf32> to vector<8x64xf32>
    %720 = arith.mulf %719, %718 : vector<8x64xf32>
    %721 = arith.addf %716, %720 : vector<8x64xf32>
    %722 = vector.extract_strided_slice %715 {offsets = [0, 1], sizes = [8, 1], strides = [1, 1]} : vector<8x8xf32> to vector<8x1xf32>
    %723 = vector.extract_strided_slice %441 {offsets = [8, 0], sizes = [8, 64], strides = [1, 1]} : vector<64x64xf32> to vector<8x64xf32>
    %724 = vector.broadcast %722 : vector<8x1xf32> to vector<8x64xf32>
    %725 = arith.mulf %724, %723 : vector<8x64xf32>
    %726 = arith.addf %721, %725 : vector<8x64xf32>
    %727 = vector.extract_strided_slice %715 {offsets = [0, 2], sizes = [8, 1], strides = [1, 1]} : vector<8x8xf32> to vector<8x1xf32>
    %728 = vector.extract_strided_slice %441 {offsets = [16, 0], sizes = [8, 64], strides = [1, 1]} : vector<64x64xf32> to vector<8x64xf32>
    %729 = vector.broadcast %727 : vector<8x1xf32> to vector<8x64xf32>
    %730 = arith.mulf %729, %728 : vector<8x64xf32>
    %731 = arith.addf %726, %730 : vector<8x64xf32>
    %732 = vector.extract_strided_slice %715 {offsets = [0, 3], sizes = [8, 1], strides = [1, 1]} : vector<8x8xf32> to vector<8x1xf32>
    %733 = vector.extract_strided_slice %441 {offsets = [24, 0], sizes = [8, 64], strides = [1, 1]} : vector<64x64xf32> to vector<8x64xf32>
    %734 = vector.broadcast %732 : vector<8x1xf32> to vector<8x64xf32>
    %735 = arith.mulf %734, %733 : vector<8x64xf32>
    %736 = arith.addf %731, %735 : vector<8x64xf32>
    %737 = vector.extract_strided_slice %715 {offsets = [0, 4], sizes = [8, 1], strides = [1, 1]} : vector<8x8xf32> to vector<8x1xf32>
    %738 = vector.extract_strided_slice %441 {offsets = [32, 0], sizes = [8, 64], strides = [1, 1]} : vector<64x64xf32> to vector<8x64xf32>
    %739 = vector.broadcast %737 : vector<8x1xf32> to vector<8x64xf32>
    %740 = arith.mulf %739, %738 : vector<8x64xf32>
    %741 = arith.addf %736, %740 : vector<8x64xf32>
    %742 = vector.extract_strided_slice %715 {offsets = [0, 5], sizes = [8, 1], strides = [1, 1]} : vector<8x8xf32> to vector<8x1xf32>
    %743 = vector.extract_strided_slice %441 {offsets = [40, 0], sizes = [8, 64], strides = [1, 1]} : vector<64x64xf32> to vector<8x64xf32>
    %744 = vector.broadcast %742 : vector<8x1xf32> to vector<8x64xf32>
    %745 = arith.mulf %744, %743 : vector<8x64xf32>
    %746 = arith.addf %741, %745 : vector<8x64xf32>
    %747 = vector.extract_strided_slice %715 {offsets = [0, 6], sizes = [8, 1], strides = [1, 1]} : vector<8x8xf32> to vector<8x1xf32>
    %748 = vector.extract_strided_slice %441 {offsets = [48, 0], sizes = [8, 64], strides = [1, 1]} : vector<64x64xf32> to vector<8x64xf32>
    %749 = vector.broadcast %747 : vector<8x1xf32> to vector<8x64xf32>
    %750 = arith.mulf %749, %748 : vector<8x64xf32>
    %751 = arith.addf %746, %750 : vector<8x64xf32>
    %752 = vector.extract_strided_slice %715 {offsets = [0, 7], sizes = [8, 1], strides = [1, 1]} : vector<8x8xf32> to vector<8x1xf32>
    %753 = vector.extract_strided_slice %441 {offsets = [56, 0], sizes = [8, 64], strides = [1, 1]} : vector<64x64xf32> to vector<8x64xf32>
    %754 = vector.broadcast %752 : vector<8x1xf32> to vector<8x64xf32>
    %755 = arith.mulf %754, %753 : vector<8x64xf32>
    %756 = arith.addf %751, %755 : vector<8x64xf32>
    %c0_96 = arith.constant 0 : index
    %c0_97 = arith.constant 0 : index
    %757 = vector.load %arg1[%c0_96, %c0_97] : memref<8x64xf32, #tpu.memory_space<vmem>>, vector<8x64xf32>
    %758 = tpu.concatenate %756, %757 in 1 : vector<8x64xf32>, vector<8x64xf32> -> vector<8x128xf32>
    %c0_98 = arith.constant 0 : index
    %c0_99 = arith.constant 0 : index
    %759 = vector.load %arg15[%c0_98, %c0_99] : memref<128x128xf32, #tpu.memory_space<vmem>>, vector<128x128xf32>
    %cst_100 = arith.constant dense<0.000000e+00> : vector<8x128xf32>
    %760 = tpu.matmul %758, %759, %cst_100 {dimension_numbers = #tpu.dot_dimension_numbers<[1], [0], [0], [1], [0, 0, 1, 1], [], []>} : vector<8x128xf32>, vector<128x128xf32>, vector<8x128xf32> -> vector<8x128xf32>
    %c0_101 = arith.constant 0 : index
    %c0_102 = arith.constant 0 : index
    %761 = vector.load %arg16[%c0_101, %c0_102] : memref<1x128xf32, #tpu.memory_space<vmem>>, vector<1x128xf32>
    %762 = vector.broadcast %761 : vector<1x128xf32> to vector<8x128xf32>
    %763 = arith.addf %760, %762 : vector<8x128xf32>
    %cst_103 = arith.constant 0.000000e+00 : f32
    %764 = vector.broadcast %cst_103 : f32 to vector<8x128xf32>
    %765 = arith.maximumf %763, %764 : vector<8x128xf32>
    %c0_104 = arith.constant 0 : index
    %c0_105 = arith.constant 0 : index
    %766 = vector.load %arg17[%c0_104, %c0_105] : memref<128x128xf32, #tpu.memory_space<vmem>>, vector<128x128xf32>
    %cst_106 = arith.constant dense<0.000000e+00> : vector<8x128xf32>
    %767 = tpu.matmul %765, %766, %cst_106 {dimension_numbers = #tpu.dot_dimension_numbers<[1], [0], [0], [1], [0, 0, 1, 1], [], []>} : vector<8x128xf32>, vector<128x128xf32>, vector<8x128xf32> -> vector<8x128xf32>
    %c0_107 = arith.constant 0 : index
    %c0_108 = arith.constant 0 : index
    %768 = vector.load %arg18[%c0_107, %c0_108] : memref<1x128xf32, #tpu.memory_space<vmem>>, vector<1x128xf32>
    %769 = vector.broadcast %768 : vector<1x128xf32> to vector<8x128xf32>
    %770 = arith.addf %767, %769 : vector<8x128xf32>
    %cst_109 = arith.constant 0.000000e+00 : f32
    %771 = vector.broadcast %cst_109 : f32 to vector<8x128xf32>
    %772 = arith.maximumf %770, %771 : vector<8x128xf32>
    %c0_110 = arith.constant 0 : index
    %c0_111 = arith.constant 0 : index
    %773 = vector.load %arg19[%c0_110, %c0_111] : memref<128x16xf32, #tpu.memory_space<vmem>>, vector<128x16xf32>
    %cst_112 = arith.constant dense<0.000000e+00> : vector<8x16xf32>
    %774 = tpu.matmul %772, %773, %cst_112 {dimension_numbers = #tpu.dot_dimension_numbers<[1], [0], [0], [1], [0, 0, 1, 1], [], []>} : vector<8x128xf32>, vector<128x16xf32>, vector<8x16xf32> -> vector<8x16xf32>
    %c0_113 = arith.constant 0 : index
    %c0_114 = arith.constant 0 : index
    %775 = vector.load %arg20[%c0_113, %c0_114] : memref<1x16xf32, #tpu.memory_space<vmem>>, vector<1x16xf32>
    %776 = vector.broadcast %775 : vector<1x16xf32> to vector<8x16xf32>
    %777 = arith.addf %774, %776 : vector<8x16xf32>
    %778 = arith.negf %777 : vector<8x16xf32>
    %779 = math.exp %778 : vector<8x16xf32>
    %cst_115 = arith.constant 1.000000e+00 : f32
    %780 = vector.broadcast %cst_115 : f32 to vector<8x16xf32>
    %781 = arith.addf %780, %779 : vector<8x16xf32>
    %782 = arith.divf %780, %781 : vector<8x16xf32>
    %783 = vector.extract_strided_slice %782 {offsets = [0, 0], sizes = [2, 16], strides = [1, 1]} : vector<8x16xf32> to vector<2x16xf32>
    %c0_116 = arith.constant 0 : index
    %c0_117 = arith.constant 0 : index
    %784 = vector.load %arg21[%c0_116, %c0_117] : memref<2x16xf32, #tpu.memory_space<vmem>>, vector<2x16xf32>
    tpu.vector_store %arg21[%c0_116, %c0_117], %783 {strides = array<i32>} : memref<2x16xf32, #tpu.memory_space<vmem>>, vector<2x16xf32>,
    return
  }
}

</mosaic_0001>

<bundles_post_ra>
// kernel: bilstm_attn_forward.1
= control target key start
LH: loop header
LB: loop body
LE: loop exit
PB: predicated region body
PF: predicated region fallthrough
CT: control target
= control target key end

     0   :  { %s5321_s0 = inlined_call_operand.vmem [shape: f32[64,256], index: 0, kind: input, shape index: {}]   ;;  %s5322_s1 = inlined_call_operand.vmem [shape: f32[8,64], index: 1, kind: input, shape index: {}]   ;;  %s5323_s2 = inlined_call_operand.hbm [shape: f32[256,256], index: 2, kind: input, shape index: {}]   ;;  %s5324_s3 = inlined_call_operand.vmem [shape: f32[1,256], index: 3, kind: input, shape index: {}]   ;;  %s5325_s4 = inlined_call_operand.vmem [shape: f32[64,128], index: 4, kind: input, shape index: {}]   ;;  %s5326_s5 = inlined_call_operand.vmem [shape: f32[64,256], index: 5, kind: input, shape index: {}]   ;;  %s5327_s6 = inlined_call_operand.vmem [shape: f32[1,256], index: 6, kind: input, shape index: {}]   ;;  %s5328_s7 = inlined_call_operand.hbm [shape: f32[64,128], index: 7, kind: input, shape index: {}]   ;;  %s5329_s8 = inlined_call_operand.vmem [shape: f32[1,32], index: 8, kind: input, shape index: {}]   ;;  %s5330_s9 = inlined_call_operand.<no memory space> [shape: f32[1,1], index: 9, kind: input, shape index: {}]   ;;  %s5331_s10 = inlined_call_operand.vmem [shape: f32[1,32], index: 10, kind: input, shape index: {}]   ;;  %s5332_s12 = inlined_call_operand.hbm [shape: f32[64,128], index: 12, kind: input, shape index: {}]   ;;  %s5333_s13 = inlined_call_operand.vmem [shape: f32[1,128], index: 13, kind: input, shape index: {}]   ;;  %s5334_s14 = inlined_call_operand.vmem [shape: f32[1,128], index: 14, kind: input, shape index: {}]   ;;  %s5335_s15 = inlined_call_operand.vmem [shape: f32[128,128], index: 15, kind: input, shape index: {}]   ;;  %s5336_s16 = inlined_call_operand.vmem [shape: f32[1,128], index: 16, kind: input, shape index: {}]   ;;  %s5337_s17 = inlined_call_operand.hbm [shape: f32[128,128], index: 17, kind: input, shape index: {}]   ;;  %s5338_s18 = inlined_call_operand.vmem [shape: f32[1,128], index: 18, kind: input, shape index: {}]   ;;  %s5339_s19 = inlined_call_operand.vmem [shape: f32[128,16], index: 19, kind: input, shape index: {}]   ;;  %s5340_s20 = inlined_call_operand.vmem [shape: f32[1,16], index: 20, kind: input, shape index: {}]   ;;  %s5341_s21 = inlined_call_operand.hbm [shape: f32[2,16], index: 21, kind: output, shape index: {}]   ;;  %s5342_s11 = inlined_call_operand.<no memory space> [shape: f32[1,1], index: 11, kind: input, shape index: {}]  }
   0x1   :  { %5346 = sst [smem:[#allocation17_spill]] %s5321_s0  ;;  %v26_v0 = vstv %s5330_s9  ;;  %v28_v1 = vstv %s5342_s11 }
   0x2   :  { %5347 = sst [smem:[#allocation18_spill]] %s5322_s1  ;;  %27 = vst [vmem:[#allocation2] sm:$0x1] %v26_v0 }
   0x3   :  { %5348 = sst [smem:[#allocation19_spill]] %s5323_s2  ;;  %29 = vst [vmem:[#allocation3] sm:$0x1] %v28_v1 }
   0x4   :  { %5349 = sst [smem:[#allocation20_spill]] %s5324_s3 }
   0x5   :  { %5350 = sst [smem:[#allocation21_spill]] %s5325_s4 }
   0x6   :  { %5351 = sst [smem:[#allocation22_spill]] %s5326_s5 }
   0x7   :  { %30 = vsyncpa [#allocation5], 0 }
   0x8   :  { %31 = vsyncpa [#allocation8], 0 }
   0x9   :  { %32 = vsyncpa [#allocation11], 0  ;;  %s63_s29 = sshll.u32 %s5328_s7, 4  ;;  %s64_s29 = int_to_ptr.hbm [resolvable:$true] %s63_s29 }
   0xa   :  { %33 = vsyncpa [#allocation6], 0  ;;  %s3914_s0 = smov [#allocation7]   ;;  %s5352_s5 = sld [smem:[#allocation19_spill]] }
   0xb   :  { %s65_s4 = sshll.u32 %s3914_s0, 4  ;;  %s3915_s23 = smov 128   ;;  %s66_s4 = int_to_ptr.vmem [resolvable:$true] %s65_s4 }
   0xc   :  { %s3916_s11 = smov 8   ;;  %s3917_s1 = smov [#allocation4]  }
   0xd   :  { %71 = dma.hbm_to_vmem [thread:$0]  %s64_s29, 1024, %s66_s4, [#allocation8], %s3915_s23, %s3915_s23, %s3916_s11  }
   0xe   :  { %s44_s24 = sshll.u32 %s3917_s1, 4  ;;  %s3918_s2 = smov 256   ;;  %s45_s24 = int_to_ptr.vmem [resolvable:$true] %s44_s24 }
   0xf   :  { %s3919_s25 = smov 16   ;;  %s84_s27 = sshll.u32 %s5332_s12, 4  ;;  %s85_s27 = int_to_ptr.hbm [resolvable:$true] %s84_s27 }
  0x10   :  { %s42_s22 = sshll.u32 %s5352_s5, 4  ;;  %s3920_s3 = smov [#allocation9]   ;;  %s43_s22 = int_to_ptr.hbm [resolvable:$true] %s42_s22 }
  0x11   :  { %50 = dma.hbm_to_vmem [thread:$0]  %s43_s22, 8192, %s45_s24, [#allocation5], %s3918_s2, %s3918_s2, %s3919_s25  }
  0x12   :  { %s86_s28 = sshll.u32 %s3920_s3, 4  ;;  %s105_s9 = sshll.u32 %s5337_s17, 4  ;;  %s87_s28 = int_to_ptr.vmem [resolvable:$true] %s86_s28  ;;  %s106_s9 = int_to_ptr.hbm [resolvable:$true] %s105_s9 }
  0x13   :  { %92 = dma.hbm_to_vmem [thread:$0]  %s85_s27, 1024, %s87_s28, [#allocation8], %s3915_s23, %s3915_s23, %s3916_s11  }
  0x14   :  { %s3921_s29 = smov [#allocation10]  }
  0x15   :  { %s107_s4 = sshll.u32 %s3921_s29, 4  ;;  %s108_s4 = int_to_ptr.vmem [resolvable:$true] %s107_s4 }
  0x16   :  { %113 = dma.hbm_to_vmem [thread:$0]  %s106_s9, 2048, %s108_s4, [#allocation11], %s3915_s23, %s3915_s23, %s3916_s11  }
  0x17   :  { %3906 = dma.done.wait [#allocation5], 8192  }
  0x18   :  { %3907 = vsyncadd [#allocation5], 4294959104 }
  0x19   :  { %3908 = dma.done.wait [#allocation8], 2048  }
  0x1a   :  { %3909 = vsyncadd [#allocation8], 4294965248 }
  0x1b   :  { %3910 = dma.done.wait [#allocation11], 2048  }
  0x1c   :  { %3911 = vsyncadd [#allocation11], 4294965248  ;;  %v208_v2 = vld [vmem:[#allocation4 + $0xf0] sm:$0xff]  ;;  %v209_v3 = vld [vmem:[#allocation4 + $0xf8] sm:$0xff]  ;;  %s5353_s5 = sld [smem:[#allocation17_spill]]  ;;  %s3924_s30 = smov 32  }
  0x1d   :  { %v206_v4 = vld [vmem:[#allocation4 + $0xe0] sm:$0xff]  ;;  %3392 = vmatpush.msra.mxu1 %v208_v2  ;;  %330 = vmatpush.msra.mxu2 %v209_v3  ;;  %v207_v5 = vld [vmem:[#allocation4 + $0xe8] sm:$0xff]  ;;  %v241_v6 = vld [vmem:[#allocation4 + $0x1f8] sm:$0xff]  ;;  %s5354_s25 = sld [smem:[#allocation21_spill]]  ;;  %vm539_vm12 = vcmask 261120   ;;  %vm420_vm13 = vcmask 523264  }
  0x1e   :  { %248 = vmatpush.msra.mxu0 %v208_v2  ;;  %371 = vmatpush.msra.mxu3 %v241_v6  ;;  %v204_v7 = vld [vmem:[#allocation4 + $0xd0] sm:$0xff]  ;;  %v205_v8 = vld [vmem:[#allocation4 + $0xd8] sm:$0xff]  ;;  %v239_v9 = vld [vmem:[#allocation4 + $0x1e8] sm:$0xff]  ;;  %s5355_s0 = sld [smem:[#allocation20_spill]]  ;;  %s3925_s9 = smov 96  }
  0x1f   :  { %3393 = vmatpush.msra.mxu1 %v206_v4  ;;  %331 = vmatpush.msra.mxu2 %v207_v5  ;;  %v237_v10 = vld [vmem:[#allocation4 + $0x1d8] sm:$0xff]  ;;  %v202_v11 = vld [vmem:[#allocation4 + $0xc0] sm:$0xff]  ;;  %v203_v12 = vld [vmem:[#allocation4 + $0xc8] sm:$0xff]  ;;  %s5358_s4 = sld [smem:[#allocation22_spill]]  ;;  %s3927_s22 = smov 126  }
  0x20   :  { %249 = vmatpush.msra.mxu0 %v206_v4  ;;  %372 = vmatpush.msra.mxu3 %v239_v9  ;;  %v235_v13 = vld [vmem:[#allocation4 + $0x1c8] sm:$0xff]  ;;  %v200_v14 = vld [vmem:[#allocation4 + $0xb0] sm:$0xff]  ;;  %v201_v15 = vld [vmem:[#allocation4 + $0xb8] sm:$0xff]  ;;  %s3932_s23 = smov 127   ;;  %s3933_s11 = smov 3  }
  0x21   :  { %3394 = vmatpush.msra.mxu1 %v204_v7  ;;  %332 = vmatpush.msra.mxu2 %v205_v8  ;;  %v233_v16 = vld [vmem:[#allocation4 + $0x1b8] sm:$0xff]  ;;  %v198_v17 = vld [vmem:[#allocation4 + $0xa0] sm:$0xff]  ;;  %v199_v18 = vld [vmem:[#allocation4 + $0xa8] sm:$0xff]  ;;  %s3934_s1 = smov 4   ;;  %s5359_s7 = sld [smem:[#allocation18_spill]] }
  0x22   :  { %250 = vmatpush.msra.mxu0 %v204_v7  ;;  %373 = vmatpush.msra.mxu3 %v237_v10  ;;  %v231_v19 = vld [vmem:[#allocation4 + $0x1a8] sm:$0xff]  ;;  %v196_v20 = vld [vmem:[#allocation4 + $0x90] sm:$0xff]  ;;  %v197_v21 = vld [vmem:[#allocation4 + $0x98] sm:$0xff] }
  0x23   :  { %3395 = vmatpush.msra.mxu1 %v202_v11  ;;  %333 = vmatpush.msra.mxu2 %v203_v12  ;;  %v229_v22 = vld [vmem:[#allocation4 + $0x198] sm:$0xff]  ;;  %v194_v23 = vld [vmem:[#allocation4 + $0x80] sm:$0xff]  ;;  %v195_v24 = vld [vmem:[#allocation4 + $0x88] sm:$0xff] }
  0x24   :  { %251 = vmatpush.msra.mxu0 %v202_v11  ;;  %374 = vmatpush.msra.mxu3 %v235_v13  ;;  %v227_v25 = vld [vmem:[#allocation4 + $0x188] sm:$0xff]  ;;  %v192_v26 = vld [vmem:[#allocation4 + $0x70] sm:$0xff]  ;;  %v193_v27 = vld [vmem:[#allocation4 + $0x78] sm:$0xff] }
  0x25   :  { %3396 = vmatpush.msra.mxu1 %v200_v14  ;;  %334 = vmatpush.msra.mxu2 %v201_v15  ;;  %v225_v28 = vld [vmem:[#allocation4 + $0x178] sm:$0xff]  ;;  %v190_v29 = vld [vmem:[#allocation4 + $0x60] sm:$0xff]  ;;  %v191_v30 = vld [vmem:[#allocation4 + $0x68] sm:$0xff] }
  0x26   :  { %252 = vmatpush.msra.mxu0 %v200_v14  ;;  %375 = vmatpush.msra.mxu3 %v233_v16  ;;  %v223_v31 = vld [vmem:[#allocation4 + $0x168] sm:$0xff]  ;;  %v188_v32 = vld [vmem:[#allocation4 + $0x50] sm:$0xff]  ;;  %v189_v33 = vld [vmem:[#allocation4 + $0x58] sm:$0xff] }
  0x27   :  { %3397 = vmatpush.msra.mxu1 %v198_v17  ;;  %335 = vmatpush.msra.mxu2 %v199_v18  ;;  %v221_v34 = vld [vmem:[#allocation4 + $0x158] sm:$0xff]  ;;  %v186_v35 = vld [vmem:[#allocation4 + $0x40] sm:$0xff]  ;;  %v187_v36 = vld [vmem:[#allocation4 + $0x48] sm:$0xff] }
  0x28   :  { %253 = vmatpush.msra.mxu0 %v198_v17  ;;  %376 = vmatpush.msra.mxu3 %v231_v19  ;;  %v219_v37 = vld [vmem:[#allocation4 + $0x148] sm:$0xff]  ;;  %v184_v38 = vld [vmem:[#allocation4 + $0x30] sm:$0xff]  ;;  %v185_v39 = vld [vmem:[#allocation4 + $0x38] sm:$0xff] }
  0x29   :  { %3398 = vmatpush.msra.mxu1 %v196_v20  ;;  %336 = vmatpush.msra.mxu2 %v197_v21  ;;  %v217_v40 = vld [vmem:[#allocation4 + $0x138] sm:$0xff]  ;;  %v182_v41 = vld [vmem:[#allocation4 + $0x20] sm:$0xff]  ;;  %v183_v42 = vld [vmem:[#allocation4 + $0x28] sm:$0xff] }
  0x2a   :  { %254 = vmatpush.msra.mxu0 %v196_v20  ;;  %377 = vmatpush.msra.mxu3 %v229_v22  ;;  %v180_v43 = vld [vmem:[#allocation4 + $0x10] sm:$0xff]  ;;  %v215_v44 = vld [vmem:[#allocation4 + $0x128] sm:$0xff]  ;;  %v181_v45 = vld [vmem:[#allocation4 + $0x18] sm:$0xff] }
  0x2b   :  { %3399 = vmatpush.msra.mxu1 %v194_v23  ;;  %337 = vmatpush.msra.mxu2 %v195_v24  ;;  %v178_v46 = vld [vmem:[#allocation4] sm:$0xff]  ;;  %v179_v47 = vld [vmem:[#allocation4 + $0x8] sm:$0xff]  ;;  %v213_v48 = vld [vmem:[#allocation4 + $0x118] sm:$0xff] }
  0x2c   :  { %255 = vmatpush.msra.mxu0 %v194_v23  ;;  %378 = vmatpush.msra.mxu3 %v227_v25  ;;  %v4073_v49 = vld [vmem:[%s5353_s5 + $0x40] sm:$0xff]  ;;  %v240_v51 = vld [vmem:[#allocation4 + $0x1f0] sm:$0xff]  ;;  %v211_v52 = vld [vmem:[#allocation4 + $0x108] sm:$0xff]  ;;  %v3922_v23 = vmov 0.0  }
  0x2d   :  { %3400 = vmatpush.msra.mxu1 %v192_v26  ;;  %338 = vmatpush.msra.mxu2 %v193_v27  ;;  %v162_v50 = vld [vmem:[%s5353_s5] sm:$0xff]  ;;  %v4082_v53 = vld [vmem:[%s5353_s5 + $0x8] sm:$0xff]  ;;  %v4087_v55 = vld [vmem:[%s5354_s25 + $0x38] sm:$0xff] }
  0x2e   :  { %256 = vmatpush.msra.mxu0 %v192_v26  ;;  %379 = vmatpush.msra.mxu3 %v225_v28  ;;  %v238_v54 = vld [vmem:[#allocation4 + $0x1e0] sm:$0xff]  ;;  %v236_v56 = vld [vmem:[#allocation4 + $0x1d0] sm:$0xff]  ;;  %v242_v27 = vld [vmem:[%s5355_s0] sm:$0x3] }
  0x2f   :  { %3401 = vmatpush.msra.mxu1 %v190_v29  ;;  %339 = vmatpush.msra.mxu2 %v191_v30  ;;  %v4093_v57 = vld [vmem:[%s5354_s25 + $0x30] sm:$0xff]  ;;  %v234_v58 = vld [vmem:[#allocation4 + $0x1c0] sm:$0xff]  ;;  %v4118_v63 = vld [vmem:[%s5353_s5 + $0x18] sm:$0xff]  ;;  %v4257_v30 = vperm.slane %v242_v27, 1 }
  0x30   :  { %257 = vmatpush.msra.mxu0 %v190_v29  ;;  %380 = vmatpush.msra.mxu3 %v223_v31  ;;  %v4100_v59 = vld [vmem:[%s5353_s5 + $0x50] sm:$0xff]  ;;  %v4110_v62 = vld [vmem:[%s5354_s25 + $0x28] sm:$0xff]  ;;  %v4124_v1 = vld [vmem:[%s5354_s25 + $0x20] sm:$0xff] }
  0x31   :  { %3402 = vmatpush.msra.mxu1 %v188_v32  ;;  %340 = vmatpush.msra.mxu2 %v189_v33  ;;  %v164_v60 = vld [vmem:[%s5353_s5 + $0x10] sm:$0xff]  ;;  %v230_v0 = vld [vmem:[#allocation4 + $0x1a0] sm:$0xff]  ;;  %v4131_v3 = vld [vmem:[%s5354_s25 + $0x18] sm:$0xff] }
  0x32   :  { %258 = vmatpush.msra.mxu0 %v188_v32  ;;  %381 = vmatpush.msra.mxu3 %v221_v34  ;;  %v232_v61 = vld [vmem:[#allocation4 + $0x1b0] sm:$0xff]  ;;  %v226_v4 = vld [vmem:[#allocation4 + $0x180] sm:$0xff]  ;;  %v4259_v32 = vperm.slane %v242_v27, 0 }
  0x33   :  { %3403 = vmatpush.msra.mxu1 %v186_v35  ;;  %341 = vmatpush.msra.mxu2 %v187_v36  ;;  %v228_v2 = vld [vmem:[#allocation4 + $0x190] sm:$0xff]  ;;  %v4138_v5 = vld [vmem:[%s5353_s5 + $0x60] sm:$0xff]  ;;  %v4156_v9 = vld [vmem:[%s5353_s5 + $0x28] sm:$0xff] }
  0x34   :  { %259 = vmatpush.msra.mxu0 %v186_v35  ;;  %382 = vmatpush.msra.mxu3 %v219_v37  ;;  %v166_v6 = vld [vmem:[%s5353_s5 + $0x20] sm:$0xff]  ;;  %v224_v7 = vld [vmem:[#allocation4 + $0x170] sm:$0xff]  ;;  %v4162_v11 = vld [vmem:[%s5354_s25 + $0x8] sm:$0xff] }
  0x35   :  { %3404 = vmatpush.msra.mxu1 %v184_v38  ;;  %342 = vmatpush.msra.mxu2 %v185_v39  ;;  %v4148_v8 = vld [vmem:[%s5354_s25 + $0x10] sm:$0xff]  ;;  %v222_v10 = vld [vmem:[#allocation4 + $0x160] sm:$0xff]  ;;  %v169_v18 = vld [vmem:[%s5353_s5 + $0x38] sm:$0xff] }
  0x36   :  { %260 = vmatpush.msra.mxu0 %v184_v38  ;;  %383 = vmatpush.msra.mxu3 %v217_v40  ;;  %v220_v12 = vld [vmem:[#allocation4 + $0x150] sm:$0xff]  ;;  %v4169_v13 = vld [vmem:[%s5354_s25] sm:$0xff]  ;;  %v171_v22 = vld [vmem:[%s5353_s5 + $0x48] sm:$0xff] }
  0x37   :  { %3405 = vmatpush.msra.mxu1 %v182_v41  ;;  %343 = vmatpush.msra.mxu2 %v183_v42  ;;  %v218_v14 = vld [vmem:[#allocation4 + $0x140] sm:$0xff]  ;;  %v4176_v15 = vld [vmem:[%s5353_s5 + $0x70] sm:$0xff]  ;;  %v173_v24 = vld [vmem:[%s5353_s5 + $0x58] sm:$0xff] }
  0x38   :  { %261 = vmatpush.msra.mxu0 %v182_v41  ;;  %384 = vmatpush.msra.mxu3 %v215_v44  ;;  %v168_v16 = vld [vmem:[%s5353_s5 + $0x30] sm:$0xff]  ;;  %v214_v19 = vld [vmem:[#allocation4 + $0x120] sm:$0xff]  ;;  %v177_v26 = vld [vmem:[%s5353_s5 + $0x78] sm:$0xff] }
  0x39   :  { %3406 = vmatpush.msra.mxu1 %v180_v43  ;;  %344 = vmatpush.msra.mxu2 %v181_v45  ;;  %v216_v17 = vld [vmem:[#allocation4 + $0x130] sm:$0xff]  ;;  %v210_v21 = vld [vmem:[#allocation4 + $0x100] sm:$0xff] }
  0x3a   :  { %262 = vmatpush.msra.mxu0 %v180_v43  ;;  %385 = vmatpush.msra.mxu3 %v213_v48  ;;  %v212_v20 = vld [vmem:[#allocation4 + $0x110] sm:$0xff]  ;;  %v175_v25 = vld [vmem:[%s5353_s5 + $0x68] sm:$0xff]  ;;  %s3923_s5 = smov 64  }
  0x3b   :  { %3407 = vmatpush.msra.mxu1 %v178_v46  ;;  %345 = vmatpush.msra.mxu2 %v179_v47 }
  0x3c   :  { %276 = vmatmul.f32.vlgmr.msra.gmra.mxu1 %v4073_v49  ;;  %346 = vmatmul.f32.vlgmr.msra.gmra.mxu2 %v162_v50 }
  0x3d   :  { %263 = vmatpush.msra.mxu0 %v178_v46  ;;  %289 = vmatpush.msrb.mxu1 %v240_v51 }
  0x3e   :  { %386 = vmatpush.msra.mxu3 %v211_v52  ;;  %264 = vmatmul.f32.vlgmr.msra.gmra.mxu0 %v162_v50 }
  0x3f   :  { %387 = vmatmul.f32.vlgmr.msra.gmra.mxu3 %v4082_v53  ;;  %290 = vmatpush.msrb.mxu1 %v238_v54 }
  0x40   :  { %432 = vmatpush.msrb.mxu0 %v4087_v55  ;;  %683 = vmatpush.msrb.mxu2 %v4087_v55 }
  0x41   :  { %291 = vmatpush.msrb.mxu1 %v236_v56  ;;  %808 = vmatpush.msrb.mxu3 %v4087_v55 }
  0x42   :  { %433 = vmatpush.msrb.mxu0 %v4093_v57  ;;  %684 = vmatpush.msrb.mxu2 %v4093_v57 }
  0x43   :  { %292 = vmatpush.msrb.mxu1 %v234_v58  ;;  %809 = vmatpush.msrb.mxu3 %v4093_v57 }
  0x44   :  { %279 = vmatmul.f32.gmra.mxu1 %v4100_v59  ;;  %349 = vmatmul.f32.gmra.mxu2 %v164_v60 }
  0x45   :  { %293 = vmatpush.msrb.mxu1 %v232_v61  ;;  %434 = vmatpush.msrb.mxu0 %v4110_v62 }
  0x46   :  { %267 = vmatmul.f32.gmra.mxu0 %v164_v60  ;;  %685 = vmatpush.msrb.mxu2 %v4110_v62 }
  0x47   :  { %390 = vmatmul.f32.gmra.mxu3 %v4118_v63  ;;  %294 = vmatpush.msrb.mxu1 %v230_v0 }
  0x48   :  { %435 = vmatpush.msrb.mxu0 %v4124_v1  ;;  %686 = vmatpush.msrb.mxu2 %v4124_v1 }
  0x49   :  { %295 = vmatpush.msrb.mxu1 %v228_v2  ;;  %810 = vmatpush.msrb.mxu3 %v4110_v62 }
  0x4a   :  { %436 = vmatpush.msrb.mxu0 %v4131_v3  ;;  %687 = vmatpush.msrb.mxu2 %v4131_v3 }
  0x4b   :  { %296 = vmatpush.msrb.mxu1 %v226_v4  ;;  %811 = vmatpush.msrb.mxu3 %v4124_v1 }
  0x4c   :  { %282 = vmatmul.f32.gmra.mxu1 %v4138_v5  ;;  %352 = vmatmul.f32.gmra.mxu2 %v166_v6 }
  0x4d   :  { %297 = vmatpush.msrb.mxu1 %v224_v7  ;;  %437 = vmatpush.msrb.mxu0 %v4148_v8 }
  0x4e   :  { %270 = vmatmul.f32.gmra.mxu0 %v166_v6  ;;  %688 = vmatpush.msrb.mxu2 %v4148_v8 }
  0x4f   :  { %393 = vmatmul.f32.gmra.mxu3 %v4156_v9  ;;  %298 = vmatpush.msrb.mxu1 %v222_v10 }
  0x50   :  { %438 = vmatpush.msrb.mxu0 %v4162_v11  ;;  %689 = vmatpush.msrb.mxu2 %v4162_v11 }
  0x51   :  { %299 = vmatpush.msrb.mxu1 %v220_v12  ;;  %812 = vmatpush.msrb.mxu3 %v4131_v3  ;;  %v136_v12 = vlaneseq }
  0x52   :  { %439 = vmatpush.msrb.mxu0 %v4169_v13  ;;  %690 = vmatpush.msrb.mxu2 %v4169_v13 }
  0x53   :  { %300 = vmatpush.msrb.mxu1 %v218_v14  ;;  %813 = vmatpush.msrb.mxu3 %v4148_v8 }
  0x54   :  { %285 = vmatmul.f32.gmra.mxu1 %v4176_v15  ;;  %355 = vmatmul.f32.gmra.mxu2 %v168_v16 }
  0x55   :  { %301 = vmatpush.msrb.mxu1 %v216_v17  ;;  %814 = vmatpush.msrb.mxu3 %v4162_v11 }
  0x56   :  { %273 = vmatmul.f32.gmra.mxu0 %v168_v16  ;;  %1183 = vmatpush.msra.mxu2 %v4087_v55  ;;  %v4298_v16 = vand.u32 127, %v136_v12 }
  0x57   :  { %396 = vmatmul.f32.gmra.mxu3 %v169_v18  ;;  %302 = vmatpush.msrb.mxu1 %v214_v19 }
  0x58   :  { %815 = vmatpush.msrb.mxu3 %v4169_v13  ;;  %933 = vmatpush.msra.mxu0 %v4087_v55  ;;  %vm138_vm0 = vcmp.ge.s32.totalorder %v4298_v16, 64  ;;  %vm139_vm1 = vcmp.lt.s32.totalorder %v4298_v16, 96  ;;  %vm150_vm11 = vcmp.lt.s32.totalorder %v4298_v16, 32 }
  0x59   :  { %303 = vmatpush.msrb.mxu1 %v212_v20  ;;  %1184 = vmatpush.msra.mxu2 %v4093_v57  ;;  %vm4307_vm3 = vmand %vm138_vm0, %vm139_vm1 }
  0x5a   :  { %934 = vmatpush.msra.mxu0 %v4093_v57  ;;  %1308 = vmatpush.msra.mxu3 %v4087_v55 }
  0x5b   :  { %304 = vmatpush.msrb.mxu1 %v210_v21  ;;  %1185 = vmatpush.msra.mxu2 %v4110_v62 }
  0x5c   :  { %305 = vmatmul.f32.vlgmr.msrb.gmra.mxu1 %v4082_v53  ;;  %358 = vmatmul.f32.gmra.mxu2 %v4073_v49 }
  0x5d   :  { %558 = vmatpush.msra.mxu1 %v4087_v55  ;;  %935 = vmatpush.msra.mxu0 %v4110_v62 }
  0x5e   :  { %440 = vmatmul.f32.vlgmr.msrb.gmra.mxu0 %v3922_v23  ;;  %1186 = vmatpush.msra.mxu2 %v4124_v1 }
  0x5f   :  { %399 = vmatmul.f32.gmra.mxu3 %v171_v22  ;;  %559 = vmatpush.msra.mxu1 %v4093_v57 }
  0x60   :  { %936 = vmatpush.msra.mxu0 %v4124_v1  ;;  %1187 = vmatpush.msra.mxu2 %v4131_v3 }
  0x61   :  { %560 = vmatpush.msra.mxu1 %v4110_v62  ;;  %1309 = vmatpush.msra.mxu3 %v4093_v57 }
  0x62   :  { %937 = vmatpush.msra.mxu0 %v4131_v3  ;;  %1188 = vmatpush.msra.mxu2 %v4148_v8 }
  0x63   :  { %561 = vmatpush.msra.mxu1 %v4124_v1  ;;  %1310 = vmatpush.msra.mxu3 %v4110_v62 }
  0x64   :  { %308 = vmatmul.f32.gmra.mxu1 %v4118_v63  ;;  %361 = vmatmul.f32.gmra.mxu2 %v4100_v59 }
  0x65   :  { %562 = vmatpush.msra.mxu1 %v4131_v3  ;;  %938 = vmatpush.msra.mxu0 %v4148_v8 }
  0x66   :  { %443 = vmatmul.f32.gmra.mxu0 %v3922_v23  ;;  %1189 = vmatpush.msra.mxu2 %v4162_v11 }
  0x67   :  { %402 = vmatmul.f32.gmra.mxu3 %v173_v24  ;;  %563 = vmatpush.msra.mxu1 %v4148_v8 }
  0x68   :  { %939 = vmatpush.msra.mxu0 %v4162_v11  ;;  %1190 = vmatpush.msra.mxu2 %v4169_v13 }
  0x69   :  { %564 = vmatpush.msra.mxu1 %v4162_v11  ;;  %1311 = vmatpush.msra.mxu3 %v4124_v1 }
  0x6a   :  { %940 = vmatpush.msra.mxu0 %v4169_v13 }
  0x6b   :  { %565 = vmatpush.msra.mxu1 %v4169_v13  ;;  %1312 = vmatpush.msra.mxu3 %v4131_v3 }
  0x6c   :  { %311 = vmatmul.f32.gmra.mxu1 %v4156_v9  ;;  %364 = vmatmul.f32.gmra.mxu2 %v4138_v5 }
  0x6d   :  { %1058 = vmatpush.msrb.mxu1 %v4087_v55  ;;  %1313 = vmatpush.msra.mxu3 %v4148_v8 }
  0x6f   :  { %405 = vmatmul.f32.gmra.mxu3 %v175_v25  ;;  %1059 = vmatpush.msrb.mxu1 %v4093_v57 }
  0x70   :  { %1314 = vmatpush.msra.mxu3 %v4162_v11 }
  0x71   :  { %1060 = vmatpush.msrb.mxu1 %v4110_v62 }
  0x72   :  { %1315 = vmatpush.msra.mxu3 %v4169_v13 }
  0x73   :  { %1061 = vmatpush.msrb.mxu1 %v4124_v1 }
  0x74   :  { %314 = vmatmul.f32.gmra.mxu1 %v169_v18  ;;  %367 = vmatmul.f32.gmra.mxu2 %v4176_v15 }
  0x75   :  { %1062 = vmatpush.msrb.mxu1 %v4131_v3 }
  0x77   :  { %408 = vmatmul.f32.gmra.mxu3 %v177_v26  ;;  %1063 = vmatpush.msrb.mxu1 %v4148_v8 }
  0x79   :  { %1064 = vmatpush.msrb.mxu1 %v4162_v11 }
  0x7b   :  { %1065 = vmatpush.msrb.mxu1 %v4169_v13 }
  0x7c   :  { %317 = vmatmul.f32.gmra.mxu1 %v171_v22 }
  0x84   :  { %320 = vmatmul.f32.gmra.mxu1 %v173_v24 }
  0x8c   :  { %323 = vmatmul.f32.gmra.mxu1 %v175_v25 }
  0x94   :  { %326 = vmatmul.f32.gmra.mxu1 %v177_v26 }
  0xb9   :  { %v4255_v28 = vpop.f32.mrf.mxu1 }
  0xbb   :  { %v265_v29 = vpop.f32.mrf.mxu0 }
  0xbc   :  { %v266_v57 = vadd.f32 %v265_v29, %v4259_v32 }
  0xbf   :  { %v347_v31 = vpop.f32.mrf.mxu2 }
  0xc0   :  { %v348_v33 = vadd.f32 %v347_v31, %v4257_v30 }
  0xc1   :  { %v280_v34 = vpop.f32.mrf.mxu1 }
  0xc2   :  { %v4263_v35 = vadd.f32 %v280_v34, %v4259_v32  ;;  %v388_v36 = vpop.f32.mrf.mxu3 }
  0xc3   :  { %v4265_v37 = vadd.f32 %v388_v36, %v348_v33  ;;  %v268_v38 = vpop.f32.mrf.mxu0 }
  0xc4   :  { %v4268_v39 = vadd.f32 %v268_v38, %v4259_v32 }
  0xc7   :  { %v350_v40 = vpop.f32.mrf.mxu2 }
  0xc8   :  { %v351_v41 = vadd.f32 %v350_v40, %v4257_v30  ;;  %v278_v40 = vadd.f32 %v4255_v28, %v4259_v32 }
  0xc9   :  { %v283_v42 = vpop.f32.mrf.mxu1 }
  0xca   :  { %v4272_v43 = vadd.f32 %v283_v42, %v4259_v32  ;;  %v391_v44 = vpop.f32.mrf.mxu3 }
  0xcb   :  { %v4274_v45 = vadd.f32 %v391_v44, %v351_v41  ;;  %v271_v46 = vpop.f32.mrf.mxu0 }
  0xcc   :  { %v272_v47 = vadd.f32 %v271_v46, %v4259_v32 }
  0xcf   :  { %v353_v48 = vpop.f32.mrf.mxu2 }
  0xd0   :  { %v354_v49 = vadd.f32 %v353_v48, %v4257_v30 }
  0xd1   :  { %v286_v50 = vpop.f32.mrf.mxu1 }
  0xd2   :  { %v4279_v51 = vadd.f32 %v286_v50, %v4259_v32  ;;  %v394_v52 = vpop.f32.mrf.mxu3 }
  0xd3   :  { %v4281_v53 = vadd.f32 %v394_v52, %v354_v49  ;;  %v274_v54 = vpop.f32.mrf.mxu0 }
  0xd4   :  { %v275_v55 = vadd.f32 %v274_v54, %v4259_v32 }
  0xd7   :  { %v356_v56 = vpop.f32.mrf.mxu2 }
  0xd8   :  { %v357_v58 = vadd.f32 %v356_v56, %v4257_v30 }
  0xd9   :  { %v306_v59 = vpop.f32.mrf.mxu1 }
  0xda   :  { %v307_v60 = vadd.f32 %v306_v59, %v266_v57  ;;  %v397_v61 = vpop.f32.mrf.mxu3 }
  0xdb   :  { %v4286_v62 = vadd.f32 %v397_v61, %v357_v58  ;;  %v441_v63 = vpop.f32.mrf.mxu0 }
  0xdc   :  { %v447_v0 = vadd.f32 %v441_v63, %v307_v60 }
  0xde   :  { %v3299_v1 = vmul.f32 -1.442695, %v447_v0 }
  0xdf   :  { %v359_v2 = vpop.f32.mrf.mxu2 }
  0xe0   :  { %3458 = vpow2.f32 %v3299_v1  ;;  %v360_v3 = vadd.f32 %v359_v2, %v4257_v30 }
  0xe1   :  { %v4289_v4 = vpop.f32.mrf.mxu1 }
  0xe2   :  { %v400_v5 = vpop.f32.mrf.mxu3 }
  0xe3   :  { %v4291_v6 = vadd.f32 %v400_v5, %v360_v3  ;;  %v444_v50 = vpop.f32.mrf.mxu0 }
  0xe6   :  { %v3459_v7 = vpop.eup %3458 }
  0xe7   :  { %v457_v8 = vadd.f32 1.0, %v3459_v7  ;;  %v362_v9 = vpop.f32.mrf.mxu2 }
  0xe8   :  { %v363_v10 = vadd.f32 %v362_v9, %v4257_v30 }
  0xe9   :  { %3460 = vrcp.f32 %v457_v8  ;;  %v312_v11 = vpop.f32.mrf.mxu1  ;;  %v470_v27 = vand.u32 2147483648, %v457_v8  ;;  %v468_v31 = vand.u32 2147483647, %v457_v8  ;;  %vm464_vm4 = vweird.f32 %v457_v8 }
  0xea   :  { %v4294_v13 = vadd.f32 %v312_v11, %v272_v47  ;;  %v403_v14 = vpop.f32.mrf.mxu3  ;;  %3462 = vtanh.f32 %v447_v0 }
  0xeb   :  { %v4296_v15 = vadd.f32 %v403_v14, %v363_v10  ;;  %v471_v38 = vor.u32 1.1754944e-38, %v470_v27  ;;  %vm469_vm6 = vcmp.eq.f32.partialorder %v468_v31, 8.507059e+37 }
  0xef   :  { %v3461_v17 = vpop.eup %3460  ;;  %v365_v18 = vpop.f32.mrf.mxu2 }
  0xf0   :  { %v366_v19 = vadd.f32 %v365_v18, %v4257_v30  ;;  %v460_v20 = vmul.f32 %v3461_v17, %v457_v8  ;;  %vm465_vm2 = vweird.f32 %v3461_v17  ;;  %v3463_v44 = vpop.eup %3462 }
  0xf1   :  { %v315_v21 = vpop.f32.mrf.mxu1  ;;  %vm466_vm5 = vmor %vm464_vm4, %vm465_vm2 }
  0xf2   :  { %v4302_v22 = vadd.f32 %v315_v21, %v275_v55  ;;  %v406_v24 = vpop.f32.mrf.mxu3  ;;  %v461_v25 = vsub.f32 1.0, %v460_v20 }
  0xf3   :  { %v4305_v26 = vadd.f32 %v406_v24, %v366_v19 }
  0xf4   :  { %v462_v29 = vmul.f32 %v3461_v17, %v461_v25 }
  0xf6   :  { %v463_v34 = vadd.f32 %v3461_v17, %v462_v29 }
  0xf7   :  { %v368_v36 = vpop.f32.mrf.mxu2 }
  0xf8   :  { %v369_v41 = vadd.f32 %v368_v36, %v4257_v30  ;;  %v467_v42 = vsel %vm466_vm5, %v3461_v17, %v463_v34  ;;  %v3298_v36 = vsel %vm150_vm11, 1.0, %v3922_v23 }
  0xf9   :  { %v318_v46 = vpop.f32.mrf.mxu1  ;;  %v472_v47 = vsel %vm469_vm6, %v471_v38, %v467_v42  ;;  %v157_v38 = vsub.f32 1.0, %v3298_v36 }
  0xfa   :  { %v4314_v48 = vadd.f32 %v318_v46, %v278_v40  ;;  %v409_v49 = vpop.f32.mrf.mxu3  ;;  %v489_v52 = vsel %vm4307_vm3, %v3463_v44, %v472_v47 }
  0xfb   :  { %v410_v54 = vadd.f32 %v409_v49, %v369_v41  ;;  %495 = vrot.lane.b32.xlu0 %v489_v52, %s3923_s5  ;;  %v491_v14 = vmul.f32 0.0, %v489_v52  ;;  %v158_v40 = vmul.f32 0.0, %v157_v38  ;;  %v154_v49 = vmul.f32 0.0, %v3298_v36 }
  0xfd   :  { %v448_v55 = vadd.f32 %v444_v50, %v410_v54  ;;  %v4344_v41 = vadd.f32 %v3298_v36, %v158_v40  ;;  %v4352_v16 = vadd.f32 %v157_v38, %v154_v49 }
  0xff   :  { %v3300_v28 = vmul.f32 -1.442695, %v448_v55 }
 0x101   :  { %3464 = vpow2.f32 %v3300_v28  ;;  %v321_v30 = vpop.f32.mrf.mxu1 }
 0x102   :  { %v4320_v32 = vadd.f32 %v321_v30, %v4263_v35  ;;  %v310_v30 = vadd.f32 %v4289_v4, %v4268_v39 }
 0x107   :  { %v3465_v56 = vpop.eup %3464 }
 0x108   :  { %v458_v57 = vadd.f32 1.0, %v3465_v56 }
 0x109   :  { %v324_v58 = vpop.f32.mrf.mxu1 }
 0x10a   :  { %3466 = vrcp.f32 %v458_v57  ;;  %v4323_v59 = vadd.f32 %v324_v58, %v4272_v43  ;;  %v485_v0 = vand.u32 2147483648, %v458_v57  ;;  %v483_v2 = vand.u32 2147483647, %v458_v57 }
 0x10b   :  { %3468 = vtanh.f32 %v448_v55  ;;  %vm479_vm8 = vweird.f32 %v458_v57 }
 0x10c   :  { %v486_v35 = vor.u32 1.1754944e-38, %v485_v0  ;;  %vm484_vm10 = vcmp.eq.f32.partialorder %v483_v2, 8.507059e+37 }
 0x110   :  { %v3467_v60 = vpop.eup %3466 }
 0x111   :  { %v475_v61 = vmul.f32 %v3467_v60, %v458_v57  ;;  %vm480_vm7 = vweird.f32 %v3467_v60  ;;  %v3469_v7 = vpop.eup %3468  ;;  %v4360_v28 = vpop.f32.mrf.mxu1 }
 0x112   :  { %vm481_vm9 = vmor %vm479_vm8, %vm480_vm7 }
 0x113   :  { %v476_v63 = vsub.f32 1.0, %v475_v61 }
 0x115   :  { %v477_v1 = vmul.f32 %v3467_v60, %v476_v63 }
 0x117   :  { %v478_v3 = vadd.f32 %v3467_v60, %v477_v1 }
 0x119   :  { %v482_v5 = vsel %vm481_vm9, %v3467_v60, %v478_v3 }
 0x11a   :  { %v487_v8 = vsel %vm484_vm10, %v486_v35, %v482_v5 }
 0x11b   :  { %v490_v43 = vsel %vm4307_vm3, %v3469_v7, %v487_v8 }
 0x11c   :  { %497 = vrot.lane.b32.xlu0 %v490_v43, %s3923_s5  ;;  %v492_v20 = vmul.f32 0.0, %v490_v43 }
 0x16d   :  { %v496_v9 = vpop.permute.xlu0 %495 }
 0x16e   :  { %v501_v10 = vmul.f32 %v496_v9, %v489_v52 }
 0x170   :  { %505 = vrot.lane.b32.xlu1 %v501_v10, %s3924_s30 }
 0x18e   :  { %v498_v11 = vpop.permute.xlu0 %497 }
 0x18f   :  { %v502_v12 = vmul.f32 %v498_v11, %v490_v43 }
 0x191   :  { %507 = vrot.lane.b32.xlu1 %v502_v12, %s3924_s30 }
 0x1e2   :  { %v506_v17 = vpop.permute.xlu1 %505 }
 0x1e3   :  { %v4330_v18 = vadd.f32 %v506_v17, %v491_v14 }
 0x1e5   :  { %3470 = vtanh.f32 %v4330_v18 }
 0x1eb   :  { %v3471_v19 = vpop.eup %3470 }
 0x1ec   :  { %517 = vrot.lane.b32.xlu2 %v3471_v19, %s3923_s5 }
 0x203   :  { %v508_v21 = vpop.permute.xlu1 %507 }
 0x204   :  { %v4334_v24 = vadd.f32 %v508_v21, %v492_v20 }
 0x206   :  { %3472 = vtanh.f32 %v4334_v24 }
 0x20c   :  { %v3473_v25 = vpop.eup %3472 }
 0x20d   :  { %519 = vrot.lane.b32.xlu2 %v3473_v25, %s3923_s5 }
 0x246   :  { %v518_v27 = vpop.permute.xlu2 %517 }
 0x247   :  { %v523_v29 = vmul.f32 %v518_v27, %v489_v52 }
 0x249   :  { %533 = vrot.lane.b32.xlu1 %v523_v29, %s3923_s5  ;;  %527 = vrot.lane.b32.xlu0 %v523_v29, %s3924_s30 }
 0x267   :  { %v520_v31 = vpop.permute.xlu2 %519 }
 0x268   :  { %v524_v34 = vmul.f32 %v520_v31, %v490_v43 }
 0x26a   :  { %535 = vrot.lane.b32.xlu0 %v524_v34, %s3923_s5  ;;  %529 = vrot.lane.b32.xlu2 %v524_v34, %s3924_s30 }
 0x2bb   :  { %v534_v42 = vpop.permute.xlu1 %533  ;;  %v4346_v44 = vpop.permute.xlu0 %527 }
 0x2bc   :  { %v540_v46 = vsel %vm539_vm12, %v4346_v44, %v534_v42 }
 0x2bd   :  { %v542_v47 = vmul.f32 %v540_v46, %v4344_v41 }
 0x2bf   :  { %3301 = vmatmul.msk.f32.vlgmr.msra.gmra.mxu1 %vm420_vm13, %v542_v47 }
 0x2c4   :  { %v530_v50 = vpop.permute.xlu2 %529 }
 0x2dc   :  { %v4354_v52 = vpop.permute.xlu0 %535 }
 0x2dd   :  { %v541_v54 = vsel %vm539_vm12, %v530_v50, %v4354_v52 }
 0x2de   :  { %v543_v55 = vmul.f32 %v541_v54, %v4352_v16 }
 0x2e0   :  { %3302 = vmatmul.msk.f32.gmra.mxu1 %vm420_vm13, %v543_v55 }
 0x33c   :  { %v567_v56 = vpop.f32.mrf.mxu1 }
 0x33d   :  { %v573_v57 = vadd.f32 %v567_v56, %v310_v30 }
 0x33f   :  { %v3303_v58 = vmul.f32 -1.442695, %v573_v57 }
 0x341   :  { %3474 = vpow2.f32 %v3303_v58 }
 0x347   :  { %v3475_v60 = vpop.eup %3474 }
 0x348   :  { %v583_v61 = vadd.f32 1.0, %v3475_v60 }
 0x34a   :  { %3476 = vrcp.f32 %v583_v61  ;;  %v596_v2 = vand.u32 2147483648, %v583_v61  ;;  %v594_v35 = vand.u32 2147483647, %v583_v61  ;;  %vm590_vm15 = vweird.f32 %v583_v61 }
 0x34b   :  { %3478 = vtanh.f32 %v573_v57 }
 0x34c   :  { %v597_v7 = vor.u32 1.1754944e-38, %v596_v2  ;;  %vm595_vm1 = vcmp.eq.f32.partialorder %v594_v35, 8.507059e+37 }
 0x350   :  { %v3477_v63 = vpop.eup %3476 }
 0x351   :  { %v586_v0 = vmul.f32 %v3477_v63, %v583_v61  ;;  %vm591_vm14 = vweird.f32 %v3477_v63  ;;  %v3479_v4 = vpop.eup %3478 }
 0x352   :  { %vm592_vm0 = vmor %vm590_vm15, %vm591_vm14 }
 0x353   :  { %v587_v1 = vsub.f32 1.0, %v586_v0 }
 0x355   :  { %v588_v3 = vmul.f32 %v3477_v63, %v587_v1 }
 0x357   :  { %v589_v5 = vadd.f32 %v3477_v63, %v588_v3 }
 0x359   :  { %v593_v39 = vsel %vm592_vm0, %v3477_v63, %v589_v5 }
 0x35a   :  { %v598_v8 = vsel %vm595_vm1, %v597_v7, %v593_v39 }
 0x35b   :  { %v615_v43 = vsel %vm4307_vm3, %v3479_v4, %v598_v8 }
 0x35c   :  { %621 = vrot.lane.b32.xlu1 %v615_v43, %s3923_s5  ;;  %v617_v49 = vmul.f32 %v615_v43, %v4330_v18 }
 0x35d   :  { %v570_v9 = vpop.f32.mrf.mxu1 }
 0x35e   :  { %v574_v10 = vadd.f32 %v570_v9, %v4305_v26 }
 0x360   :  { %v3304_v11 = vmul.f32 -1.442695, %v574_v10 }
 0x362   :  { %3480 = vpow2.f32 %v3304_v11 }
 0x368   :  { %v3481_v12 = vpop.eup %3480 }
 0x369   :  { %v584_v14 = vadd.f32 1.0, %v3481_v12 }
 0x36b   :  { %3482 = vrcp.f32 %v584_v14  ;;  %v611_v21 = vand.u32 2147483648, %v584_v14  ;;  %v609_v27 = vand.u32 2147483647, %v584_v14  ;;  %vm605_vm4 = vweird.f32 %v584_v14 }
 0x36c   :  { %3484 = vtanh.f32 %v574_v10 }
 0x36d   :  { %v612_v31 = vor.u32 1.1754944e-38, %v611_v21  ;;  %vm610_vm6 = vcmp.eq.f32.partialorder %v609_v27, 8.507059e+37 }
 0x371   :  { %v3483_v17 = vpop.eup %3482 }
 0x372   :  { %v601_v19 = vmul.f32 %v3483_v17, %v584_v14  ;;  %vm606_vm2 = vweird.f32 %v3483_v17  ;;  %v3485_v26 = vpop.eup %3484 }
 0x373   :  { %vm607_vm5 = vmor %vm605_vm4, %vm606_vm2 }
 0x374   :  { %v602_v20 = vsub.f32 1.0, %v601_v19 }
 0x376   :  { %v603_v25 = vmul.f32 %v3483_v17, %v602_v20 }
 0x378   :  { %v604_v29 = vadd.f32 %v3483_v17, %v603_v25 }
 0x37a   :  { %v608_v34 = vsel %vm607_vm5, %v3483_v17, %v604_v29 }
 0x37b   :  { %v613_v36 = vsel %vm610_vm6, %v612_v31, %v608_v34 }
 0x37c   :  { %v616_v38 = vsel %vm4307_vm3, %v3485_v26, %v613_v36 }
 0x37d   :  { %623 = vrot.lane.b32.xlu2 %v616_v38, %s3923_s5  ;;  %v618_v55 = vmul.f32 %v616_v38, %v4334_v24 }
 0x3ce   :  { %v622_v40 = vpop.permute.xlu1 %621 }
 0x3cf   :  { %v627_v42 = vmul.f32 %v622_v40, %v615_v43 }
 0x3d1   :  { %631 = vrot.lane.b32.xlu0 %v627_v42, %s3924_s30 }
 0x3d7   :  { %v624_v46 = vpop.permute.xlu2 %623 }
 0x3d8   :  { %v628_v47 = vmul.f32 %v624_v46, %v616_v38 }
 0x3da   :  { %633 = vrot.lane.b32.xlu1 %v628_v47, %s3924_s30 }
 0x443   :  { %v632_v50 = vpop.permute.xlu0 %631 }
 0x444   :  { %v4374_v54 = vadd.f32 %v632_v50, %v617_v49 }
 0x446   :  { %3486 = vtanh.f32 %v4374_v54 }
 0x44c   :  { %v3487_v30 = vpop.eup %3486  ;;  %v634_v56 = vpop.permute.xlu1 %633 }
 0x44d   :  { %v4378_v57 = vadd.f32 %v634_v56, %v618_v55  ;;  %643 = vrot.lane.b32.xlu2 %v3487_v30, %s3923_s5 }
 0x44f   :  { %3488 = vtanh.f32 %v4378_v57 }
 0x455   :  { %v3489_v58 = vpop.eup %3488 }
 0x456   :  { %645 = vrot.lane.b32.xlu0 %v3489_v58, %s3923_s5 }
 0x4a7   :  { %v644_v60 = vpop.permute.xlu2 %643 }
 0x4a8   :  { %v649_v18 = vmul.f32 %v644_v60, %v615_v43 }
 0x4aa   :  { %659 = vrot.lane.b32.xlu2 %v649_v18, %s3923_s5  ;;  %653 = vrot.lane.b32.xlu1 %v649_v18, %s3924_s30 }
 0x4c8   :  { %v646_v61 = vpop.permute.xlu0 %645 }
 0x4c9   :  { %v650_v63 = vmul.f32 %v646_v61, %v616_v38 }
 0x4cb   :  { %661 = vrot.lane.b32.xlu1 %v650_v63, %s3923_s5  ;;  %655 = vrot.lane.b32.xlu0 %v650_v63, %s3924_s30 }
 0x504   :  { %v660_v24 = vpop.permute.xlu2 %659 }
 0x51c   :  { %v4387_v0 = vpop.permute.xlu1 %653 }
 0x51d   :  { %v665_v1 = vsel %vm539_vm12, %v4387_v0, %v660_v24 }
 0x51e   :  { %v667_v2 = vmul.f32 %v665_v1, %v4344_v41 }
 0x520   :  { %3305 = vmatmul.msk.f32.vlgmr.msrb.gmra.mxu2 %vm420_vm13, %v667_v2 }
 0x53d   :  { %v4393_v3 = vpop.permute.xlu1 %661  ;;  %v656_v35 = vpop.permute.xlu0 %655 }
 0x53e   :  { %v666_v5 = vsel %vm539_vm12, %v656_v35, %v4393_v3 }
 0x53f   :  { %v668_v7 = vmul.f32 %v666_v5, %v4352_v16 }
 0x541   :  { %3306 = vmatmul.msk.f32.gmra.mxu2 %vm420_vm13, %v668_v7 }
 0x5a3   :  { %v692_v39 = vpop.f32.mrf.mxu2 }
 0x5a4   :  { %v698_v4 = vadd.f32 %v692_v39, %v4294_v13 }
 0x5a6   :  { %v3307_v8 = vmul.f32 -1.442695, %v698_v4 }
 0x5a8   :  { %3490 = vpow2.f32 %v3307_v8 }
 0x5ae   :  { %v3491_v43 = vpop.eup %3490 }
 0x5af   :  { %v708_v9 = vadd.f32 1.0, %v3491_v43 }
 0x5b1   :  { %3492 = vrcp.f32 %v708_v9  ;;  %v721_v14 = vand.u32 2147483648, %v708_v9  ;;  %v719_v19 = vand.u32 2147483647, %v708_v9  ;;  %vm715_vm8 = vweird.f32 %v708_v9 }
 0x5b2   :  { %3494 = vtanh.f32 %v698_v4 }
 0x5b3   :  { %v722_v21 = vor.u32 1.1754944e-38, %v721_v14  ;;  %vm720_vm10 = vcmp.eq.f32.partialorder %v719_v19, 8.507059e+37 }
 0x5b7   :  { %v3493_v10 = vpop.eup %3492 }
 0x5b8   :  { %v711_v11 = vmul.f32 %v3493_v10, %v708_v9  ;;  %vm716_vm7 = vweird.f32 %v3493_v10  ;;  %v3495_v13 = vpop.eup %3494 }
 0x5b9   :  { %vm717_vm9 = vmor %vm715_vm8, %vm716_vm7 }
 0x5ba   :  { %v712_v12 = vsub.f32 1.0, %v711_v11 }
 0x5bc   :  { %v713_v17 = vmul.f32 %v3493_v10, %v712_v12 }
 0x5be   :  { %v714_v20 = vadd.f32 %v3493_v10, %v713_v17 }
 0x5c0   :  { %v718_v25 = vsel %vm717_vm9, %v3493_v10, %v714_v20 }
 0x5c1   :  { %v723_v27 = vsel %vm720_vm10, %v722_v21, %v718_v25 }
 0x5c2   :  { %v740_v29 = vsel %vm4307_vm3, %v3495_v13, %v723_v27 }
 0x5c3   :  { %746 = vrot.lane.b32.xlu2 %v740_v29, %s3923_s5  ;;  %v742_v1 = vmul.f32 %v740_v29, %v4374_v54 }
 0x5c4   :  { %v695_v31 = vpop.f32.mrf.mxu2 }
 0x5c5   :  { %v699_v34 = vadd.f32 %v695_v31, %v4296_v15 }
 0x5c7   :  { %v3308_v26 = vmul.f32 -1.442695, %v699_v34 }
 0x5c9   :  { %3496 = vpow2.f32 %v3308_v26 }
 0x5cf   :  { %v3497_v36 = vpop.eup %3496 }
 0x5d0   :  { %v709_v38 = vadd.f32 1.0, %v3497_v36 }
 0x5d2   :  { %3498 = vrcp.f32 %v709_v38  ;;  %v736_v47 = vand.u32 2147483648, %v709_v38  ;;  %v734_v50 = vand.u32 2147483647, %v709_v38  ;;  %vm730_vm14 = vweird.f32 %v709_v38 }
 0x5d3   :  { %3500 = vtanh.f32 %v699_v34 }
 0x5d4   :  { %v737_v30 = vor.u32 1.1754944e-38, %v736_v47  ;;  %vm735_vm0 = vcmp.eq.f32.partialorder %v734_v50, 8.507059e+37 }
 0x5d8   :  { %v3499_v40 = vpop.eup %3498 }
 0x5d9   :  { %v726_v42 = vmul.f32 %v3499_v40, %v709_v38  ;;  %vm731_vm11 = vweird.f32 %v3499_v40  ;;  %v3501_v15 = vpop.eup %3500 }
 0x5da   :  { %vm732_vm15 = vmor %vm730_vm14, %vm731_vm11 }
 0x5db   :  { %v727_v46 = vsub.f32 1.0, %v726_v42 }
 0x5dd   :  { %v728_v49 = vmul.f32 %v3499_v40, %v727_v46 }
 0x5df   :  { %v729_v55 = vadd.f32 %v3499_v40, %v728_v49 }
 0x5e1   :  { %v733_v56 = vsel %vm732_vm15, %v3499_v40, %v729_v55 }
 0x5e2   :  { %v738_v58 = vsel %vm735_vm0, %v737_v30, %v733_v56 }
 0x5e3   :  { %v741_v60 = vsel %vm4307_vm3, %v3501_v15, %v738_v58 }
 0x5e4   :  { %748 = vrot.lane.b32.xlu0 %v741_v60, %s3923_s5  ;;  %v743_v7 = vmul.f32 %v741_v60, %v4378_v57 }
 0x61d   :  { %v747_v18 = vpop.permute.xlu2 %746 }
 0x61e   :  { %v752_v61 = vmul.f32 %v747_v18, %v740_v29 }
 0x620   :  { %756 = vrot.lane.b32.xlu1 %v752_v61, %s3924_s30 }
 0x656   :  { %v749_v63 = vpop.permute.xlu0 %748 }
 0x657   :  { %v753_v24 = vmul.f32 %v749_v63, %v741_v60 }
 0x659   :  { %758 = vrot.lane.b32.xlu2 %v753_v24, %s3924_s30 }
 0x692   :  { %v757_v2 = vpop.permute.xlu1 %756 }
 0x693   :  { %v4410_v35 = vadd.f32 %v757_v2, %v742_v1 }
 0x695   :  { %3502 = vtanh.f32 %v4410_v35 }
 0x69b   :  { %v3503_v5 = vpop.eup %3502 }
 0x69c   :  { %768 = vrot.lane.b32.xlu0 %v3503_v5, %s3923_s5 }
 0x6b3   :  { %v759_v39 = vpop.permute.xlu2 %758 }
 0x6b4   :  { %v4415_v4 = vadd.f32 %v759_v39, %v743_v7 }
 0x6b6   :  { %3504 = vtanh.f32 %v4415_v4 }
 0x6bc   :  { %v3505_v8 = vpop.eup %3504 }
 0x6bd   :  { %770 = vrot.lane.b32.xlu1 %v3505_v8, %s3923_s5 }
 0x70e   :  { %v769_v43 = vpop.permute.xlu0 %768 }
 0x70f   :  { %v774_v54 = vmul.f32 %v769_v43, %v740_v29 }
 0x711   :  { %784 = vrot.lane.b32.xlu0 %v774_v54, %s3923_s5  ;;  %778 = vrot.lane.b32.xlu2 %v774_v54, %s3924_s30 }
 0x72f   :  { %v771_v9 = vpop.permute.xlu1 %770 }
 0x730   :  { %v775_v10 = vmul.f32 %v771_v9, %v741_v60 }
 0x732   :  { %786 = vrot.lane.b32.xlu2 %v775_v10, %s3923_s5  ;;  %780 = vrot.lane.b32.xlu1 %v775_v10, %s3924_s30 }
 0x76b   :  { %v4423_v57 = vpop.permute.xlu2 %778 }
 0x783   :  { %v785_v11 = vpop.permute.xlu0 %784 }
 0x784   :  { %v790_v12 = vsel %vm539_vm12, %v4423_v57, %v785_v11 }
 0x785   :  { %v792_v14 = vmul.f32 %v790_v12, %v4344_v41 }
 0x787   :  { %3309 = vmatmul.msk.f32.vlgmr.msrb.gmra.mxu3 %vm420_vm13, %v792_v14 }
 0x78c   :  { %v4429_v17 = vpop.permute.xlu2 %786 }
 0x7a4   :  { %v781_v19 = vpop.permute.xlu1 %780 }
 0x7a5   :  { %v791_v20 = vsel %vm539_vm12, %v781_v19, %v4429_v17 }
 0x7a6   :  { %v793_v21 = vmul.f32 %v791_v20, %v4352_v16 }
 0x7a8   :  { %3310 = vmatmul.msk.f32.gmra.mxu3 %vm420_vm13, %v793_v21 }
 0x80a   :  { %v817_v25 = vpop.f32.mrf.mxu3 }
 0x80b   :  { %v823_v13 = vadd.f32 %v817_v25, %v4302_v22 }
 0x80d   :  { %v3311_v27 = vmul.f32 -1.442695, %v823_v13 }
 0x80f   :  { %3506 = vpow2.f32 %v3311_v27 }
 0x815   :  { %v3507_v29 = vpop.eup %3506 }
 0x816   :  { %v833_v31 = vadd.f32 1.0, %v3507_v29 }
 0x818   :  { %3508 = vrcp.f32 %v833_v31  ;;  %v846_v38 = vand.u32 2147483648, %v833_v31  ;;  %v844_v42 = vand.u32 2147483647, %v833_v31  ;;  %vm840_vm2 = vweird.f32 %v833_v31 }
 0x819   :  { %3510 = vtanh.f32 %v823_v13 }
 0x81a   :  { %v847_v47 = vor.u32 1.1754944e-38, %v846_v38  ;;  %vm845_vm5 = vcmp.eq.f32.partialorder %v844_v42, 8.507059e+37 }
 0x81e   :  { %v3509_v34 = vpop.eup %3508 }
 0x81f   :  { %v836_v26 = vmul.f32 %v3509_v34, %v833_v31  ;;  %vm841_vm1 = vweird.f32 %v3509_v34  ;;  %v3511_v22 = vpop.eup %3510 }
 0x820   :  { %vm842_vm4 = vmor %vm840_vm2, %vm841_vm1 }
 0x821   :  { %v837_v36 = vsub.f32 1.0, %v836_v26 }
 0x823   :  { %v838_v40 = vmul.f32 %v3509_v34, %v837_v36 }
 0x825   :  { %v839_v46 = vadd.f32 %v3509_v34, %v838_v40 }
 0x827   :  { %v843_v49 = vsel %vm842_vm4, %v3509_v34, %v839_v46 }
 0x828   :  { %v848_v50 = vsel %vm845_vm5, %v847_v47, %v843_v49 }
 0x829   :  { %v865_v55 = vsel %vm4307_vm3, %v3511_v22, %v848_v50 }
 0x82a   :  { %871 = vrot.lane.b32.xlu0 %v865_v55, %s3923_s5  ;;  %v867_v12 = vmul.f32 %v865_v55, %v4410_v35 }
 0x82b   :  { %v820_v30 = vpop.f32.mrf.mxu3 }
 0x82c   :  { %v824_v56 = vadd.f32 %v820_v30, %v4291_v6 }
 0x82e   :  { %v3312_v15 = vmul.f32 -1.442695, %v824_v56 }
 0x830   :  { %3512 = vpow2.f32 %v3312_v15 }
 0x836   :  { %v3513_v58 = vpop.eup %3512 }
 0x837   :  { %v834_v60 = vadd.f32 1.0, %v3513_v58 }
 0x839   :  { %3514 = vrcp.f32 %v834_v60  ;;  %v861_v24 = vand.u32 2147483648, %v834_v60  ;;  %v859_v2 = vand.u32 2147483647, %v834_v60  ;;  %vm855_vm7 = vweird.f32 %v834_v60 }
 0x83a   :  { %3516 = vtanh.f32 %v824_v56 }
 0x83b   :  { %v862_v7 = vor.u32 1.1754944e-38, %v861_v24  ;;  %vm860_vm9 = vcmp.eq.f32.partialorder %v859_v2, 8.507059e+37 }
 0x83f   :  { %v3515_v18 = vpop.eup %3514 }
 0x840   :  { %v851_v61 = vmul.f32 %v3515_v18, %v834_v60  ;;  %vm856_vm6 = vweird.f32 %v3515_v18  ;;  %v3517_v6 = vpop.eup %3516 }
 0x841   :  { %vm857_vm8 = vmor %vm855_vm7, %vm856_vm6 }
 0x842   :  { %v852_v63 = vsub.f32 1.0, %v851_v61 }
 0x844   :  { %v853_v1 = vmul.f32 %v3515_v18, %v852_v63 }
 0x846   :  { %v854_v5 = vadd.f32 %v3515_v18, %v853_v1 }
 0x848   :  { %v858_v39 = vsel %vm857_vm8, %v3515_v18, %v854_v5 }
 0x849   :  { %v863_v8 = vsel %vm860_vm9, %v862_v7, %v858_v39 }
 0x84a   :  { %v866_v43 = vsel %vm4307_vm3, %v3517_v6, %v863_v8 }
 0x84b   :  { %873 = vrot.lane.b32.xlu1 %v866_v43, %s3923_s5  ;;  %v868_v21 = vmul.f32 %v866_v43, %v4415_v4 }
 0x89c   :  { %v872_v54 = vpop.permute.xlu0 %871 }
 0x89d   :  { %v877_v9 = vmul.f32 %v872_v54, %v865_v55 }
 0x89f   :  { %881 = vrot.lane.b32.xlu2 %v877_v9, %s3924_s30 }
 0x8bd   :  { %v874_v10 = vpop.permute.xlu1 %873 }
 0x8be   :  { %v878_v11 = vmul.f32 %v874_v10, %v866_v43 }
 0x8c0   :  { %883 = vrot.lane.b32.xlu0 %v878_v11, %s3924_s30 }
 0x8f9   :  { %v882_v14 = vpop.permute.xlu2 %881 }
 0x8fa   :  { %v4446_v19 = vadd.f32 %v882_v14, %v867_v12 }
 0x8fc   :  { %3518 = vtanh.f32 %v4446_v19 }
 0x902   :  { %v3519_v20 = vpop.eup %3518 }
 0x903   :  { %893 = vrot.lane.b32.xlu1 %v3519_v20, %s3923_s5 }
 0x932   :  { %v884_v25 = vpop.permute.xlu0 %883 }
 0x933   :  { %v4451_v13 = vadd.f32 %v884_v25, %v868_v21 }
 0x935   :  { %3520 = vtanh.f32 %v4451_v13 }
 0x93b   :  { %v3521_v27 = vpop.eup %3520 }
 0x93c   :  { %895 = vrot.lane.b32.xlu2 %v3521_v27, %s3923_s5 }
 0x975   :  { %v894_v29 = vpop.permute.xlu1 %893 }
 0x976   :  { %v899_v35 = vmul.f32 %v894_v29, %v865_v55 }
 0x978   :  { %909 = vrot.lane.b32.xlu1 %v899_v35, %s3923_s5  ;;  %903 = vrot.lane.b32.xlu0 %v899_v35, %s3924_s30 }
 0x996   :  { %v896_v31 = vpop.permute.xlu2 %895 }
 0x997   :  { %v900_v34 = vmul.f32 %v896_v31, %v866_v43 }
 0x999   :  { %911 = vrot.lane.b32.xlu0 %v900_v34, %s3923_s5  ;;  %905 = vrot.lane.b32.xlu2 %v900_v34, %s3924_s30 }
 0x9ea   :  { %v910_v4 = vpop.permute.xlu1 %909  ;;  %v4459_v26 = vpop.permute.xlu0 %903 }
 0x9eb   :  { %v915_v36 = vsel %vm539_vm12, %v4459_v26, %v910_v4 }
 0x9ec   :  { %v917_v38 = vmul.f32 %v915_v36, %v4344_v41 }
 0x9ee   :  { %3313 = vmatmul.msk.f32.vlgmr.msra.gmra.mxu0 %vm420_vm13, %v917_v38 }
 0x9f3   :  { %v906_v40 = vpop.permute.xlu2 %905 }
 0xa0b   :  { %v4465_v42 = vpop.permute.xlu0 %911 }
 0xa0c   :  { %v916_v46 = vsel %vm539_vm12, %v906_v40, %v4465_v42 }
 0xa0d   :  { %v918_v47 = vmul.f32 %v916_v46, %v4352_v16 }
 0xa0f   :  { %3314 = vmatmul.msk.f32.gmra.mxu0 %vm420_vm13, %v918_v47 }
 0xa6b   :  { %v942_v49 = vpop.f32.mrf.mxu0 }
 0xa6c   :  { %v948_v22 = vadd.f32 %v942_v49, %v4314_v48 }
 0xa6e   :  { %v3315_v50 = vmul.f32 -1.442695, %v948_v22 }
 0xa70   :  { %3522 = vpow2.f32 %v3315_v50 }
 0xa76   :  { %v3523_v55 = vpop.eup %3522 }
 0xa77   :  { %v958_v30 = vadd.f32 1.0, %v3523_v55 }
 0xa79   :  { %3524 = vrcp.f32 %v958_v30  ;;  %v971_v60 = vand.u32 2147483648, %v958_v30  ;;  %v969_v61 = vand.u32 2147483647, %v958_v30  ;;  %vm965_vm11 = vweird.f32 %v958_v30 }
 0xa7a   :  { %3526 = vtanh.f32 %v948_v22 }
 0xa7b   :  { %v972_v24 = vor.u32 1.1754944e-38, %v971_v60  ;;  %vm970_vm15 = vcmp.eq.f32.partialorder %v969_v61, 8.507059e+37 }
 0xa7f   :  { %v3525_v56 = vpop.eup %3524 }
 0xa80   :  { %v961_v15 = vmul.f32 %v3525_v56, %v958_v30  ;;  %vm966_vm10 = vweird.f32 %v3525_v56  ;;  %v3527_v48 = vpop.eup %3526 }
 0xa81   :  { %vm967_vm14 = vmor %vm965_vm11, %vm966_vm10 }
 0xa82   :  { %v962_v58 = vsub.f32 1.0, %v961_v15 }
 0xa84   :  { %v963_v18 = vmul.f32 %v3525_v56, %v962_v58 }
 0xa86   :  { %v964_v63 = vadd.f32 %v3525_v56, %v963_v18 }
 0xa88   :  { %v968_v1 = vsel %vm967_vm14, %v3525_v56, %v964_v63 }
 0xa89   :  { %v973_v2 = vsel %vm970_vm15, %v972_v24, %v968_v1 }
 0xa8a   :  { %v990_v5 = vsel %vm4307_vm3, %v3527_v48, %v973_v2 }
 0xa8b   :  { %996 = vrot.lane.b32.xlu1 %v990_v5, %s3923_s5  ;;  %v992_v36 = vmul.f32 %v990_v5, %v4446_v19 }
 0xa8c   :  { %v945_v7 = vpop.f32.mrf.mxu0 }
 0xa8d   :  { %v949_v39 = vadd.f32 %v945_v7, %v4286_v62 }
 0xa8f   :  { %v3316_v6 = vmul.f32 -1.442695, %v949_v39 }
 0xa91   :  { %3528 = vpow2.f32 %v3316_v6 }
 0xa97   :  { %v3529_v8 = vpop.eup %3528 }
 0xa98   :  { %v959_v43 = vadd.f32 1.0, %v3529_v8 }
 0xa9a   :  { %3530 = vrcp.f32 %v959_v43  ;;  %v986_v11 = vand.u32 2147483648, %v959_v43  ;;  %v984_v14 = vand.u32 2147483647, %v959_v43  ;;  %vm980_vm1 = vweird.f32 %v959_v43 }
 0xa9b   :  { %3532 = vtanh.f32 %v949_v39 }
 0xa9c   :  { %v987_v21 = vor.u32 1.1754944e-38, %v986_v11  ;;  %vm985_vm4 = vcmp.eq.f32.partialorder %v984_v14, 8.507059e+37 }
 0xaa0   :  { %v3531_v54 = vpop.eup %3530 }
 0xaa1   :  { %v976_v9 = vmul.f32 %v3531_v54, %v959_v43  ;;  %vm981_vm0 = vweird.f32 %v3531_v54  ;;  %v3533_v62 = vpop.eup %3532 }
 0xaa2   :  { %vm982_vm2 = vmor %vm980_vm1, %vm981_vm0 }
 0xaa3   :  { %v977_v10 = vsub.f32 1.0, %v976_v9 }
 0xaa5   :  { %v978_v12 = vmul.f32 %v3531_v54, %v977_v10 }
 0xaa7   :  { %v979_v20 = vadd.f32 %v3531_v54, %v978_v12 }
 0xaa9   :  { %v983_v25 = vsel %vm982_vm2, %v3531_v54, %v979_v20 }
 0xaaa   :  { %v988_v27 = vsel %vm985_vm4, %v987_v21, %v983_v25 }
 0xaab   :  { %v991_v29 = vsel %vm4307_vm3, %v3533_v62, %v988_v27 }
 0xaac   :  { %998 = vrot.lane.b32.xlu2 %v991_v29, %s3923_s5  ;;  %v993_v46 = vmul.f32 %v991_v29, %v4451_v13 }
 0xafd   :  { %v997_v35 = vpop.permute.xlu1 %996 }
 0xafe   :  { %v1002_v31 = vmul.f32 %v997_v35, %v990_v5 }
 0xb00   :  { %1006 = vrot.lane.b32.xlu0 %v1002_v31, %s3924_s30 }
 0xb06   :  { %v999_v34 = vpop.permute.xlu2 %998 }
 0xb07   :  { %v1003_v4 = vmul.f32 %v999_v34, %v991_v29 }
 0xb09   :  { %1008 = vrot.lane.b32.xlu1 %v1003_v4, %s3924_s30 }
 0xb72   :  { %v1007_v38 = vpop.permute.xlu0 %1006 }
 0xb73   :  { %v4482_v40 = vadd.f32 %v1007_v38, %v992_v36 }
 0xb75   :  { %3534 = vtanh.f32 %v4482_v40 }
 0xb7b   :  { %v3535_v47 = vpop.eup %3534  ;;  %v1009_v49 = vpop.permute.xlu1 %1008 }
 0xb7c   :  { %v4486_v22 = vadd.f32 %v1009_v49, %v993_v46  ;;  %1018 = vrot.lane.b32.xlu2 %v3535_v47, %s3923_s5 }
 0xb7e   :  { %3536 = vtanh.f32 %v4486_v22 }
 0xb84   :  { %v3537_v50 = vpop.eup %3536 }
 0xb85   :  { %1020 = vrot.lane.b32.xlu0 %v3537_v50, %s3923_s5 }
 0xbd6   :  { %v1019_v55 = vpop.permute.xlu2 %1018 }
 0xbd7   :  { %v1024_v19 = vmul.f32 %v1019_v55, %v990_v5 }
 0xbd9   :  { %1034 = vrot.lane.b32.xlu2 %v1024_v19, %s3923_s5  ;;  %1028 = vrot.lane.b32.xlu1 %v1024_v19, %s3924_s30 }
 0xbf7   :  { %v1021_v30 = vpop.permute.xlu0 %1020 }
 0xbf8   :  { %v1025_v56 = vmul.f32 %v1021_v30, %v991_v29 }
 0xbfa   :  { %1036 = vrot.lane.b32.xlu1 %v1025_v56, %s3923_s5  ;;  %1030 = vrot.lane.b32.xlu0 %v1025_v56, %s3924_s30 }
 0xc33   :  { %v1035_v13 = vpop.permute.xlu2 %1034 }
 0xc4b   :  { %v4495_v15 = vpop.permute.xlu1 %1028 }
 0xc4c   :  { %v1040_v58 = vsel %vm539_vm12, %v4495_v15, %v1035_v13 }
 0xc4d   :  { %v1042_v60 = vmul.f32 %v1040_v58, %v4344_v41 }
 0xc4f   :  { %3317 = vmatmul.msk.f32.vlgmr.msrb.gmra.mxu1 %vm420_vm13, %v1042_v60 }
 0xc6c   :  { %v4501_v18 = vpop.permute.xlu1 %1036  ;;  %v1031_v61 = vpop.permute.xlu0 %1030 }
 0xc6d   :  { %v1041_v63 = vsel %vm539_vm12, %v1031_v61, %v4501_v18 }
 0xc6e   :  { %v1043_v24 = vmul.f32 %v1041_v63, %v4352_v16 }
 0xc70   :  { %3318 = vmatmul.msk.f32.gmra.mxu1 %vm420_vm13, %v1043_v24 }
 0xccc   :  { %v1067_v1 = vpop.f32.mrf.mxu1 }
 0xccd   :  { %v1073_v48 = vadd.f32 %v1067_v1, %v4320_v32 }
 0xccf   :  { %v3319_v2 = vmul.f32 -1.442695, %v1073_v48 }
 0xcd1   :  { %3538 = vpow2.f32 %v3319_v2 }
 0xcd7   :  { %v3539_v5 = vpop.eup %3538 }
 0xcd8   :  { %v1083_v7 = vadd.f32 1.0, %v3539_v5 }
 0xcda   :  { %3540 = vrcp.f32 %v1083_v7  ;;  %v1096_v43 = vand.u32 2147483648, %v1083_v7  ;;  %v1094_v9 = vand.u32 2147483647, %v1083_v7  ;;  %vm1090_vm6 = vweird.f32 %v1083_v7 }
 0xcdb   :  { %3542 = vtanh.f32 %v1073_v48 }
 0xcdc   :  { %v1097_v11 = vor.u32 1.1754944e-38, %v1096_v43  ;;  %vm1095_vm8 = vcmp.eq.f32.partialorder %v1094_v9, 8.507059e+37 }
 0xce0   :  { %v3541_v39 = vpop.eup %3540 }
 0xce1   :  { %v1086_v6 = vmul.f32 %v3541_v39, %v1083_v7  ;;  %vm1091_vm5 = vweird.f32 %v3541_v39  ;;  %v3543_v32 = vpop.eup %3542 }
 0xce2   :  { %vm1092_vm7 = vmor %vm1090_vm6, %vm1091_vm5 }
 0xce3   :  { %v1087_v8 = vsub.f32 1.0, %v1086_v6 }
 0xce5   :  { %v1088_v54 = vmul.f32 %v3541_v39, %v1087_v8 }
 0xce7   :  { %v1089_v10 = vadd.f32 %v3541_v39, %v1088_v54 }
 0xce9   :  { %v1093_v12 = vsel %vm1092_vm7, %v3541_v39, %v1089_v10 }
 0xcea   :  { %v1098_v14 = vsel %vm1095_vm8, %v1097_v11, %v1093_v12 }
 0xceb   :  { %v1115_v20 = vsel %vm4307_vm3, %v3543_v32, %v1098_v14 }
 0xcec   :  { %1121 = vrot.lane.b32.xlu2 %v1115_v20, %s3923_s5  ;;  %v1117_v58 = vmul.f32 %v1115_v20, %v4482_v40 }
 0xced   :  { %v1070_v21 = vpop.f32.mrf.mxu1 }
 0xcee   :  { %v1074_v25 = vadd.f32 %v1070_v21, %v4281_v53 }
 0xcf0   :  { %v3320_v62 = vmul.f32 -1.442695, %v1074_v25 }
 0xcf2   :  { %3544 = vpow2.f32 %v3320_v62 }
 0xcf8   :  { %v3545_v27 = vpop.eup %3544 }
 0xcf9   :  { %v1084_v29 = vadd.f32 1.0, %v3545_v27 }
 0xcfb   :  { %3546 = vrcp.f32 %v1084_v29  ;;  %v1111_v4 = vand.u32 2147483648, %v1084_v29  ;;  %v1109_v38 = vand.u32 2147483647, %v1084_v29  ;;  %vm1105_vm10 = vweird.f32 %v1084_v29 }
 0xcfc   :  { %3548 = vtanh.f32 %v1074_v25 }
 0xcfd   :  { %v1112_v47 = vor.u32 1.1754944e-38, %v1111_v4  ;;  %vm1110_vm14 = vcmp.eq.f32.partialorder %v1109_v38, 8.507059e+37 }
 0xd01   :  { %v3547_v35 = vpop.eup %3546 }
 0xd02   :  { %v1101_v31 = vmul.f32 %v3547_v35, %v1084_v29  ;;  %vm1106_vm9 = vweird.f32 %v3547_v35  ;;  %v3549_v53 = vpop.eup %3548 }
 0xd03   :  { %vm1107_vm11 = vmor %vm1105_vm10, %vm1106_vm9 }
 0xd04   :  { %v1102_v34 = vsub.f32 1.0, %v1101_v31 }
 0xd06   :  { %v1103_v36 = vmul.f32 %v3547_v35, %v1102_v34 }
 0xd08   :  { %v1104_v46 = vadd.f32 %v3547_v35, %v1103_v36 }
 0xd0a   :  { %v1108_v49 = vsel %vm1107_vm11, %v3547_v35, %v1104_v46 }
 0xd0b   :  { %v1113_v50 = vsel %vm1110_vm14, %v1112_v47, %v1108_v49 }
 0xd0c   :  { %v1116_v55 = vsel %vm4307_vm3, %v3549_v53, %v1113_v50 }
 0xd0d   :  { %1123 = vrot.lane.b32.xlu0 %v1116_v55, %s3923_s5  ;;  %v1118_v24 = vmul.f32 %v1116_v55, %v4486_v22 }
 0xd46   :  { %v1122_v19 = vpop.permute.xlu2 %1121 }
 0xd47   :  { %v1127_v30 = vmul.f32 %v1122_v19, %v1115_v20 }
 0xd49   :  { %1131 = vrot.lane.b32.xlu1 %v1127_v30, %s3924_s30 }
 0xd7f   :  { %v1124_v56 = vpop.permute.xlu0 %1123 }
 0xd80   :  { %v1128_v13 = vmul.f32 %v1124_v56, %v1116_v55 }
 0xd82   :  { %1133 = vrot.lane.b32.xlu2 %v1128_v13, %s3924_s30 }
 0xdbb   :  { %v1132_v60 = vpop.permute.xlu1 %1131 }
 0xdbc   :  { %v4518_v61 = vadd.f32 %v1132_v60, %v1117_v58 }
 0xdbe   :  { %3550 = vtanh.f32 %v4518_v61 }
 0xdc4   :  { %v3551_v63 = vpop.eup %3550 }
 0xdc5   :  { %1143 = vrot.lane.b32.xlu0 %v3551_v63, %s3923_s5 }
 0xddc   :  { %v1134_v1 = vpop.permute.xlu2 %1133 }
 0xddd   :  { %v4523_v48 = vadd.f32 %v1134_v1, %v1118_v24 }
 0xddf   :  { %3552 = vtanh.f32 %v4523_v48 }
 0xde5   :  { %v3553_v2 = vpop.eup %3552 }
 0xde6   :  { %1145 = vrot.lane.b32.xlu1 %v3553_v2, %s3923_s5 }
 0xe37   :  { %v1144_v5 = vpop.permute.xlu0 %1143 }
 0xe38   :  { %v1149_v40 = vmul.f32 %v1144_v5, %v1115_v20 }
 0xe3a   :  { %1159 = vrot.lane.b32.xlu0 %v1149_v40, %s3923_s5  ;;  %1153 = vrot.lane.b32.xlu2 %v1149_v40, %s3924_s30 }
 0xe58   :  { %v1146_v7 = vpop.permute.xlu1 %1145 }
 0xe59   :  { %v1150_v39 = vmul.f32 %v1146_v7, %v1116_v55 }
 0xe5b   :  { %1161 = vrot.lane.b32.xlu2 %v1150_v39, %s3923_s5  ;;  %1155 = vrot.lane.b32.xlu1 %v1150_v39, %s3924_s30 }
 0xe94   :  { %v4531_v22 = vpop.permute.xlu2 %1153 }
 0xeac   :  { %v1160_v6 = vpop.permute.xlu0 %1159 }
 0xead   :  { %v1165_v8 = vsel %vm539_vm12, %v4531_v22, %v1160_v6 }
 0xeae   :  { %v1167_v43 = vmul.f32 %v1165_v8, %v4344_v41 }
 0xeb0   :  { %3321 = vmatmul.msk.f32.vlgmr.msra.gmra.mxu2 %vm420_vm13, %v1167_v43 }
 0xeb5   :  { %v4537_v54 = vpop.permute.xlu2 %1161 }
 0xecd   :  { %v1156_v9 = vpop.permute.xlu1 %1155 }
 0xece   :  { %v1166_v10 = vsel %vm539_vm12, %v1156_v9, %v4537_v54 }
 0xecf   :  { %v1168_v11 = vmul.f32 %v1166_v10, %v4352_v16 }
 0xed1   :  { %3322 = vmatmul.msk.f32.gmra.mxu2 %vm420_vm13, %v1168_v11 }
 0xf33   :  { %v1192_v12 = vpop.f32.mrf.mxu2 }
 0xf34   :  { %v1198_v32 = vadd.f32 %v1192_v12, %v4323_v59 }
 0xf36   :  { %v3323_v14 = vmul.f32 -1.442695, %v1198_v32 }
 0xf38   :  { %3554 = vpow2.f32 %v3323_v14 }
 0xf3e   :  { %v3555_v20 = vpop.eup %3554 }
 0xf3f   :  { %v1208_v21 = vadd.f32 1.0, %v3555_v20 }
 0xf41   :  { %3556 = vrcp.f32 %v1208_v21  ;;  %v1221_v29 = vand.u32 2147483648, %v1208_v21  ;;  %v1219_v31 = vand.u32 2147483647, %v1208_v21  ;;  %vm1215_vm0 = vweird.f32 %v1208_v21 }
 0xf42   :  { %3558 = vtanh.f32 %v1198_v32 }
 0xf43   :  { %v1222_v4 = vor.u32 1.1754944e-38, %v1221_v29  ;;  %vm1220_vm2 = vcmp.eq.f32.partialorder %v1219_v31, 8.507059e+37 }
 0xf47   :  { %v3557_v25 = vpop.eup %3556 }
 0xf48   :  { %v1211_v62 = vmul.f32 %v3557_v25, %v1208_v21  ;;  %vm1216_vm15 = vweird.f32 %v3557_v25  ;;  %v3559_v59 = vpop.eup %3558 }
 0xf49   :  { %vm1217_vm1 = vmor %vm1215_vm0, %vm1216_vm15 }
 0xf4a   :  { %v1212_v27 = vsub.f32 1.0, %v1211_v62 }
 0xf4c   :  { %v1213_v35 = vmul.f32 %v3557_v25, %v1212_v27 }
 0xf4e   :  { %v1214_v34 = vadd.f32 %v3557_v25, %v1213_v35 }
 0xf50   :  { %v1218_v36 = vsel %vm1217_vm1, %v3557_v25, %v1214_v34 }
 0xf51   :  { %v1223_v38 = vsel %vm1220_vm2, %v1222_v4, %v1218_v36  ;;  %v328_v36 = vadd.f32 %v4360_v28, %v4279_v51 }
 0xf52   :  { %v1240_v46 = vsel %vm4307_vm3, %v3559_v59, %v1223_v38 }
 0xf53   :  { %1246 = vrot.lane.b32.xlu0 %v1240_v46, %s3923_s5  ;;  %v1242_v8 = vmul.f32 %v1240_v46, %v4518_v61 }
 0xf54   :  { %v1195_v47 = vpop.f32.mrf.mxu2 }
 0xf55   :  { %v1199_v49 = vadd.f32 %v1195_v47, %v4274_v45 }
 0xf57   :  { %v3324_v53 = vmul.f32 -1.442695, %v1199_v49 }
 0xf59   :  { %3560 = vpow2.f32 %v3324_v53 }
 0xf5f   :  { %v3561_v50 = vpop.eup %3560 }
 0xf60   :  { %v1209_v55 = vadd.f32 1.0, %v3561_v50 }
 0xf62   :  { %3562 = vrcp.f32 %v1209_v55  ;;  %v1236_v13 = vand.u32 2147483648, %v1209_v55  ;;  %v1234_v60 = vand.u32 2147483647, %v1209_v55  ;;  %vm1230_vm5 = vweird.f32 %v1209_v55 }
 0xf63   :  { %3564 = vtanh.f32 %v1199_v49 }
 0xf64   :  { %v1237_v24 = vor.u32 1.1754944e-38, %v1236_v13  ;;  %vm1235_vm7 = vcmp.eq.f32.partialorder %v1234_v60, 8.507059e+37 }
 0xf68   :  { %v3563_v19 = vpop.eup %3562 }
 0xf69   :  { %v1226_v30 = vmul.f32 %v3563_v19, %v1209_v55  ;;  %vm1231_vm4 = vweird.f32 %v3563_v19  ;;  %v3565_v45 = vpop.eup %3564 }
 0xf6a   :  { %vm1232_vm6 = vmor %vm1230_vm5, %vm1231_vm4 }
 0xf6b   :  { %v1227_v56 = vsub.f32 1.0, %v1226_v30 }
 0xf6d   :  { %v1228_v58 = vmul.f32 %v3563_v19, %v1227_v56 }
 0xf6f   :  { %v1229_v63 = vadd.f32 %v3563_v19, %v1228_v58 }
 0xf71   :  { %v1233_v1 = vsel %vm1232_vm6, %v3563_v19, %v1229_v63 }
 0xf72   :  { %v1238_v2 = vsel %vm1235_vm7, %v1237_v24, %v1233_v1 }
 0xf73   :  { %v1241_v5 = vsel %vm4307_vm3, %v3565_v45, %v1238_v2 }
 0xf74   :  { %1248 = vrot.lane.b32.xlu1 %v1241_v5, %s3923_s5  ;;  %v1243_v11 = vmul.f32 %v1241_v5, %v4523_v48 }
 0xfc5   :  { %v1247_v40 = vpop.permute.xlu0 %1246 }
 0xfc6   :  { %v1252_v7 = vmul.f32 %v1247_v40, %v1240_v46 }
 0xfc8   :  { %1256 = vrot.lane.b32.xlu2 %v1252_v7, %s3924_s30 }
 0xfe6   :  { %v1249_v39 = vpop.permute.xlu1 %1248 }
 0xfe7   :  { %v1253_v6 = vmul.f32 %v1249_v39, %v1241_v5 }
 0xfe9   :  { %1258 = vrot.lane.b32.xlu0 %v1253_v6, %s3924_s30 }
0x1022   :  { %v1257_v43 = vpop.permute.xlu2 %1256 }
0x1023   :  { %v4554_v9 = vadd.f32 %v1257_v43, %v1242_v8 }
0x1025   :  { %3566 = vtanh.f32 %v4554_v9 }
0x102b   :  { %v3567_v10 = vpop.eup %3566 }
0x102c   :  { %1268 = vrot.lane.b32.xlu1 %v3567_v10, %s3923_s5 }
0x105b   :  { %v1259_v12 = vpop.permute.xlu0 %1258 }
0x105c   :  { %v4559_v32 = vadd.f32 %v1259_v12, %v1243_v11 }
0x105e   :  { %3568 = vtanh.f32 %v4559_v32 }
0x1064   :  { %v3569_v14 = vpop.eup %3568 }
0x1065   :  { %1270 = vrot.lane.b32.xlu2 %v3569_v14, %s3923_s5 }
0x109e   :  { %v1269_v20 = vpop.permute.xlu1 %1268 }
0x109f   :  { %v1274_v61 = vmul.f32 %v1269_v20, %v1240_v46 }
0x10a1   :  { %1284 = vrot.lane.b32.xlu1 %v1274_v61, %s3923_s5  ;;  %1278 = vrot.lane.b32.xlu0 %v1274_v61, %s3924_s30 }
0x10bf   :  { %v1271_v21 = vpop.permute.xlu2 %1270 }
0x10c0   :  { %v1275_v25 = vmul.f32 %v1271_v21, %v1241_v5 }
0x10c2   :  { %1286 = vrot.lane.b32.xlu0 %v1275_v25, %s3923_s5  ;;  %1280 = vrot.lane.b32.xlu2 %v1275_v25, %s3924_s30 }
0x1113   :  { %v1285_v48 = vpop.permute.xlu1 %1284  ;;  %v4567_v62 = vpop.permute.xlu0 %1278 }
0x1114   :  { %v1290_v27 = vsel %vm539_vm12, %v4567_v62, %v1285_v48 }
0x1115   :  { %v1292_v29 = vmul.f32 %v1290_v27, %v4344_v41 }
0x1117   :  { %3325 = vmatmul.msk.f32.vlgmr.msra.gmra.mxu3 %vm420_vm13, %v1292_v29 }
0x111c   :  { %v1281_v35 = vpop.permute.xlu2 %1280 }
0x1134   :  { %v4573_v31 = vpop.permute.xlu0 %1286 }
0x1135   :  { %v1291_v34 = vsel %vm539_vm12, %v1281_v35, %v4573_v31 }
0x1136   :  { %v1293_v4 = vmul.f32 %v1291_v34, %v4352_v16 }
0x1138   :  { %3326 = vmatmul.msk.f32.gmra.mxu3 %vm420_vm13, %v1293_v4 }
0x119a   :  { %v1317_v59 = vpop.f32.mrf.mxu3 }
0x119b   :  { %v1323_v38 = vadd.f32 %v1317_v59, %v328_v36 }
0x119d   :  { %v3327_v46 = vmul.f32 -1.442695, %v1323_v38 }
0x119f   :  { %3570 = vpow2.f32 %v3327_v46  ;;  %v4594_v46 = vld [vmem:[#allocation7 + $0x38] sm:$0xff] }
0x11a0   :  { %1561 = vmatpush.msrb.mxu2 %v4594_v46  ;;  %1686 = vmatpush.msrb.mxu3 %v4594_v46 }
0x11a5   :  { %v3571_v47 = vpop.eup %3570 }
0x11a6   :  { %v1333_v49 = vadd.f32 1.0, %v3571_v47 }
0x11a8   :  { %3572 = vrcp.f32 %v1333_v49  ;;  %v1346_v19 = vand.u32 2147483648, %v1333_v49  ;;  %v1344_v56 = vand.u32 2147483647, %v1333_v49  ;;  %vm1340_vm9 = vweird.f32 %v1333_v49 }
0x11a9   :  { %3574 = vtanh.f32 %v1323_v38 }
0x11aa   :  { %v1347_v58 = vor.u32 1.1754944e-38, %v1346_v19  ;;  %vm1345_vm11 = vcmp.eq.f32.partialorder %v1344_v56, 8.507059e+37  ;;  %v4609_v19 = vld [vmem:[#allocation7 + $0x28] sm:$0xff]  ;;  %v1429_v56 = vld [vmem:[%s5358_s4 + $0x60] sm:$0xff] }
0x11ae   :  { %v3573_v53 = vpop.eup %3572 }
0x11af   :  { %v1336_v50 = vmul.f32 %v3573_v53, %v1333_v49  ;;  %vm1341_vm8 = vweird.f32 %v3573_v53  ;;  %v3575_v28 = vpop.eup %3574 }
0x11b0   :  { %vm1342_vm10 = vmor %vm1340_vm9, %vm1341_vm8 }
0x11b1   :  { %v1337_v55 = vsub.f32 1.0, %v1336_v50  ;;  %v1432_v50 = vld [vmem:[%s5358_s4 + $0x78] sm:$0xff] }
0x11b2   :  { %1512 = vmatpush.msra.mxu1 %v1432_v50 }
0x11b3   :  { %v1338_v30 = vmul.f32 %v3573_v53, %v1337_v55  ;;  %v1431_v55 = vld [vmem:[%s5358_s4 + $0x70] sm:$0xff] }
0x11b4   :  { %1471 = vmatpush.msrb.mxu0 %v1431_v55 }
0x11b5   :  { %v1339_v13 = vadd.f32 %v3573_v53, %v1338_v30  ;;  %v1430_v30 = vld [vmem:[%s5358_s4 + $0x68] sm:$0xff] }
0x11b6   :  { %1513 = vmatpush.msra.mxu1 %v1430_v30  ;;  %1472 = vmatpush.msrb.mxu0 %v1429_v56 }
0x11b7   :  { %v1343_v51 = vsel %vm1342_vm10, %v3573_v53, %v1339_v13  ;;  %v4600_v53 = vld [vmem:[#allocation7 + $0x30] sm:$0xff]  ;;  %v4617_v13 = vld [vmem:[#allocation7 + $0x20] sm:$0xff] }
0x11b8   :  { %v1348_v60 = vsel %vm1345_vm11, %v1347_v58, %v1343_v51  ;;  %1562 = vmatpush.msrb.mxu2 %v4600_v53  ;;  %v1428_v58 = vld [vmem:[%s5358_s4 + $0x58] sm:$0xff]  ;;  %1687 = vmatpush.msrb.mxu3 %v4600_v53  ;;  %v1427_v51 = vld [vmem:[%s5358_s4 + $0x50] sm:$0xff] }
0x11b9   :  { %v1365_v63 = vsel %vm4307_vm3, %v3575_v28, %v1348_v60  ;;  %v4627_v28 = vld [vmem:[#allocation7 + $0x18] sm:$0xff]  ;;  %v1426_v60 = vld [vmem:[%s5358_s4 + $0x48] sm:$0xff]  ;;  %1514 = vmatpush.msra.mxu1 %v1428_v58  ;;  %1473 = vmatpush.msrb.mxu0 %v1427_v51 }
0x11ba   :  { %1371 = vrot.lane.b32.xlu0 %v1365_v63, %s3923_s5  ;;  %v1367_v34 = vmul.f32 %v1365_v63, %v4554_v9  ;;  %1563 = vmatpush.msrb.mxu2 %v4609_v19 }
0x11bb   :  { %v1320_v24 = vpop.f32.mrf.mxu3  ;;  %1688 = vmatpush.msrb.mxu3 %v4609_v19  ;;  %1515 = vmatpush.msra.mxu1 %v1426_v60 }
0x11bc   :  { %v1324_v1 = vadd.f32 %v1320_v24, %v4265_v37  ;;  %1564 = vmatpush.msrb.mxu2 %v4617_v13  ;;  %v4637_v24 = vld [vmem:[#allocation7 + $0x10] sm:$0xff] }
0x11bd   :  { %1689 = vmatpush.msrb.mxu3 %v4617_v13 }
0x11be   :  { %v3328_v45 = vmul.f32 -1.442695, %v1324_v1  ;;  %1565 = vmatpush.msrb.mxu2 %v4627_v28 }
0x11bf   :  { %1690 = vmatpush.msrb.mxu3 %v4627_v28 }
0x11c0   :  { %3576 = vpow2.f32 %v3328_v45  ;;  %v1423_v45 = vld [vmem:[%s5358_s4 + $0x30] sm:$0xff]  ;;  %1566 = vmatpush.msrb.mxu2 %v4637_v24 }
0x11c1   :  { %1691 = vmatpush.msrb.mxu3 %v4637_v24 }
0x11c6   :  { %v3577_v2 = vpop.eup %3576 }
0x11c7   :  { %v1334_v5 = vadd.f32 1.0, %v3577_v2  ;;  %v4647_v2 = vld [vmem:[#allocation7 + $0x8] sm:$0xff] }
0x11c8   :  { %1567 = vmatpush.msrb.mxu2 %v4647_v2  ;;  %1692 = vmatpush.msrb.mxu3 %v4647_v2 }
0x11c9   :  { %3578 = vrcp.f32 %v1334_v5  ;;  %v1361_v6 = vand.u32 2147483648, %v1334_v5  ;;  %v1359_v43 = vand.u32 2147483647, %v1334_v5  ;;  %vm1355_vm15 = vweird.f32 %v1334_v5 }
0x11ca   :  { %3580 = vtanh.f32 %v1324_v1  ;;  %v1424_v1 = vld [vmem:[%s5358_s4 + $0x38] sm:$0xff] }
0x11cb   :  { %v1362_v11 = vor.u32 1.1754944e-38, %v1361_v6  ;;  %vm1360_vm1 = vcmp.eq.f32.partialorder %v1359_v43, 8.507059e+37  ;;  %1516 = vmatpush.msra.mxu1 %v1424_v1  ;;  %v1419_v6 = vld [vmem:[%s5358_s4 + $0x10] sm:$0xff]  ;;  %v1417_v43 = vld [vmem:[%s5358_s4] sm:$0xff] }
0x11cf   :  { %v3579_v40 = vpop.eup %3578 }
0x11d0   :  { %v1351_v7 = vmul.f32 %v3579_v40, %v1334_v5  ;;  %vm1356_vm14 = vweird.f32 %v3579_v40  ;;  %v3581_v37 = vpop.eup %3580  ;;  %v1422_v5 = vld [vmem:[%s5358_s4 + $0x28] sm:$0xff] }
0x11d1   :  { %vm1357_vm0 = vmor %vm1355_vm15, %vm1356_vm14  ;;  %1517 = vmatpush.msra.mxu1 %v1422_v5 }
0x11d2   :  { %v1352_v39 = vsub.f32 1.0, %v1351_v7  ;;  %v4657_v7 = vld [vmem:[#allocation7] sm:$0xff] }
0x11d3   :  { %1568 = vmatpush.msrb.mxu2 %v4657_v7  ;;  %1693 = vmatpush.msrb.mxu3 %v4657_v7 }
0x11d4   :  { %v1353_v8 = vmul.f32 %v3579_v40, %v1352_v39  ;;  %v1420_v39 = vld [vmem:[%s5358_s4 + $0x18] sm:$0xff]  ;;  %1569 = vmatmul.f32.vlgmr.msrb.gmra.mxu2 %v3922_v23 }
0x11d5   :  { %1518 = vmatpush.msra.mxu1 %v1420_v39  ;;  %1811 = vmatpush.msra.mxu2 %v4594_v46 }
0x11d6   :  { %v1354_v10 = vadd.f32 %v3579_v40, %v1353_v8  ;;  %v1418_v8 = vld [vmem:[%s5358_s4 + $0x8] sm:$0xff]  ;;  %1936 = vmatpush.msra.mxu3 %v4594_v46 }
0x11d7   :  { %1519 = vmatpush.msra.mxu1 %v1418_v8  ;;  %1812 = vmatpush.msra.mxu2 %v4600_v53 }
0x11d8   :  { %v1358_v12 = vsel %vm1357_vm0, %v3579_v40, %v1354_v10  ;;  %v1421_v40 = vld [vmem:[%s5358_s4 + $0x20] sm:$0xff]  ;;  %1937 = vmatpush.msra.mxu3 %v4600_v53 }
0x11d9   :  { %v1363_v14 = vsel %vm1360_vm1, %v1362_v11, %v1358_v12  ;;  %1813 = vmatpush.msra.mxu2 %v4609_v19  ;;  %v1410_v11 = vsel %vm539_vm12, %v4387_v0, %v4573_v31  ;;  %v1411_v12 = vsel %vm539_vm12, %v4423_v57, %v4537_v54  ;;  %v1413_v0 = vsel %vm539_vm12, %v4495_v15, %v4465_v42 }
0x11da   :  { %v1366_v20 = vsel %vm4307_vm3, %v3581_v37, %v1363_v14  ;;  %1938 = vmatpush.msra.mxu3 %v4609_v19  ;;  %v1414_v57 = vsel %vm539_vm12, %v4531_v22, %v4429_v17  ;;  %v1433_v17 = vld [vmem:[%s5327_s6] sm:$0x3] }
0x11db   :  { %1373 = vrot.lane.b32.xlu1 %v1366_v20, %s3923_s5  ;;  %v1368_v27 = vmul.f32 %v1366_v20, %v4559_v32  ;;  %1814 = vmatpush.msra.mxu2 %v4617_v13  ;;  %v1436_v22 = vperm.slane %v1433_v17, 1 }
0x11dc   :  { %1572 = vmatmul.f32.gmra.mxu2 %v3922_v23  ;;  %1939 = vmatpush.msra.mxu3 %v4617_v13 }
0x11dd   :  { %1815 = vmatpush.msra.mxu2 %v4627_v28 }
0x11de   :  { %1940 = vmatpush.msra.mxu3 %v4627_v28 }
0x11df   :  { %1816 = vmatpush.msra.mxu2 %v4637_v24 }
0x11e0   :  { %1941 = vmatpush.msra.mxu3 %v4637_v24 }
0x11e1   :  { %1817 = vmatpush.msra.mxu2 %v4647_v2 }
0x11e2   :  { %1942 = vmatpush.msra.mxu3 %v4647_v2 }
0x11e3   :  { %1818 = vmatpush.msra.mxu2 %v4657_v7 }
0x11e4   :  { %1943 = vmatpush.msra.mxu3 %v4657_v7 }
0x11e5   :  { %2061 = vmatpush.msrb.mxu2 %v4594_v46 }
0x11e7   :  { %2062 = vmatpush.msrb.mxu2 %v4600_v53 }
0x11e9   :  { %2063 = vmatpush.msrb.mxu2 %v4609_v19 }
0x11eb   :  { %2064 = vmatpush.msrb.mxu2 %v4617_v13 }
0x11ed   :  { %2065 = vmatpush.msrb.mxu2 %v4627_v28 }
0x11ef   :  { %2066 = vmatpush.msrb.mxu2 %v4637_v24 }
0x11f1   :  { %2067 = vmatpush.msrb.mxu2 %v4647_v2 }
0x11f3   :  { %2068 = vmatpush.msrb.mxu2 %v4657_v7 }
0x122c   :  { %v1372_v25 = vpop.permute.xlu0 %1371 }
0x122d   :  { %v1377_v48 = vmul.f32 %v1372_v25, %v1365_v63 }
0x124d   :  { %v1374_v61 = vpop.permute.xlu1 %1373 }
0x124e   :  { %v1378_v21 = vmul.f32 %v1374_v61, %v1366_v20 }
0x1250   :  { %1383 = vrot.lane.b32.xlu2 %v1378_v21, %s3924_s30 }
0x1258   :  { %1381 = vrot.lane.b32.xlu2 %v1377_v48, %s3924_s30 }
0x12aa   :  { %v1384_v29 = vpop.permute.xlu2 %1383 }
0x12ab   :  { %v1388_v35 = vadd.f32 %v1384_v29, %v1368_v27 }
0x12ad   :  { %3582 = vtanh.f32 %v1388_v35 }
0x12b2   :  { %v1382_v4 = vpop.permute.xlu2 %1381 }
0x12b3   :  { %v3583_v36 = vpop.eup %3582  ;;  %v1387_v59 = vadd.f32 %v1382_v4, %v1367_v34 }
0x12b4   :  { %1395 = vrot.lane.b32.xlu1 %v3583_v36, %s3923_s5 }
0x12b5   :  { %3584 = vtanh.f32 %v1387_v59 }
0x12bb   :  { %v3585_v38 = vpop.eup %3584 }
0x12bc   :  { %1393 = vrot.lane.b32.xlu1 %v3585_v38, %s3923_s5 }
0x1326   :  { %v1396_v32 = vpop.permute.xlu1 %1395 }
0x1327   :  { %v1400_v47 = vmul.f32 %v1396_v32, %v1366_v20 }
0x1329   :  { %1406 = vrot.lane.b32.xlu0 %v1400_v47, %s3923_s5 }
0x132e   :  { %v1394_v9 = vpop.permute.xlu1 %1393 }
0x132f   :  { %v1399_v49 = vmul.f32 %v1394_v9, %v1365_v63  ;;  %v1425_v63 = vld [vmem:[%s5358_s4 + $0x40] sm:$0xff] }
0x1330   :  { %1474 = vmatpush.msrb.mxu0 %v1425_v63 }
0x1331   :  { %1402 = vrot.lane.b32.xlu2 %v1399_v49, %s3924_s30 }
0x1332   :  { %1475 = vmatpush.msrb.mxu0 %v1423_v45 }
0x1334   :  { %1476 = vmatpush.msrb.mxu0 %v1421_v40 }
0x1336   :  { %1477 = vmatpush.msrb.mxu0 %v1419_v6 }
0x1338   :  { %1478 = vmatpush.msrb.mxu0 %v1417_v43 }
0x138b   :  { %v1403_v42 = vpop.permute.xlu2 %1402 }
0x138c   :  { %v1416_v15 = vsel %vm539_vm12, %v1403_v42, %v4354_v52 }
0x139b   :  { %v1407_v23 = vpop.permute.xlu0 %1406 }
0x139c   :  { %v1409_v10 = vsel %vm539_vm12, %v4346_v44, %v1407_v23  ;;  %v1412_v44 = vsel %vm539_vm12, %v4459_v26, %v4501_v18  ;;  %v1415_v26 = vsel %vm539_vm12, %v4567_v62, %v4393_v3  ;;  %v4743_v18 = vperm.slane %v1433_v17, 0  ;;  %v1570_v3 = vpop.f32.mrf.mxu2 }
0x139d   :  { %3329 = vmatmul.msk.f32.vlgmr.msrb.gmra.mxu0 %vm420_vm13, %v1409_v10  ;;  %3337 = vmatmul.msk.f32.vlgmr.msra.gmra.mxu1 %vm420_vm13, %v1409_v10 }
0x13a4   :  { %v1573_v5 = vpop.f32.mrf.mxu2 }
0x13a5   :  { %3330 = vmatmul.msk.f32.gmra.mxu0 %vm420_vm13, %v1410_v11  ;;  %3338 = vmatmul.msk.f32.gmra.mxu1 %vm420_vm13, %v1410_v11 }
0x13ad   :  { %3331 = vmatmul.msk.f32.gmra.mxu0 %vm420_vm13, %v1411_v12  ;;  %3339 = vmatmul.msk.f32.gmra.mxu1 %vm420_vm13, %v1411_v12 }
0x13b5   :  { %3332 = vmatmul.msk.f32.gmra.mxu0 %vm420_vm13, %v1412_v44  ;;  %3340 = vmatmul.msk.f32.gmra.mxu1 %vm420_vm13, %v1412_v44 }
0x13bd   :  { %3333 = vmatmul.msk.f32.gmra.mxu0 %vm420_vm13, %v1413_v0  ;;  %3341 = vmatmul.msk.f32.gmra.mxu1 %vm420_vm13, %v1413_v0 }
0x13c5   :  { %3334 = vmatmul.msk.f32.gmra.mxu0 %vm420_vm13, %v1414_v57  ;;  %3342 = vmatmul.msk.f32.gmra.mxu1 %vm420_vm13, %v1414_v57 }
0x13cd   :  { %3335 = vmatmul.msk.f32.gmra.mxu0 %vm420_vm13, %v1415_v26  ;;  %3343 = vmatmul.msk.f32.gmra.mxu1 %vm420_vm13, %v1415_v26 }
0x13d5   :  { %3336 = vmatmul.msk.f32.gmra.mxu0 %vm420_vm13, %v1416_v15  ;;  %3344 = vmatmul.msk.f32.gmra.mxu1 %vm420_vm13, %v1416_v15 }
0x141a   :  { %v1480_v54 = vpop.f32.mrf.mxu0  ;;  %v1521_v62 = vpop.f32.mrf.mxu1 }
0x141b   :  { %v1481_v31 = vadd.f32 %v1480_v54, %v4743_v18  ;;  %v4746_v37 = vadd.f32 %v1521_v62, %v1436_v22 }
0x141d   :  { %v1576_v14 = vadd.f32 %v1570_v3, %v1481_v31 }
0x141f   :  { %v3345_v52 = vmul.f32 -1.442695, %v1576_v14 }
0x1421   :  { %3586 = vpow2.f32 %v3345_v52 }
0x1422   :  { %v1524_v20 = vpop.f32.mrf.mxu1 }
0x1423   :  { %v4748_v61 = vadd.f32 %v1524_v20, %v1436_v22 }
0x1427   :  { %v3587_v21 = vpop.eup %3586 }
0x1428   :  { %v1586_v25 = vadd.f32 1.0, %v3587_v21 }
0x142a   :  { %3588 = vrcp.f32 %v1586_v25  ;;  %v1527_v48 = vpop.f32.mrf.mxu1  ;;  %v1599_v59 = vand.u32 2147483648, %v1586_v25  ;;  %v1597_v32 = vand.u32 2147483647, %v1586_v25  ;;  %vm1593_vm4 = vweird.f32 %v1586_v25 }
0x142b   :  { %v4750_v27 = vadd.f32 %v1527_v48, %v1436_v22  ;;  %3590 = vtanh.f32 %v1576_v14 }
0x142c   :  { %v1600_v9 = vor.u32 1.1754944e-38, %v1599_v59  ;;  %vm1598_vm6 = vcmp.eq.f32.partialorder %v1597_v32, 8.507059e+37 }
0x1430   :  { %v3589_v29 = vpop.eup %3588 }
0x1431   :  { %v1589_v35 = vmul.f32 %v3589_v29, %v1586_v25  ;;  %vm1594_vm2 = vweird.f32 %v3589_v29  ;;  %v3591_v50 = vpop.eup %3590 }
0x1432   :  { %v1530_v34 = vpop.f32.mrf.mxu1  ;;  %vm1595_vm5 = vmor %vm1593_vm4, %vm1594_vm2 }
0x1433   :  { %v4752_v4 = vadd.f32 %v1530_v34, %v1436_v22  ;;  %v1590_v36 = vsub.f32 1.0, %v1589_v35 }
0x1435   :  { %v1591_v38 = vmul.f32 %v3589_v29, %v1590_v36 }
0x1437   :  { %v1592_v47 = vadd.f32 %v3589_v29, %v1591_v38 }
0x1439   :  { %v1596_v49 = vsel %vm1595_vm5, %v3589_v29, %v1592_v47 }
0x143a   :  { %v1533_v55 = vpop.f32.mrf.mxu1  ;;  %v1601_v30 = vsel %vm1598_vm6, %v1600_v9, %v1596_v49 }
0x143b   :  { %v4754_v56 = vadd.f32 %v1533_v55, %v1436_v22  ;;  %v1618_v58 = vsel %vm4307_vm3, %v3591_v50, %v1601_v30 }
0x143c   :  { %1624 = vrot.lane.b32.xlu0 %v1618_v58, %s3923_s5  ;;  %v1620_v14 = vmul.f32 0.0, %v1618_v58 }
0x1442   :  { %v1536_v51 = vpop.f32.mrf.mxu1 }
0x1443   :  { %v4759_v60 = vadd.f32 %v1536_v51, %v1436_v22  ;;  %v1483_v51 = vpop.f32.mrf.mxu0 }
0x144a   :  { %v1539_v63 = vpop.f32.mrf.mxu1 }
0x144b   :  { %v4761_v1 = vadd.f32 %v1539_v63, %v1436_v22  ;;  %v1484_v63 = vadd.f32 %v1483_v51, %v4743_v18 }
0x1452   :  { %v1542_v45 = vpop.f32.mrf.mxu1 }
0x1453   :  { %v1543_v40 = vadd.f32 %v1542_v45, %v1436_v22 }
0x1455   :  { %v1577_v39 = vadd.f32 %v1573_v5, %v1543_v40 }
0x1457   :  { %v3346_v6 = vmul.f32 -1.442695, %v1577_v39 }
0x1459   :  { %3592 = vpow2.f32 %v3346_v6 }
0x145f   :  { %v3593_v8 = vpop.eup %3592 }
0x1460   :  { %v1587_v43 = vadd.f32 1.0, %v3593_v8 }
0x1462   :  { %3594 = vrcp.f32 %v1587_v43  ;;  %v1614_v12 = vand.u32 2147483648, %v1587_v43  ;;  %v1612_v0 = vand.u32 2147483647, %v1587_v43  ;;  %vm1608_vm8 = vweird.f32 %v1587_v43 }
0x1463   :  { %3596 = vtanh.f32 %v1577_v39 }
0x1464   :  { %v1615_v26 = vor.u32 1.1754944e-38, %v1614_v12  ;;  %vm1613_vm10 = vcmp.eq.f32.partialorder %v1612_v0, 8.507059e+37 }
0x1468   :  { %v3595_v23 = vpop.eup %3594 }
0x1469   :  { %v1604_v10 = vmul.f32 %v3595_v23, %v1587_v43  ;;  %vm1609_vm7 = vweird.f32 %v3595_v23  ;;  %v3597_v15 = vpop.eup %3596 }
0x146a   :  { %vm1610_vm9 = vmor %vm1608_vm8, %vm1609_vm7 }
0x146b   :  { %v1605_v11 = vsub.f32 1.0, %v1604_v10 }
0x146d   :  { %v1606_v44 = vmul.f32 %v3595_v23, %v1605_v11 }
0x146f   :  { %v1607_v57 = vadd.f32 %v3595_v23, %v1606_v44 }
0x1471   :  { %v1611_v42 = vsel %vm1610_vm9, %v3595_v23, %v1607_v57 }
0x1472   :  { %v1616_v17 = vsel %vm1613_vm10, %v1615_v26, %v1611_v42 }
0x1473   :  { %v1619_v22 = vsel %vm4307_vm3, %v3597_v15, %v1616_v17 }
0x1474   :  { %1626 = vrot.lane.b32.xlu1 %v1619_v22, %s3923_s5  ;;  %v1621_v25 = vmul.f32 0.0, %v1619_v22 }
0x14ae   :  { %v1625_v3 = vpop.permute.xlu0 %1624 }
0x14af   :  { %v1630_v54 = vmul.f32 %v1625_v3, %v1618_v58 }
0x14b1   :  { %1634 = vrot.lane.b32.xlu2 %v1630_v54, %s3924_s30 }
0x14e6   :  { %v1627_v62 = vpop.permute.xlu1 %1626 }
0x14e7   :  { %v1631_v31 = vmul.f32 %v1627_v62, %v1619_v22 }
0x14e9   :  { %1636 = vrot.lane.b32.xlu0 %v1631_v31, %s3924_s30 }
0x150b   :  { %v1635_v52 = vpop.permute.xlu2 %1634 }
0x150c   :  { %v4768_v20 = vadd.f32 %v1635_v52, %v1620_v14 }
0x150e   :  { %3598 = vtanh.f32 %v4768_v20 }
0x1514   :  { %v3599_v21 = vpop.eup %3598 }
0x1515   :  { %1646 = vrot.lane.b32.xlu1 %v3599_v21, %s3923_s5 }
0x155b   :  { %v1637_v48 = vpop.permute.xlu0 %1636 }
0x155c   :  { %v4772_v29 = vadd.f32 %v1637_v48, %v1621_v25 }
0x155e   :  { %3600 = vtanh.f32 %v4772_v29 }
0x1564   :  { %v3601_v35 = vpop.eup %3600 }
0x1565   :  { %1648 = vrot.lane.b32.xlu2 %v3601_v35, %s3923_s5 }
0x1587   :  { %v1647_v34 = vpop.permute.xlu1 %1646 }
0x1588   :  { %v1652_v36 = vmul.f32 %v1647_v34, %v1618_v58 }
0x158a   :  { %1662 = vrot.lane.b32.xlu1 %v1652_v36, %s3923_s5  ;;  %1656 = vrot.lane.b32.xlu0 %v1652_v36, %s3924_s30 }
0x15bf   :  { %v1649_v59 = vpop.permute.xlu2 %1648 }
0x15c0   :  { %v1653_v38 = vmul.f32 %v1649_v59, %v1619_v22 }
0x15c2   :  { %1664 = vrot.lane.b32.xlu0 %v1653_v38, %s3923_s5  ;;  %1658 = vrot.lane.b32.xlu2 %v1653_v38, %s3924_s30 }
0x15fc   :  { %v1663_v32 = vpop.permute.xlu1 %1662  ;;  %v4780_v47 = vpop.permute.xlu0 %1656 }
0x15fd   :  { %v1668_v9 = vsel %vm539_vm12, %v4780_v47, %v1663_v32 }
0x15fe   :  { %v1670_v49 = vmul.f32 %v1668_v9, %v4344_v41 }
0x1600   :  { %3347 = vmatmul.msk.f32.vlgmr.msrb.gmra.mxu3 %vm420_vm13, %v1670_v49 }
0x1601   :  { %2186 = vmatpush.msrb.mxu3 %v4594_v46 }
0x1603   :  { %2187 = vmatpush.msrb.mxu3 %v4600_v53 }
0x1605   :  { %2188 = vmatpush.msrb.mxu3 %v4609_v19 }
0x1607   :  { %2189 = vmatpush.msrb.mxu3 %v4617_v13 }
0x1609   :  { %2190 = vmatpush.msrb.mxu3 %v4627_v28 }
0x160b   :  { %2191 = vmatpush.msrb.mxu3 %v4637_v24 }
0x160d   :  { %2192 = vmatpush.msrb.mxu3 %v4647_v2 }
0x160f   :  { %2193 = vmatpush.msrb.mxu3 %v4657_v7 }
0x161c   :  { %v1659_v50 = vpop.permute.xlu2 %1658 }
0x1634   :  { %v4794_v55 = vpop.permute.xlu0 %1664 }
0x1635   :  { %v1669_v30 = vsel %vm539_vm12, %v1659_v50, %v4794_v55 }
0x1636   :  { %v1671_v58 = vmul.f32 %v1669_v30, %v4352_v16 }
0x1638   :  { %3348 = vmatmul.msk.f32.gmra.mxu3 %vm420_vm13, %v1671_v58 }
0x1683   :  { %v1695_v45 = vpop.f32.mrf.mxu3 }
0x1684   :  { %v1701_v5 = vadd.f32 %v1695_v45, %v1484_v63 }
0x1686   :  { %v3349_v40 = vmul.f32 -1.442695, %v1701_v5 }
0x1688   :  { %3602 = vpow2.f32 %v3349_v40 }
0x168e   :  { %v3603_v39 = vpop.eup %3602 }
0x168f   :  { %v1711_v6 = vadd.f32 1.0, %v3603_v39 }
0x1691   :  { %3604 = vrcp.f32 %v1711_v6  ;;  %v1724_v10 = vand.u32 2147483648, %v1711_v6  ;;  %v1722_v12 = vand.u32 2147483647, %v1711_v6  ;;  %vm1718_vm14 = vweird.f32 %v1711_v6 }
0x1692   :  { %3606 = vtanh.f32 %v1701_v5 }
0x1693   :  { %v1725_v0 = vor.u32 1.1754944e-38, %v1724_v10  ;;  %vm1723_vm0 = vcmp.eq.f32.partialorder %v1722_v12, 8.507059e+37 }
0x1697   :  { %v3605_v8 = vpop.eup %3604 }
0x1698   :  { %v1714_v43 = vmul.f32 %v3605_v8, %v1711_v6  ;;  %vm1719_vm11 = vweird.f32 %v3605_v8  ;;  %v3607_v26 = vpop.eup %3606 }
0x1699   :  { %vm1720_vm15 = vmor %vm1718_vm14, %vm1719_vm11 }
0x169a   :  { %v1715_v23 = vsub.f32 1.0, %v1714_v43 }
0x169c   :  { %v1716_v11 = vmul.f32 %v3605_v8, %v1715_v23 }
0x169e   :  { %v1717_v44 = vadd.f32 %v3605_v8, %v1716_v11 }
0x16a0   :  { %v1721_v57 = vsel %vm1720_vm15, %v3605_v8, %v1717_v44 }
0x16a1   :  { %v1726_v42 = vsel %vm1723_vm0, %v1725_v0, %v1721_v57 }
0x16a2   :  { %v1743_v15 = vsel %vm4307_vm3, %v3607_v26, %v1726_v42  ;;  %v1486_v26 = vpop.f32.mrf.mxu0 }
0x16a3   :  { %1749 = vrot.lane.b32.xlu1 %v1743_v15, %s3923_s5  ;;  %v1745_v30 = vmul.f32 %v1743_v15, %v4768_v20  ;;  %v1487_v42 = vadd.f32 %v1486_v26, %v4743_v18 }
0x16bb   :  { %v1698_v17 = vpop.f32.mrf.mxu3 }
0x16bc   :  { %v1702_v22 = vadd.f32 %v1698_v17, %v4761_v1 }
0x16be   :  { %v3350_v3 = vmul.f32 -1.442695, %v1702_v22 }
0x16c0   :  { %3608 = vpow2.f32 %v3350_v3 }
0x16c6   :  { %v3609_v54 = vpop.eup %3608 }
0x16c7   :  { %v1712_v62 = vadd.f32 1.0, %v3609_v54 }
0x16c9   :  { %3610 = vrcp.f32 %v1712_v62  ;;  %v1739_v21 = vand.u32 2147483648, %v1712_v62  ;;  %v1737_v48 = vand.u32 2147483647, %v1712_v62  ;;  %vm1733_vm2 = vweird.f32 %v1712_v62 }
0x16ca   :  { %3612 = vtanh.f32 %v1702_v22 }
0x16cb   :  { %v1740_v34 = vor.u32 1.1754944e-38, %v1739_v21  ;;  %vm1738_vm5 = vcmp.eq.f32.partialorder %v1737_v48, 8.507059e+37 }
0x16cf   :  { %v3611_v31 = vpop.eup %3610 }
0x16d0   :  { %v1729_v14 = vmul.f32 %v3611_v31, %v1712_v62  ;;  %vm1734_vm1 = vweird.f32 %v3611_v31  ;;  %v3613_v1 = vpop.eup %3612 }
0x16d1   :  { %vm1735_vm4 = vmor %vm1733_vm2, %vm1734_vm1 }
0x16d2   :  { %v1730_v52 = vsub.f32 1.0, %v1729_v14 }
0x16d4   :  { %v1731_v25 = vmul.f32 %v3611_v31, %v1730_v52 }
0x16d6   :  { %v1732_v35 = vadd.f32 %v3611_v31, %v1731_v25 }
0x16d8   :  { %v1736_v36 = vsel %vm1735_vm4, %v3611_v31, %v1732_v35 }
0x16d9   :  { %v1741_v59 = vsel %vm1738_vm5, %v1740_v34, %v1736_v36 }
0x16da   :  { %v1744_v38 = vsel %vm4307_vm3, %v3613_v1, %v1741_v59 }
0x16db   :  { %1751 = vrot.lane.b32.xlu2 %v1744_v38, %s3923_s5  ;;  %v1746_v45 = vmul.f32 %v1744_v38, %v4772_v29 }
0x1715   :  { %v1750_v32 = vpop.permute.xlu1 %1749 }
0x1716   :  { %v1755_v9 = vmul.f32 %v1750_v32, %v1743_v15 }
0x1718   :  { %1759 = vrot.lane.b32.xlu0 %v1755_v9, %s3924_s30 }
0x1735   :  { %v1752_v49 = vpop.permute.xlu2 %1751 }
0x1736   :  { %v1756_v50 = vmul.f32 %v1752_v49, %v1744_v38 }
0x1738   :  { %1761 = vrot.lane.b32.xlu1 %v1756_v50, %s3924_s30 }
0x178a   :  { %v1760_v58 = vpop.permute.xlu0 %1759 }
0x178b   :  { %v4811_v51 = vadd.f32 %v1760_v58, %v1745_v30 }
0x178d   :  { %3614 = vtanh.f32 %v4811_v51 }
0x1793   :  { %v3615_v63 = vpop.eup %3614 }
0x1794   :  { %1771 = vrot.lane.b32.xlu2 %v3615_v63, %s3923_s5 }
0x17aa   :  { %v1762_v5 = vpop.permute.xlu1 %1761 }
0x17ab   :  { %v4816_v40 = vadd.f32 %v1762_v5, %v1746_v45 }
0x17ad   :  { %3616 = vtanh.f32 %v4816_v40 }
0x17b3   :  { %v3617_v39 = vpop.eup %3616 }
0x17b4   :  { %1773 = vrot.lane.b32.xlu0 %v3617_v39, %s3923_s5 }
0x17ee   :  { %v1772_v6 = vpop.permute.xlu2 %1771 }
0x17ef   :  { %v1777_v20 = vmul.f32 %v1772_v6, %v1743_v15 }
0x17f1   :  { %1787 = vrot.lane.b32.xlu2 %v1777_v20, %s3923_s5  ;;  %1781 = vrot.lane.b32.xlu1 %v1777_v20, %s3924_s30 }
0x1826   :  { %v1774_v8 = vpop.permute.xlu0 %1773 }
0x1827   :  { %v1778_v43 = vmul.f32 %v1774_v8, %v1744_v38 }
0x1829   :  { %1789 = vrot.lane.b32.xlu1 %v1778_v43, %s3923_s5  ;;  %1783 = vrot.lane.b32.xlu0 %v1778_v43, %s3924_s30 }
0x184b   :  { %v1788_v29 = vpop.permute.xlu2 %1787 }
0x1863   :  { %v4824_v23 = vpop.permute.xlu1 %1781 }
0x1864   :  { %v1793_v10 = vsel %vm539_vm12, %v4824_v23, %v1788_v29 }
0x1865   :  { %v1795_v11 = vmul.f32 %v1793_v10, %v4344_v41 }
0x1867   :  { %3351 = vmatmul.msk.f32.vlgmr.msra.gmra.mxu2 %vm420_vm13, %v1795_v11 }
0x1868   :  { %2311 = vmatpush.msra.mxu2 %v4594_v46 }
0x186a   :  { %2312 = vmatpush.msra.mxu2 %v4600_v53 }
0x186c   :  { %2313 = vmatpush.msra.mxu2 %v4609_v19 }
0x186e   :  { %2314 = vmatpush.msra.mxu2 %v4617_v13 }
0x1870   :  { %2315 = vmatpush.msra.mxu2 %v4627_v28 }
0x1872   :  { %2316 = vmatpush.msra.mxu2 %v4637_v24 }
0x1874   :  { %2317 = vmatpush.msra.mxu2 %v4647_v2 }
0x1876   :  { %2318 = vmatpush.msra.mxu2 %v4657_v7 }
0x189b   :  { %v4838_v12 = vpop.permute.xlu1 %1789  ;;  %v1784_v44 = vpop.permute.xlu0 %1783 }
0x189c   :  { %v1794_v0 = vsel %vm539_vm12, %v1784_v44, %v4838_v12 }
0x189d   :  { %v1796_v57 = vmul.f32 %v1794_v0, %v4352_v16 }
0x189f   :  { %3352 = vmatmul.msk.f32.gmra.mxu2 %vm420_vm13, %v1796_v57 }
0x18ea   :  { %v1820_v15 = vpop.f32.mrf.mxu2 }
0x18eb   :  { %v1826_v17 = vadd.f32 %v1820_v15, %v1487_v42 }
0x18ed   :  { %v3353_v22 = vmul.f32 -1.442695, %v1826_v17 }
0x18ef   :  { %3618 = vpow2.f32 %v3353_v22 }
0x18f5   :  { %v3619_v3 = vpop.eup %3618 }
0x18f6   :  { %v1836_v54 = vadd.f32 1.0, %v3619_v3 }
0x18f8   :  { %3620 = vrcp.f32 %v1836_v54  ;;  %v1849_v52 = vand.u32 2147483648, %v1836_v54  ;;  %v1847_v25 = vand.u32 2147483647, %v1836_v54  ;;  %vm1843_vm7 = vweird.f32 %v1836_v54 }
0x18f9   :  { %3622 = vtanh.f32 %v1826_v17 }
0x18fa   :  { %v1850_v35 = vor.u32 1.1754944e-38, %v1849_v52  ;;  %vm1848_vm9 = vcmp.eq.f32.partialorder %v1847_v25, 8.507059e+37 }
0x18fe   :  { %v3621_v62 = vpop.eup %3620 }
0x18ff   :  { %v1839_v31 = vmul.f32 %v3621_v62, %v1836_v54  ;;  %vm1844_vm6 = vweird.f32 %v3621_v62  ;;  %v3623_v36 = vpop.eup %3622 }
0x1900   :  { %vm1845_vm8 = vmor %vm1843_vm7, %vm1844_vm6 }
0x1901   :  { %v1840_v14 = vsub.f32 1.0, %v1839_v31 }
0x1903   :  { %v1841_v21 = vmul.f32 %v3621_v62, %v1840_v14 }
0x1905   :  { %v1842_v48 = vadd.f32 %v3621_v62, %v1841_v21 }
0x1907   :  { %v1846_v34 = vsel %vm1845_vm8, %v3621_v62, %v1842_v48 }
0x1908   :  { %v1851_v1 = vsel %vm1848_vm9, %v1850_v35, %v1846_v34 }
0x1909   :  { %v1868_v59 = vsel %vm4307_vm3, %v3623_v36, %v1851_v1 }
0x190a   :  { %1874 = vrot.lane.b32.xlu2 %v1868_v59, %s3923_s5  ;;  %v1870_v57 = vmul.f32 %v1868_v59, %v4811_v51 }
0x1922   :  { %v1823_v38 = vpop.f32.mrf.mxu2 }
0x1923   :  { %v1827_v32 = vadd.f32 %v1823_v38, %v4759_v60 }
0x1925   :  { %v3354_v9 = vmul.f32 -1.442695, %v1827_v32 }
0x1927   :  { %3624 = vpow2.f32 %v3354_v9 }
0x192d   :  { %v3625_v49 = vpop.eup %3624 }
0x192e   :  { %v1837_v50 = vadd.f32 1.0, %v3625_v49 }
0x1930   :  { %3626 = vrcp.f32 %v1837_v50  ;;  %v1864_v45 = vand.u32 2147483648, %v1837_v50  ;;  %v1862_v39 = vand.u32 2147483647, %v1837_v50  ;;  %vm1858_vm11 = vweird.f32 %v1837_v50 }
0x1931   :  { %3628 = vtanh.f32 %v1827_v32 }
0x1932   :  { %v1865_v20 = vor.u32 1.1754944e-38, %v1864_v45  ;;  %vm1863_vm15 = vcmp.eq.f32.partialorder %v1862_v39, 8.507059e+37 }
0x1936   :  { %v3627_v30 = vpop.eup %3626 }
0x1937   :  { %v1854_v58 = vmul.f32 %v3627_v30, %v1837_v50  ;;  %vm1859_vm10 = vweird.f32 %v3627_v30  ;;  %v3629_v60 = vpop.eup %3628 }
0x1938   :  { %vm1860_vm14 = vmor %vm1858_vm11, %vm1859_vm10 }
0x1939   :  { %v1855_v63 = vsub.f32 1.0, %v1854_v58 }
0x193b   :  { %v1856_v5 = vmul.f32 %v3627_v30, %v1855_v63 }
0x193d   :  { %v1857_v6 = vadd.f32 %v3627_v30, %v1856_v5 }
0x193f   :  { %v1861_v8 = vsel %vm1860_vm14, %v3627_v30, %v1857_v6 }
0x1940   :  { %v1866_v43 = vsel %vm1863_vm15, %v1865_v20, %v1861_v8 }
0x1941   :  { %v1869_v29 = vsel %vm4307_vm3, %v3629_v60, %v1866_v43 }
0x1942   :  { %1876 = vrot.lane.b32.xlu0 %v1869_v29, %s3923_s5  ;;  %v1871_v17 = vmul.f32 %v1869_v29, %v4816_v40 }
0x1964   :  { %v1875_v10 = vpop.permute.xlu2 %1874 }
0x1965   :  { %v1880_v11 = vmul.f32 %v1875_v10, %v1868_v59 }
0x1967   :  { %1884 = vrot.lane.b32.xlu1 %v1880_v11, %s3924_s30 }
0x19b4   :  { %v1877_v44 = vpop.permute.xlu0 %1876 }
0x19b5   :  { %v1881_v0 = vmul.f32 %v1877_v44, %v1869_v29 }
0x19b7   :  { %1886 = vrot.lane.b32.xlu2 %v1881_v0, %s3924_s30 }
0x19d9   :  { %v1885_v26 = vpop.permute.xlu1 %1884 }
0x19da   :  { %v4855_v42 = vadd.f32 %v1885_v26, %v1870_v57 }
0x19dc   :  { %3630 = vtanh.f32 %v4855_v42 }
0x19e2   :  { %v3631_v15 = vpop.eup %3630 }
0x19e3   :  { %1896 = vrot.lane.b32.xlu0 %v3631_v15, %s3923_s5 }
0x1a11   :  { %v1887_v22 = vpop.permute.xlu2 %1886 }
0x1a12   :  { %v4860_v3 = vadd.f32 %v1887_v22, %v1871_v17 }
0x1a14   :  { %3632 = vtanh.f32 %v4860_v3 }
0x1a1a   :  { %v3633_v54 = vpop.eup %3632 }
0x1a1b   :  { %1898 = vrot.lane.b32.xlu1 %v3633_v54, %s3923_s5 }
0x1a55   :  { %v1897_v62 = vpop.permute.xlu0 %1896 }
0x1a56   :  { %v1902_v51 = vmul.f32 %v1897_v62, %v1868_v59 }
0x1a58   :  { %1912 = vrot.lane.b32.xlu0 %v1902_v51, %s3923_s5  ;;  %1906 = vrot.lane.b32.xlu2 %v1902_v51, %s3924_s30 }
0x1a8d   :  { %v1899_v31 = vpop.permute.xlu1 %1898 }
0x1a8e   :  { %v1903_v14 = vmul.f32 %v1899_v31, %v1869_v29 }
0x1a90   :  { %1914 = vrot.lane.b32.xlu2 %v1903_v14, %s3923_s5  ;;  %1908 = vrot.lane.b32.xlu1 %v1903_v14, %s3924_s30 }
0x1ab2   :  { %v4868_v40 = vpop.permute.xlu2 %1906 }
0x1aca   :  { %v1913_v52 = vpop.permute.xlu0 %1912 }
0x1acb   :  { %v1918_v21 = vsel %vm539_vm12, %v4868_v40, %v1913_v52 }
0x1acc   :  { %v1920_v25 = vmul.f32 %v1918_v21, %v4344_v41 }
0x1ace   :  { %3355 = vmatmul.msk.f32.vlgmr.msra.gmra.mxu3 %vm420_vm13, %v1920_v25 }
0x1acf   :  { %2436 = vmatpush.msra.mxu3 %v4594_v46 }
0x1ad1   :  { %2437 = vmatpush.msra.mxu3 %v4600_v53 }
0x1ad3   :  { %2438 = vmatpush.msra.mxu3 %v4609_v19  ;;  %v1489_v19 = vpop.f32.mrf.mxu0 }
0x1ad5   :  { %2439 = vmatpush.msra.mxu3 %v4617_v13  ;;  %v1490_v13 = vadd.f32 %v1489_v19, %v4743_v18 }
0x1ad7   :  { %2440 = vmatpush.msra.mxu3 %v4627_v28 }
0x1ad9   :  { %2441 = vmatpush.msra.mxu3 %v4637_v24 }
0x1adb   :  { %2442 = vmatpush.msra.mxu3 %v4647_v2 }
0x1add   :  { %2443 = vmatpush.msra.mxu3 %v4657_v7 }
0x1aea   :  { %v4882_v48 = vpop.permute.xlu2 %1914 }
0x1b02   :  { %v1909_v35 = vpop.permute.xlu1 %1908 }
0x1b03   :  { %v1919_v46 = vsel %vm539_vm12, %v1909_v35, %v4882_v48 }
0x1b04   :  { %v1921_v53 = vmul.f32 %v1919_v46, %v4352_v16 }
0x1b06   :  { %3356 = vmatmul.msk.f32.gmra.mxu3 %vm420_vm13, %v1921_v53 }
0x1b51   :  { %v1945_v28 = vpop.f32.mrf.mxu3 }
0x1b52   :  { %v1951_v34 = vadd.f32 %v1945_v28, %v1490_v13 }
0x1b54   :  { %v3357_v24 = vmul.f32 -1.442695, %v1951_v34 }
0x1b56   :  { %3634 = vpow2.f32 %v3357_v24 }
0x1b5c   :  { %v3635_v2 = vpop.eup %3634 }
0x1b5d   :  { %v1961_v36 = vadd.f32 1.0, %v3635_v2 }
0x1b5f   :  { %3636 = vrcp.f32 %v1961_v36  ;;  %v1974_v38 = vand.u32 2147483648, %v1961_v36  ;;  %v1972_v9 = vand.u32 2147483647, %v1961_v36  ;;  %vm1968_vm1 = vweird.f32 %v1961_v36 }
0x1b60   :  { %3638 = vtanh.f32 %v1951_v34 }
0x1b61   :  { %v1975_v50 = vor.u32 1.1754944e-38, %v1974_v38  ;;  %vm1973_vm4 = vcmp.eq.f32.partialorder %v1972_v9, 8.507059e+37  ;;  %v1492_v38 = vpop.f32.mrf.mxu0 }
0x1b65   :  { %v3637_v7 = vpop.eup %3636 }
0x1b66   :  { %v1964_v1 = vmul.f32 %v3637_v7, %v1961_v36  ;;  %vm1969_vm0 = vweird.f32 %v3637_v7  ;;  %v3639_v58 = vpop.eup %3638 }
0x1b67   :  { %vm1970_vm2 = vmor %vm1968_vm1, %vm1969_vm0 }
0x1b68   :  { %v1965_v59 = vsub.f32 1.0, %v1964_v1 }
0x1b6a   :  { %v1966_v32 = vmul.f32 %v3637_v7, %v1965_v59 }
0x1b6c   :  { %v1967_v49 = vadd.f32 %v3637_v7, %v1966_v32  ;;  %v1493_v32 = vadd.f32 %v1492_v38, %v4743_v18 }
0x1b6e   :  { %v1971_v30 = vsel %vm1970_vm2, %v3637_v7, %v1967_v49 }
0x1b6f   :  { %v1976_v63 = vsel %vm1973_vm4, %v1975_v50, %v1971_v30 }
0x1b70   :  { %v1993_v45 = vsel %vm4307_vm3, %v3639_v58, %v1976_v63 }
0x1b71   :  { %1999 = vrot.lane.b32.xlu0 %v1993_v45, %s3923_s5  ;;  %v1995_v31 = vmul.f32 %v1993_v45, %v4855_v42 }
0x1b89   :  { %v1948_v5 = vpop.f32.mrf.mxu3 }
0x1b8a   :  { %v1952_v39 = vadd.f32 %v1948_v5, %v4754_v56 }
0x1b8c   :  { %v3358_v6 = vmul.f32 -1.442695, %v1952_v39 }
0x1b8e   :  { %3640 = vpow2.f32 %v3358_v6 }
0x1b94   :  { %v3641_v20 = vpop.eup %3640 }
0x1b95   :  { %v1962_v8 = vadd.f32 1.0, %v3641_v20 }
0x1b97   :  { %3642 = vrcp.f32 %v1962_v8  ;;  %v1989_v10 = vand.u32 2147483648, %v1962_v8  ;;  %v1987_v44 = vand.u32 2147483647, %v1962_v8  ;;  %vm1983_vm6 = vweird.f32 %v1962_v8 }
0x1b98   :  { %3644 = vtanh.f32 %v1952_v39 }
0x1b99   :  { %v1990_v57 = vor.u32 1.1754944e-38, %v1989_v10  ;;  %vm1988_vm8 = vcmp.eq.f32.partialorder %v1987_v44, 8.507059e+37 }
0x1b9d   :  { %v3643_v60 = vpop.eup %3642 }
0x1b9e   :  { %v1979_v43 = vmul.f32 %v3643_v60, %v1962_v8  ;;  %vm1984_vm5 = vweird.f32 %v3643_v60  ;;  %v3645_v56 = vpop.eup %3644 }
0x1b9f   :  { %vm1985_vm7 = vmor %vm1983_vm6, %vm1984_vm5 }
0x1ba0   :  { %v1980_v29 = vsub.f32 1.0, %v1979_v43 }
0x1ba2   :  { %v1981_v11 = vmul.f32 %v3643_v60, %v1980_v29 }
0x1ba4   :  { %v1982_v0 = vadd.f32 %v3643_v60, %v1981_v11 }
0x1ba6   :  { %v1986_v26 = vsel %vm1985_vm7, %v3643_v60, %v1982_v0 }
0x1ba7   :  { %v1991_v15 = vsel %vm1988_vm8, %v1990_v57, %v1986_v26 }
0x1ba8   :  { %v1994_v17 = vsel %vm4307_vm3, %v3645_v56, %v1991_v15 }
0x1ba9   :  { %2001 = vrot.lane.b32.xlu1 %v1994_v17, %s3923_s5  ;;  %v1996_v25 = vmul.f32 %v1994_v17, %v4860_v3 }
0x1be3   :  { %v2000_v22 = vpop.permute.xlu0 %1999 }
0x1be4   :  { %v2005_v54 = vmul.f32 %v2000_v22, %v1993_v45 }
0x1be6   :  { %2009 = vrot.lane.b32.xlu2 %v2005_v54, %s3924_s30 }
0x1c1b   :  { %v2002_v62 = vpop.permute.xlu1 %2001 }
0x1c1c   :  { %v2006_v51 = vmul.f32 %v2002_v62, %v1994_v17 }
0x1c1e   :  { %2011 = vrot.lane.b32.xlu0 %v2006_v51, %s3924_s30 }
0x1c40   :  { %v2010_v14 = vpop.permute.xlu2 %2009 }
0x1c41   :  { %v4899_v52 = vadd.f32 %v2010_v14, %v1995_v31 }
0x1c43   :  { %3646 = vtanh.f32 %v4899_v52 }
0x1c49   :  { %v3647_v21 = vpop.eup %3646 }
0x1c4a   :  { %2021 = vrot.lane.b32.xlu1 %v3647_v21, %s3923_s5 }
0x1c90   :  { %v2012_v35 = vpop.permute.xlu0 %2011 }
0x1c91   :  { %v4904_v46 = vadd.f32 %v2012_v35, %v1996_v25 }
0x1c93   :  { %3648 = vtanh.f32 %v4904_v46 }
0x1c99   :  { %v3649_v53 = vpop.eup %3648 }
0x1c9a   :  { %2023 = vrot.lane.b32.xlu2 %v3649_v53, %s3923_s5 }
0x1cbc   :  { %v2022_v19 = vpop.permute.xlu1 %2021 }
0x1cbd   :  { %v2027_v42 = vmul.f32 %v2022_v19, %v1993_v45 }
0x1cbf   :  { %2037 = vrot.lane.b32.xlu1 %v2027_v42, %s3923_s5  ;;  %2031 = vrot.lane.b32.xlu0 %v2027_v42, %s3924_s30 }
0x1cf4   :  { %v2024_v13 = vpop.permute.xlu2 %2023 }
0x1cf5   :  { %v2028_v28 = vmul.f32 %v2024_v13, %v1994_v17 }
0x1cf7   :  { %2039 = vrot.lane.b32.xlu0 %v2028_v28, %s3923_s5  ;;  %2033 = vrot.lane.b32.xlu2 %v2028_v28, %s3924_s30 }
0x1d31   :  { %v2038_v3 = vpop.permute.xlu1 %2037  ;;  %v4912_v34 = vpop.permute.xlu0 %2031 }
0x1d32   :  { %v2043_v24 = vsel %vm539_vm12, %v4912_v34, %v2038_v3 }
0x1d33   :  { %v2045_v2 = vmul.f32 %v2043_v24, %v4344_v41 }
0x1d35   :  { %3359 = vmatmul.msk.f32.vlgmr.msrb.gmra.mxu2 %vm420_vm13, %v2045_v2 }
0x1d51   :  { %v2034_v36 = vpop.permute.xlu2 %2033 }
0x1d69   :  { %v4918_v7 = vpop.permute.xlu0 %2039 }
0x1d6a   :  { %v2044_v1 = vsel %vm539_vm12, %v2034_v36, %v4918_v7 }
0x1d6b   :  { %v2046_v59 = vmul.f32 %v2044_v1, %v4352_v16 }
0x1d6d   :  { %3360 = vmatmul.msk.f32.gmra.mxu2 %vm420_vm13, %v2046_v59 }
0x1db8   :  { %v2070_v9 = vpop.f32.mrf.mxu2 }
0x1db9   :  { %v2076_v49 = vadd.f32 %v2070_v9, %v1493_v32 }
0x1dbb   :  { %v3361_v50 = vmul.f32 -1.442695, %v2076_v49 }
0x1dbd   :  { %3650 = vpow2.f32 %v3361_v50 }
0x1dc3   :  { %v3651_v30 = vpop.eup %3650 }
0x1dc4   :  { %v2086_v58 = vadd.f32 1.0, %v3651_v30 }
0x1dc6   :  { %3652 = vrcp.f32 %v2086_v58  ;;  %v2099_v39 = vand.u32 2147483648, %v2086_v58  ;;  %v2097_v20 = vand.u32 2147483647, %v2086_v58  ;;  %vm2093_vm10 = vweird.f32 %v2086_v58 }
0x1dc7   :  { %3654 = vtanh.f32 %v2076_v49 }
0x1dc8   :  { %v2100_v60 = vor.u32 1.1754944e-38, %v2099_v39  ;;  %vm2098_vm14 = vcmp.eq.f32.partialorder %v2097_v20, 8.507059e+37 }
0x1dcc   :  { %v3653_v63 = vpop.eup %3652 }
0x1dcd   :  { %v2089_v45 = vmul.f32 %v3653_v63, %v2086_v58  ;;  %vm2094_vm9 = vweird.f32 %v3653_v63  ;;  %v3655_v29 = vpop.eup %3654 }
0x1dce   :  { %vm2095_vm11 = vmor %vm2093_vm10, %vm2094_vm9 }
0x1dcf   :  { %v2090_v5 = vsub.f32 1.0, %v2089_v45 }
0x1dd1   :  { %v2091_v6 = vmul.f32 %v3653_v63, %v2090_v5 }
0x1dd3   :  { %v2092_v8 = vadd.f32 %v3653_v63, %v2091_v6  ;;  %v1495_v6 = vpop.f32.mrf.mxu0 }
0x1dd4   :  { %v1496_v20 = vadd.f32 %v1495_v6, %v4743_v18 }
0x1dd5   :  { %v2096_v43 = vsel %vm2095_vm11, %v3653_v63, %v2092_v8 }
0x1dd6   :  { %v2101_v10 = vsel %vm2098_vm14, %v2100_v60, %v2096_v43 }
0x1dd7   :  { %v2118_v11 = vsel %vm4307_vm3, %v3655_v29, %v2101_v10 }
0x1dd8   :  { %2124 = vrot.lane.b32.xlu1 %v2118_v11, %s3923_s5  ;;  %v2120_v28 = vmul.f32 %v2118_v11, %v4899_v52 }
0x1df0   :  { %v2073_v44 = vpop.f32.mrf.mxu2 }
0x1df1   :  { %v2077_v0 = vadd.f32 %v2073_v44, %v4752_v4 }
0x1df3   :  { %v3362_v57 = vmul.f32 -1.442695, %v2077_v0 }
0x1df5   :  { %3656 = vpow2.f32 %v3362_v57 }
0x1dfb   :  { %v3657_v26 = vpop.eup %3656 }
0x1dfc   :  { %v2087_v56 = vadd.f32 1.0, %v3657_v26 }
0x1dfe   :  { %3658 = vrcp.f32 %v2087_v56  ;;  %v2114_v54 = vand.u32 2147483648, %v2087_v56  ;;  %v2112_v51 = vand.u32 2147483647, %v2087_v56  ;;  %vm2108_vm0 = vweird.f32 %v2087_v56 }
0x1dff   :  { %3660 = vtanh.f32 %v2077_v0 }
0x1e00   :  { %v2115_v14 = vor.u32 1.1754944e-38, %v2114_v54  ;;  %vm2113_vm2 = vcmp.eq.f32.partialorder %v2112_v51, 8.507059e+37 }
0x1e04   :  { %v3659_v15 = vpop.eup %3658 }
0x1e05   :  { %v2104_v17 = vmul.f32 %v3659_v15, %v2087_v56  ;;  %vm2109_vm15 = vweird.f32 %v3659_v15  ;;  %v3661_v4 = vpop.eup %3660 }
0x1e06   :  { %vm2110_vm1 = vmor %vm2108_vm0, %vm2109_vm15 }
0x1e07   :  { %v2105_v22 = vsub.f32 1.0, %v2104_v17 }
0x1e09   :  { %v2106_v62 = vmul.f32 %v3659_v15, %v2105_v22 }
0x1e0b   :  { %v2107_v31 = vadd.f32 %v3659_v15, %v2106_v62 }
0x1e0d   :  { %v2111_v21 = vsel %vm2110_vm1, %v3659_v15, %v2107_v31 }
0x1e0e   :  { %v2116_v25 = vsel %vm2113_vm2, %v2115_v14, %v2111_v21 }
0x1e0f   :  { %v2119_v35 = vsel %vm4307_vm3, %v3661_v4, %v2116_v25 }
0x1e10   :  { %2126 = vrot.lane.b32.xlu2 %v2119_v35, %s3923_s5  ;;  %v2121_v36 = vmul.f32 %v2119_v35, %v4904_v46 }
0x1e4a   :  { %v2125_v53 = vpop.permute.xlu1 %2124 }
0x1e4b   :  { %v2130_v19 = vmul.f32 %v2125_v53, %v2118_v11 }
0x1e4d   :  { %2134 = vrot.lane.b32.xlu0 %v2130_v19, %s3924_s30 }
0x1e6a   :  { %v2127_v42 = vpop.permute.xlu2 %2126 }
0x1e6b   :  { %v2131_v13 = vmul.f32 %v2127_v42, %v2119_v35 }
0x1e6d   :  { %2136 = vrot.lane.b32.xlu1 %v2131_v13, %s3924_s30 }
0x1ebf   :  { %v2135_v3 = vpop.permute.xlu0 %2134 }
0x1ec0   :  { %v4935_v24 = vadd.f32 %v2135_v3, %v2120_v28 }
0x1ec2   :  { %3662 = vtanh.f32 %v4935_v24 }
0x1ec8   :  { %v3663_v2 = vpop.eup %3662 }
0x1ec9   :  { %2146 = vrot.lane.b32.xlu2 %v3663_v2, %s3923_s5 }
0x1edf   :  { %v2137_v1 = vpop.permute.xlu1 %2136 }
0x1ee0   :  { %v4940_v59 = vadd.f32 %v2137_v1, %v2121_v36 }
0x1ee2   :  { %3664 = vtanh.f32 %v4940_v59 }
0x1ee8   :  { %v3665_v38 = vpop.eup %3664 }
0x1ee9   :  { %2148 = vrot.lane.b32.xlu0 %v3665_v38, %s3923_s5 }
0x1f23   :  { %v2147_v32 = vpop.permute.xlu2 %2146 }
0x1f24   :  { %v2152_v52 = vmul.f32 %v2147_v32, %v2118_v11 }
0x1f26   :  { %2162 = vrot.lane.b32.xlu2 %v2152_v52, %s3923_s5  ;;  %2156 = vrot.lane.b32.xlu1 %v2152_v52, %s3924_s30 }
0x1f5b   :  { %v2149_v9 = vpop.permute.xlu0 %2148 }
0x1f5c   :  { %v2153_v49 = vmul.f32 %v2149_v9, %v2119_v35 }
0x1f5e   :  { %2164 = vrot.lane.b32.xlu1 %v2153_v49, %s3923_s5  ;;  %2158 = vrot.lane.b32.xlu0 %v2153_v49, %s3924_s30 }
0x1f80   :  { %v2163_v46 = vpop.permute.xlu2 %2162 }
0x1f98   :  { %v4948_v50 = vpop.permute.xlu1 %2156 }
0x1f99   :  { %v2168_v30 = vsel %vm539_vm12, %v4948_v50, %v2163_v46 }
0x1f9a   :  { %v2170_v58 = vmul.f32 %v2168_v30, %v4344_v41 }
0x1f9c   :  { %3363 = vmatmul.msk.f32.vlgmr.msrb.gmra.mxu3 %vm420_vm13, %v2170_v58 }
0x1fd0   :  { %v4954_v63 = vpop.permute.xlu1 %2164  ;;  %v2159_v45 = vpop.permute.xlu0 %2158 }
0x1fd1   :  { %v2169_v5 = vsel %vm539_vm12, %v2159_v45, %v4954_v63 }
0x1fd2   :  { %v2171_v39 = vmul.f32 %v2169_v5, %v4352_v16 }
0x1fd4   :  { %3364 = vmatmul.msk.f32.gmra.mxu3 %vm420_vm13, %v2171_v39 }
0x201f   :  { %v2195_v8 = vpop.f32.mrf.mxu3 }
0x2020   :  { %v2201_v60 = vadd.f32 %v2195_v8, %v1496_v20 }
0x2022   :  { %v3365_v43 = vmul.f32 -1.442695, %v2201_v60 }
0x2024   :  { %3666 = vpow2.f32 %v3365_v43 }
0x202a   :  { %v3667_v29 = vpop.eup %3666 }
0x202b   :  { %v2211_v10 = vadd.f32 1.0, %v3667_v29 }
0x202d   :  { %3668 = vrcp.f32 %v2211_v10  ;;  %v2224_v57 = vand.u32 2147483648, %v2211_v10  ;;  %v2222_v56 = vand.u32 2147483647, %v2211_v10  ;;  %vm2218_vm5 = vweird.f32 %v2211_v10 }
0x202e   :  { %3670 = vtanh.f32 %v2201_v60 }
0x202f   :  { %v2225_v17 = vor.u32 1.1754944e-38, %v2224_v57  ;;  %vm2223_vm7 = vcmp.eq.f32.partialorder %v2222_v56, 8.507059e+37  ;;  %v1498_v56 = vpop.f32.mrf.mxu0 }
0x2033   :  { %v3669_v11 = vpop.eup %3668 }
0x2034   :  { %v2214_v44 = vmul.f32 %v3669_v11, %v2211_v10  ;;  %vm2219_vm4 = vweird.f32 %v3669_v11  ;;  %v3671_v54 = vpop.eup %3670 }
0x2035   :  { %vm2220_vm6 = vmor %vm2218_vm5, %vm2219_vm4 }
0x2036   :  { %v2215_v0 = vsub.f32 1.0, %v2214_v44 }
0x2038   :  { %v2216_v26 = vmul.f32 %v3669_v11, %v2215_v0 }
0x203a   :  { %v2217_v15 = vadd.f32 %v3669_v11, %v2216_v26 }
0x203c   :  { %v2221_v22 = vsel %vm2220_vm6, %v3669_v11, %v2217_v15  ;;  %v1499_v15 = vadd.f32 %v1498_v56, %v4743_v18 }
0x203d   :  { %v2226_v62 = vsel %vm2223_vm7, %v2225_v17, %v2221_v22 }
0x203e   :  { %v2243_v51 = vsel %vm4307_vm3, %v3671_v54, %v2226_v62 }
0x203f   :  { %2249 = vrot.lane.b32.xlu2 %v2243_v51, %s3923_s5  ;;  %v2245_v46 = vmul.f32 %v2243_v51, %v4935_v24 }
0x2057   :  { %v2198_v31 = vpop.f32.mrf.mxu3 }
0x2058   :  { %v2202_v14 = vadd.f32 %v2198_v31, %v4750_v27 }
0x205a   :  { %v3366_v21 = vmul.f32 -1.442695, %v2202_v14 }
0x205c   :  { %3672 = vpow2.f32 %v3366_v21 }
0x2062   :  { %v3673_v4 = vpop.eup %3672 }
0x2063   :  { %v2212_v25 = vadd.f32 1.0, %v3673_v4 }
0x2065   :  { %3674 = vrcp.f32 %v2212_v25  ;;  %v2239_v42 = vand.u32 2147483648, %v2212_v25  ;;  %v2237_v28 = vand.u32 2147483647, %v2212_v25  ;;  %vm2233_vm9 = vweird.f32 %v2212_v25 }
0x2066   :  { %3676 = vtanh.f32 %v2202_v14 }
0x2067   :  { %v2240_v2 = vor.u32 1.1754944e-38, %v2239_v42  ;;  %vm2238_vm11 = vcmp.eq.f32.partialorder %v2237_v28, 8.507059e+37 }
0x206b   :  { %v3675_v35 = vpop.eup %3674 }
0x206c   :  { %v2229_v53 = vmul.f32 %v3675_v35, %v2212_v25  ;;  %vm2234_vm8 = vweird.f32 %v3675_v35  ;;  %v3677_v27 = vpop.eup %3676 }
0x206d   :  { %vm2235_vm10 = vmor %vm2233_vm9, %vm2234_vm8 }
0x206e   :  { %v2230_v19 = vsub.f32 1.0, %v2229_v53 }
0x2070   :  { %v2231_v13 = vmul.f32 %v3675_v35, %v2230_v19 }
0x2072   :  { %v2232_v3 = vadd.f32 %v3675_v35, %v2231_v13 }
0x2074   :  { %v2236_v36 = vsel %vm2235_vm10, %v3675_v35, %v2232_v3 }
0x2075   :  { %v2241_v1 = vsel %vm2238_vm11, %v2240_v2, %v2236_v36 }
0x2076   :  { %v2244_v38 = vsel %vm4307_vm3, %v3677_v27, %v2241_v1 }
0x2077   :  { %2251 = vrot.lane.b32.xlu0 %v2244_v38, %s3923_s5  ;;  %v2246_v5 = vmul.f32 %v2244_v38, %v4940_v59 }
0x2099   :  { %v2250_v32 = vpop.permute.xlu2 %2249 }
0x209a   :  { %v2255_v52 = vmul.f32 %v2250_v32, %v2243_v51 }
0x209c   :  { %2259 = vrot.lane.b32.xlu1 %v2255_v52, %s3924_s30 }
0x20e9   :  { %v2252_v9 = vpop.permute.xlu0 %2251 }
0x20ea   :  { %v2256_v49 = vmul.f32 %v2252_v9, %v2244_v38 }
0x20ec   :  { %2261 = vrot.lane.b32.xlu2 %v2256_v49, %s3924_s30 }
0x210e   :  { %v2260_v30 = vpop.permute.xlu1 %2259 }
0x210f   :  { %v4971_v58 = vadd.f32 %v2260_v30, %v2245_v46 }
0x2111   :  { %3678 = vtanh.f32 %v4971_v58 }
0x2117   :  { %v3679_v45 = vpop.eup %3678 }
0x2118   :  { %2271 = vrot.lane.b32.xlu0 %v3679_v45, %s3923_s5 }
0x2146   :  { %v2262_v39 = vpop.permute.xlu2 %2261 }
0x2147   :  { %v4976_v6 = vadd.f32 %v2262_v39, %v2246_v5 }
0x2149   :  { %3680 = vtanh.f32 %v4976_v6 }
0x214f   :  { %v3681_v20 = vpop.eup %3680 }
0x2150   :  { %2273 = vrot.lane.b32.xlu1 %v3681_v20, %s3923_s5 }
0x218a   :  { %v2272_v8 = vpop.permute.xlu0 %2271 }
0x218b   :  { %v2277_v24 = vmul.f32 %v2272_v8, %v2243_v51 }
0x218d   :  { %2287 = vrot.lane.b32.xlu0 %v2277_v24, %s3923_s5  ;;  %2281 = vrot.lane.b32.xlu2 %v2277_v24, %s3924_s30 }
0x21c2   :  { %v2274_v60 = vpop.permute.xlu1 %2273 }
0x21c3   :  { %v2278_v43 = vmul.f32 %v2274_v60, %v2244_v38 }
0x21c5   :  { %2289 = vrot.lane.b32.xlu2 %v2278_v43, %s3923_s5  ;;  %2283 = vrot.lane.b32.xlu1 %v2278_v43, %s3924_s30 }
0x21e7   :  { %v4984_v59 = vpop.permute.xlu2 %2281 }
0x21ff   :  { %v2288_v29 = vpop.permute.xlu0 %2287 }
0x2200   :  { %v2293_v10 = vsel %vm539_vm12, %v4984_v59, %v2288_v29 }
0x2201   :  { %v2295_v11 = vmul.f32 %v2293_v10, %v4344_v41 }
0x2203   :  { %3367 = vmatmul.msk.f32.vlgmr.msra.gmra.mxu2 %vm420_vm13, %v2295_v11 }
0x221f   :  { %v4990_v44 = vpop.permute.xlu2 %2289 }
0x2237   :  { %v2284_v0 = vpop.permute.xlu1 %2283 }
0x2238   :  { %v2294_v57 = vsel %vm539_vm12, %v2284_v0, %v4990_v44 }
0x2239   :  { %v2296_v26 = vmul.f32 %v2294_v57, %v4352_v16 }
0x223b   :  { %3368 = vmatmul.msk.f32.gmra.mxu2 %vm420_vm13, %v2296_v26 }
0x2286   :  { %v2320_v17 = vpop.f32.mrf.mxu2 }
0x2287   :  { %v2326_v22 = vadd.f32 %v2320_v17, %v1499_v15 }
0x2289   :  { %v3369_v54 = vmul.f32 -1.442695, %v2326_v22 }
0x228b   :  { %3682 = vpow2.f32 %v3369_v54 }
0x2291   :  { %v3683_v62 = vpop.eup %3682 }
0x2292   :  { %v2336_v51 = vadd.f32 1.0, %v3683_v62 }
0x2294   :  { %3684 = vrcp.f32 %v2336_v51  ;;  %v2349_v4 = vand.u32 2147483648, %v2336_v51  ;;  %v2347_v35 = vand.u32 2147483647, %v2336_v51  ;;  %vm2343_vm15 = vweird.f32 %v2336_v51 }
0x2295   :  { %3686 = vtanh.f32 %v2326_v22 }
0x2296   :  { %v2350_v19 = vor.u32 1.1754944e-38, %v2349_v4  ;;  %vm2348_vm1 = vcmp.eq.f32.partialorder %v2347_v35, 8.507059e+37 }
0x229a   :  { %v3685_v31 = vpop.eup %3684 }
0x229b   :  { %v2339_v14 = vmul.f32 %v3685_v31, %v2336_v51  ;;  %vm2344_vm14 = vweird.f32 %v3685_v31  ;;  %v3687_v13 = vpop.eup %3686 }
0x229c   :  { %vm2345_vm0 = vmor %vm2343_vm15, %vm2344_vm14 }
0x229d   :  { %v2340_v21 = vsub.f32 1.0, %v2339_v14 }
0x229f   :  { %v2341_v25 = vmul.f32 %v3685_v31, %v2340_v21 }
0x22a1   :  { %v2342_v53 = vadd.f32 %v3685_v31, %v2341_v25 }
0x22a3   :  { %v2346_v42 = vsel %vm2345_vm0, %v3685_v31, %v2342_v53  ;;  %v1501_v53 = vpop.f32.mrf.mxu0 }
0x22a4   :  { %v2351_v28 = vsel %vm2348_vm1, %v2350_v19, %v2346_v42  ;;  %v1502_v19 = vadd.f32 %v1501_v53, %v4743_v18 }
0x22a5   :  { %v2368_v3 = vsel %vm4307_vm3, %v3687_v13, %v2351_v28 }
0x22a6   :  { %2374 = vrot.lane.b32.xlu0 %v2368_v3, %s3923_s5  ;;  %v2370_v10 = vmul.f32 %v2368_v3, %v4971_v58 }
0x22be   :  { %v2323_v2 = vpop.f32.mrf.mxu2 }
0x22bf   :  { %v2327_v36 = vadd.f32 %v2323_v2, %v4748_v61 }
0x22c1   :  { %v3370_v27 = vmul.f32 -1.442695, %v2327_v36 }
0x22c3   :  { %3688 = vpow2.f32 %v3370_v27 }
0x22c9   :  { %v3689_v1 = vpop.eup %3688 }
0x22ca   :  { %v2337_v38 = vadd.f32 1.0, %v3689_v1 }
0x22cc   :  { %3690 = vrcp.f32 %v2337_v38  ;;  %v2364_v49 = vand.u32 2147483648, %v2337_v38  ;;  %v2362_v30 = vand.u32 2147483647, %v2337_v38  ;;  %vm2358_vm4 = vweird.f32 %v2337_v38 }
0x22cd   :  { %3692 = vtanh.f32 %v2327_v36 }
0x22ce   :  { %v2365_v5 = vor.u32 1.1754944e-38, %v2364_v49  ;;  %vm2363_vm6 = vcmp.eq.f32.partialorder %v2362_v30, 8.507059e+37 }
0x22d2   :  { %v3691_v32 = vpop.eup %3690 }
0x22d3   :  { %v2354_v52 = vmul.f32 %v3691_v32, %v2337_v38  ;;  %vm2359_vm2 = vweird.f32 %v3691_v32  ;;  %v3693_v61 = vpop.eup %3692 }
0x22d4   :  { %vm2360_vm5 = vmor %vm2358_vm4, %vm2359_vm2 }
0x22d5   :  { %v2355_v9 = vsub.f32 1.0, %v2354_v52 }
0x22d7   :  { %v2356_v46 = vmul.f32 %v3691_v32, %v2355_v9 }
0x22d9   :  { %v2357_v45 = vadd.f32 %v3691_v32, %v2356_v46 }
0x22db   :  { %v2361_v39 = vsel %vm2360_vm5, %v3691_v32, %v2357_v45 }
0x22dc   :  { %v2366_v20 = vsel %vm2363_vm6, %v2365_v5, %v2361_v39  ;;  %v3449_v39 = vld [vmem:[%s5329_s8] ss:$0 sm:$0xff] }
0x22dd   :  { %v2369_v8 = vsel %vm4307_vm3, %v3693_v61, %v2366_v20  ;;  %v3450_v61 = vld [vmem:[%s5331_s10] ss:$0 sm:$0xff] }
0x22de   :  { %2376 = vrot.lane.b32.xlu1 %v2369_v8, %s3923_s5  ;;  %v2371_v26 = vmul.f32 %v2369_v8, %v4976_v6 }
0x2318   :  { %v2375_v24 = vpop.permute.xlu0 %2374 }
0x2319   :  { %v2380_v60 = vmul.f32 %v2375_v24, %v2368_v3 }
0x231b   :  { %2384 = vrot.lane.b32.xlu2 %v2380_v60, %s3924_s30 }
0x2350   :  { %v2377_v43 = vpop.permute.xlu1 %2376 }
0x2351   :  { %v2381_v29 = vmul.f32 %v2377_v43, %v2369_v8 }
0x2353   :  { %2386 = vrot.lane.b32.xlu0 %v2381_v29, %s3924_s30 }
0x2375   :  { %v2385_v11 = vpop.permute.xlu2 %2384 }
0x2376   :  { %v5007_v0 = vadd.f32 %v2385_v11, %v2370_v10 }
0x2378   :  { %3694 = vtanh.f32 %v5007_v0 }
0x237e   :  { %v3695_v57 = vpop.eup %3694 }
0x237f   :  { %2396 = vrot.lane.b32.xlu1 %v3695_v57, %s3923_s5 }
0x23c5   :  { %v2387_v56 = vpop.permute.xlu0 %2386 }
0x23c6   :  { %v2391_v15 = vadd.f32 %v2387_v56, %v2371_v26 }
0x23c8   :  { %3696 = vtanh.f32 %v2391_v15 }
0x23ce   :  { %v3697_v17 = vpop.eup %3696 }
0x23cf   :  { %2398 = vrot.lane.b32.xlu2 %v3697_v17, %s3923_s5 }
0x23f1   :  { %v2397_v22 = vpop.permute.xlu1 %2396 }
0x23f2   :  { %v2402_v54 = vmul.f32 %v2397_v22, %v2368_v3  ;;  %v2589_v22 = vld [vmem:[#allocation9 + $0x30] sm:$0xff] }
0x23f4   :  { %2412 = vrot.lane.b32.xlu1 %v2402_v54, %s3923_s5  ;;  %2406 = vrot.lane.b32.xlu0 %v2402_v54, %s3924_s30  ;;  %v2588_v54 = vld [vmem:[#allocation9 + $0x28] sm:$0xff] }
0x2429   :  { %v2399_v58 = vpop.permute.xlu2 %2398 }
0x242a   :  { %v2403_v62 = vmul.f32 %v2399_v58, %v2369_v8  ;;  %v2587_v58 = vld [vmem:[#allocation9 + $0x20] sm:$0xff] }
0x242c   :  { %2414 = vrot.lane.b32.xlu0 %v2403_v62, %s3923_s5  ;;  %2408 = vrot.lane.b32.xlu2 %v2403_v62, %s3924_s30  ;;  %v2586_v62 = vld [vmem:[#allocation9 + $0x18] sm:$0xff] }
0x2466   :  { %v2413_v51 = vpop.permute.xlu1 %2412  ;;  %v5017_v6 = vpop.permute.xlu0 %2406 }
0x2467   :  { %v2418_v31 = vsel %vm539_vm12, %v5017_v6, %v2413_v51  ;;  %v2585_v51 = vld [vmem:[#allocation9 + $0x10] sm:$0xff] }
0x2468   :  { %v2420_v14 = vmul.f32 %v2418_v31, %v4344_v41  ;;  %v2584_v31 = vld [vmem:[#allocation9 + $0x8] sm:$0xff] }
0x246a   :  { %3371 = vmatmul.msk.f32.vlgmr.msra.gmra.mxu3 %vm420_vm13, %v2420_v14  ;;  %v2583_v14 = vld [vmem:[#allocation9] sm:$0xff] }
0x2486   :  { %v2409_v21 = vpop.permute.xlu2 %2408 }
0x249e   :  { %v5023_v4 = vpop.permute.xlu0 %2414 }
0x249f   :  { %v2419_v25 = vsel %vm539_vm12, %v2409_v21, %v5023_v4 }
0x24a0   :  { %v2421_v35 = vmul.f32 %v2419_v25, %v4352_v16 }
0x24a2   :  { %3372 = vmatmul.msk.f32.gmra.mxu3 %vm420_vm13, %v2421_v35 }
0x24ed   :  { %v2445_v42 = vpop.f32.mrf.mxu3 }
0x24ee   :  { %v5030_v13 = vadd.f32 %v2445_v42, %v1502_v19  ;;  %v5058_v19 = vsel %vm539_vm12, %v4824_v23, %v5023_v4  ;;  %v5072_v42 = vsel %vm539_vm12, %v4912_v34, %v4954_v63  ;;  %v5079_v23 = vsel %vm539_vm12, %v4948_v50, %v4918_v7  ;;  %v3452_v50 = vld [vmem:[#allocation2] ss:$0 sm:$0xff] }
0x24ef   :  { %v5093_v34 = vsel %vm539_vm12, %v5017_v6, %v4838_v12  ;;  %v3926_v7 = vmov 0   ;;  %v5106_v12 = vld [vmem:[%s5333_s13] ss:$0 sm:$0xff]  ;;  %s3929_s13 = smov 2  }
0x24f0   :  { %3436 = vset.pattern.permute.xlu0 %v3926_v7 }
0x2525   :  { %v2448_v28 = vpop.f32.mrf.mxu3 }
0x2526   :  { %v2452_v41 = vadd.f32 %v2448_v28, %v4746_v37 }
0x2528   :  { %v3374_v3 = vmul.f32 -1.442695, %v2452_v41 }
0x252a   :  { %3698 = vpow2.f32 %v3374_v3 }
0x2530   :  { %v3699_v2 = vpop.eup %3698 }
0x2531   :  { %v2462_v36 = vadd.f32 1.0, %v3699_v2  ;;  %v3451_v2 = vld [vmem:[#allocation3] ss:$0 sm:$0xff] }
0x2533   :  { %3700 = vrcp.f32 %v2462_v36  ;;  %v2489_v16 = vand.u32 2147483648, %v2462_v36  ;;  %v2487_v52 = vand.u32 2147483647, %v2462_v36  ;;  %vm2483_vm8 = vweird.f32 %v2462_v36 }
0x2534   :  { %3702 = vtanh.f32 %v2452_v41 }
0x2535   :  { %v2490_v9 = vor.u32 1.1754944e-38, %v2489_v16  ;;  %vm2488_vm10 = vcmp.eq.f32.partialorder %v2487_v52, 8.507059e+37 }
0x2539   :  { %v3701_v27 = vpop.eup %3700 }
0x253a   :  { %v2479_v1 = vmul.f32 %v3701_v27, %v2462_v36  ;;  %vm2484_vm7 = vweird.f32 %v3701_v27  ;;  %v3703_v37 = vpop.eup %3702 }
0x253b   :  { %vm2485_vm9 = vmor %vm2483_vm8, %vm2484_vm7 }
0x253c   :  { %v2480_v38 = vsub.f32 1.0, %v2479_v1 }
0x253e   :  { %v2481_v32 = vmul.f32 %v3701_v27, %v2480_v38 }
0x2540   :  { %v2482_v18 = vadd.f32 %v3701_v27, %v2481_v32 }
0x2542   :  { %v2486_v49 = vsel %vm2485_vm9, %v3701_v27, %v2482_v18 }
0x2543   :  { %v2491_v46 = vsel %vm2488_vm10, %v2490_v9, %v2486_v49 }
0x2544   :  { %v2494_v30 = vsel %vm4307_vm3, %v3703_v37, %v2491_v46 }
0x2545   :  { %2501 = vrot.lane.b32.xlu1 %v2494_v30, %s3923_s5  ;;  %v2496_v20 = vmul.f32 %v2494_v30, %v2391_v15  ;;  %v2590_v15 = vld [vmem:[#allocation9 + $0x38] sm:$0xff] }
0x2546   :  { %2627 = vmatpush.msra.mxu0 %v2590_v15 }
0x2548   :  { %2628 = vmatpush.msra.mxu0 %v2589_v22 }
0x254a   :  { %2629 = vmatpush.msra.mxu0 %v2588_v54 }
0x254c   :  { %2630 = vmatpush.msra.mxu0 %v2587_v58 }
0x254e   :  { %2631 = vmatpush.msra.mxu0 %v2586_v62 }
0x2550   :  { %2632 = vmatpush.msra.mxu0 %v2585_v51 }
0x2552   :  { %2633 = vmatpush.msra.mxu0 %v2584_v31 }
0x2554   :  { %2634 = vmatpush.msra.mxu0 %v2583_v14 }
0x25b7   :  { %v2502_v45 = vpop.permute.xlu1 %2501 }
0x25b8   :  { %v2506_v5 = vmul.f32 %v2502_v45, %v2494_v30 }
0x25ba   :  { %2511 = vrot.lane.b32.xlu2 %v2506_v5, %s3924_s30 }
0x25c2   :  { %2548 = vrot.lane.b32.xlu2 %v3449_v39, %s3925_s9 }
0x25ca   :  { %2567 = vrot.lane.b32.xlu2 %v3450_v61, %s3924_s30 }
0x2614   :  { %v2512_v8 = vpop.permute.xlu2 %2511 }
0x2615   :  { %v2516_v24 = vadd.f32 %v2512_v8, %v2496_v20 }
0x2617   :  { %3704 = vtanh.f32 %v2516_v24 }
0x261c   :  { %v2549_v60 = vpop.permute.xlu2 %2548 }
0x261d   :  { %v3705_v43 = vpop.eup %3704 }
0x261e   :  { %2523 = vrot.lane.b32.xlu0 %v3705_v43, %s3923_s5 }
0x2624   :  { %v2568_v29 = vpop.permute.xlu2 %2567 }
0x2625   :  { %v2570_v10 = vmul.f32 %v2568_v29, %v2516_v24  ;;  %v3930_v29 = vmov 3  }
0x2626   :  { %3438 = vset.pattern.permute.xlu1 %v3930_v29  ;;  %3439 = vset.pattern.permute.xlu2 %v3930_v29 }
0x2627   :  { %2572 = vrot.lane.b32.xlu2 %v2570_v10, %s3925_s9 }
0x2681   :  { %v2573_v11 = vpop.permute.xlu2 %2572 }
0x2682   :  { %v2575_v57 = vsel %vm539_vm12, %v2573_v11, 0.0 }
0x2683   :  { %2576 = vadd.xlane.f32.xlu2 %v2575_v57 }
0x2690   :  { %v2524_v26 = vpop.permute.xlu0 %2523 }
0x2691   :  { %v2528_v56 = vmul.f32 %v2524_v26, %v2494_v30 }
0x2693   :  { %v2551_v17 = vmul.f32 %v2549_v60, %v2528_v56  ;;  %2534 = vrot.lane.b32.xlu1 %v2528_v56, %s3923_s5 }
0x2695   :  { %2553 = vrot.lane.b32.xlu0 %v2551_v17, %s3924_s30 }
0x26f6   :  { %v2577_v36 = vpop.xlane.xlu2 %2576 }
0x26f7   :  { %v2582_v27 = vadd.f32 %v3451_v2, %v2577_v36 }
0x2705   :  { %v2535_v21 = vpop.permute.xlu1 %2534 }
0x2706   :  { %v5050_v25 = vsel %vm539_vm12, %v4780_v47, %v2535_v21  ;;  %v5065_v47 = vsel %vm539_vm12, %v4868_v40, %v4990_v44  ;;  %v5086_v40 = vsel %vm539_vm12, %v4984_v59, %v4882_v48  ;;  %v5101_v48 = vld [vmem:[%s5334_s14] ss:$0 sm:$0xff]  ;;  %s3928_s14 = smov 1  }
0x2707   :  { %3375 = vmatmul.msk.f32.vlgmr.msra.gmra.mxu0 %vm420_vm13, %v5050_v25  ;;  %v2554_v35 = vpop.permute.xlu0 %2553 }
0x2708   :  { %v2556_v53 = vsel %vm539_vm12, %v2554_v35, 0.0 }
0x2709   :  { %2557 = vadd.xlane.f32.xlu1 %v2556_v53 }
0x270f   :  { %3376 = vmatmul.msk.f32.gmra.mxu0 %vm420_vm13, %v5058_v19 }
0x2717   :  { %3377 = vmatmul.msk.f32.gmra.mxu0 %vm420_vm13, %v5065_v47 }
0x271f   :  { %3378 = vmatmul.msk.f32.gmra.mxu0 %vm420_vm13, %v5072_v42 }
0x2727   :  { %3379 = vmatmul.msk.f32.gmra.mxu0 %vm420_vm13, %v5079_v23 }
0x272f   :  { %3380 = vmatmul.msk.f32.gmra.mxu0 %vm420_vm13, %v5086_v40 }
0x2737   :  { %3381 = vmatmul.msk.f32.gmra.mxu0 %vm420_vm13, %v5093_v34 }
0x277c   :  { %v2558_v63 = vpop.xlane.xlu1 %2557 }
0x277d   :  { %v2563_v44 = vadd.f32 %v3452_v50, %v2558_v63 }
0x277f   :  { %2663 = vperm.xlu0 %3436, %v2563_v44  }
0x2784   :  { %v2636_v59 = vpop.f32.mrf.mxu0 }
0x2785   :  { %v2637_v4 = vadd.f32 %v5101_v48, %v2636_v59 }
0x2787   :  { %3437 = vset.pattern.permute.xlu0 %v3930_v29 }
0x278c   :  { %v2639_v57 = vpop.f32.mrf.mxu0 }
0x278d   :  { %v2640_v56 = vadd.f32 %v5101_v48, %v2639_v57 }
0x27f1   :  { %v2664_v6 = vpop.permute.xlu0 %2663 }
0x27f2   :  { %v2669_v28 = vmul.f32 %v5106_v12, %v2664_v6 }
0x27f4   :  { %v2670_v41 = vadd.f32 %v2669_v28, %v2637_v4 }
0x27f6   :  { %3706 = vtanh.f32 %v2670_v41  ;;  %v3383_v1 = vmul.f32 -1.442695, %v2670_v41 }
0x27f8   :  { %3708 = vpow2.f32 %v3383_v1  ;;  %v2642_v1 = vpop.f32.mrf.mxu0 }
0x27fc   :  { %v3707_v3 = vpop.eup %3706 }
0x27fd   :  { %2697 = vrot.lane.b32.xlu0 %v3707_v3, %s3927_s22 }
0x27fe   :  { %v3709_v38 = vpop.eup %3708 }
0x27ff   :  { %v2674_v16 = vadd.f32 1.0, %v3709_v38 }
0x2801   :  { %3710 = vrcp.f32 %v2674_v16  ;;  %v2686_v37 = vand.u32 2147483648, %v2674_v16  ;;  %vm2680_vm14 = vweird.f32 %v2674_v16  ;;  %v2684_v46 = vand.u32 2147483647, %v2674_v16 }
0x2803   :  { %v2687_v45 = vor.u32 1.1754944e-38, %v2686_v37  ;;  %vm2685_vm0 = vcmp.eq.f32.partialorder %v2684_v46, 8.507059e+37 }
0x2805   :  { %2692 = vrot.lane.b32.xlu0 %v2582_v27, %s3928_s14 }
0x2807   :  { %v3711_v32 = vpop.eup %3710 }
0x2808   :  { %v2676_v52 = vmul.f32 %v3711_v32, %v2674_v16  ;;  %vm2681_vm11 = vweird.f32 %v3711_v32  ;;  %v2643_v16 = vadd.f32 %v5101_v48, %v2642_v1 }
0x2809   :  { %vm2682_vm15 = vmor %vm2680_vm14, %vm2681_vm11 }
0x280a   :  { %v2677_v18 = vsub.f32 1.0, %v2676_v52 }
0x280c   :  { %v2678_v9 = vmul.f32 %v3711_v32, %v2677_v18 }
0x280e   :  { %v2679_v49 = vadd.f32 %v3711_v32, %v2678_v9 }
0x2810   :  { %v2683_v30 = vsel %vm2682_vm15, %v3711_v32, %v2679_v49 }
0x2811   :  { %v2688_v39 = vsel %vm2685_vm0, %v2687_v45, %v2683_v30 }
0x286f   :  { %v2698_v5 = vpop.permute.xlu0 %2697 }
0x2870   :  { %v2700_v61 = vmul.f32 %v2698_v5, %v2688_v39 }
0x2872   :  { %2702 = vrot.lane.b32.xlu0 %v2700_v61, %s3928_s14 }
0x2877   :  { %v2693_v20 = vpop.permute.xlu0 %2692 }
0x2878   :  { %v2695_v8 = vmul.f32 %v2693_v20, %v2688_v39 }
0x28e4   :  { %v2703_v24 = vpop.permute.xlu0 %2702 }
0x28e5   :  { %v2705_v60 = vadd.f32 %v2703_v24, %v2695_v8 }
0x28e7   :  { %3712 = vtanh.f32 %v2705_v60 }
0x28ed   :  { %v3713_v43 = vpop.eup %3712 }
0x28ee   :  { %2708 = vrot.lane.b32.xlu1 %v3713_v43, %s3929_s13 }
0x2960   :  { %v2709_v10 = vpop.permute.xlu1 %2708 }
0x2961   :  { %v5117_v11 = vmul.f32 %v2709_v10, %v2688_v39 }
0x2963   :  { %2714 = vperm.xlu0 %3437, %v5117_v11  }
0x29d5   :  { %v2715_v26 = vpop.permute.xlu0 %2714 }
0x29d6   :  { %v2717_v17 = vmul.f32 %v5106_v12, %v2715_v26 }
0x29d8   :  { %v2718_v15 = vadd.f32 %v2717_v17, %v2640_v56 }
0x29da   :  { %3714 = vtanh.f32 %v2718_v15  ;;  %v3384_v54 = vmul.f32 -1.442695, %v2718_v15 }
0x29dc   :  { %3716 = vpow2.f32 %v3384_v54  ;;  %v2645_v54 = vpop.f32.mrf.mxu0 }
0x29e0   :  { %v3715_v22 = vpop.eup %3714 }
0x29e1   :  { %2741 = vrot.lane.b32.xlu2 %v3715_v22, %s3927_s22 }
0x29e2   :  { %v3717_v58 = vpop.eup %3716 }
0x29e3   :  { %v2722_v62 = vadd.f32 1.0, %v3717_v58 }
0x29e5   :  { %3718 = vrcp.f32 %v2722_v62  ;;  %v2734_v53 = vand.u32 2147483648, %v2722_v62  ;;  %vm2728_vm2 = vweird.f32 %v2722_v62  ;;  %v2732_v50 = vand.u32 2147483647, %v2722_v62 }
0x29e7   :  { %v2735_v44 = vor.u32 1.1754944e-38, %v2734_v53  ;;  %vm2733_vm5 = vcmp.eq.f32.partialorder %v2732_v50, 8.507059e+37 }
0x29eb   :  { %v3719_v51 = vpop.eup %3718 }
0x29ec   :  { %v2724_v31 = vmul.f32 %v3719_v51, %v2722_v62  ;;  %vm2729_vm1 = vweird.f32 %v3719_v51  ;;  %v2646_v62 = vadd.f32 %v5101_v48, %v2645_v54 }
0x29ed   :  { %vm2730_vm4 = vmor %vm2728_vm2, %vm2729_vm1 }
0x29ee   :  { %v2725_v14 = vsub.f32 1.0, %v2724_v31 }
0x29f0   :  { %v2726_v21 = vmul.f32 %v3719_v51, %v2725_v14 }
0x29f2   :  { %v2727_v35 = vadd.f32 %v3719_v51, %v2726_v21 }
0x29f4   :  { %v2731_v63 = vsel %vm2730_vm4, %v3719_v51, %v2727_v35 }
0x29f5   :  { %v2736_v6 = vsel %vm2733_vm5, %v2735_v44, %v2731_v63 }
0x29f6   :  { %v2739_v28 = vmul.f32 %v2736_v6, %v2705_v60 }
0x2a3b   :  { %v2742_v59 = vpop.permute.xlu2 %2741 }
0x2a3c   :  { %v2744_v4 = vmul.f32 %v2742_v59, %v2736_v6 }
0x2a3e   :  { %2746 = vrot.lane.b32.xlu0 %v2744_v4, %s3928_s14 }
0x2ab0   :  { %v2747_v41 = vpop.permute.xlu0 %2746 }
0x2ab1   :  { %v2749_v3 = vadd.f32 %v2747_v41, %v2739_v28 }
0x2ab3   :  { %3720 = vtanh.f32 %v2749_v3 }
0x2ab9   :  { %v3721_v2 = vpop.eup %3720 }
0x2aba   :  { %2752 = vrot.lane.b32.xlu1 %v3721_v2, %s3929_s13 }
0x2b2c   :  { %v2753_v36 = vpop.permute.xlu1 %2752 }
0x2b2d   :  { %v5125_v27 = vmul.f32 %v2753_v36, %v2736_v6 }
0x2b2f   :  { %2758 = vperm.xlu0 %3437, %v5125_v27  }
0x2ba1   :  { %v2759_v38 = vpop.permute.xlu0 %2758 }
0x2ba2   :  { %v2761_v32 = vmul.f32 %v5106_v12, %v2759_v38 }
0x2ba4   :  { %v2762_v52 = vadd.f32 %v2761_v32, %v2643_v16 }
0x2ba6   :  { %3722 = vtanh.f32 %v2762_v52  ;;  %v3385_v9 = vmul.f32 -1.442695, %v2762_v52 }
0x2ba8   :  { %3724 = vpow2.f32 %v3385_v9  ;;  %v2648_v9 = vpop.f32.mrf.mxu0 }
0x2bac   :  { %v3723_v18 = vpop.eup %3722 }
0x2bad   :  { %2785 = vrot.lane.b32.xlu1 %v3723_v18, %s3927_s22 }
0x2bae   :  { %v3725_v49 = vpop.eup %3724 }
0x2baf   :  { %v2766_v37 = vadd.f32 1.0, %v3725_v49 }
0x2bb1   :  { %3726 = vrcp.f32 %v2766_v37  ;;  %v2778_v61 = vand.u32 2147483648, %v2766_v37  ;;  %vm2772_vm7 = vweird.f32 %v2766_v37  ;;  %v2776_v20 = vand.u32 2147483647, %v2766_v37 }
0x2bb3   :  { %v2779_v24 = vor.u32 1.1754944e-38, %v2778_v61  ;;  %vm2777_vm9 = vcmp.eq.f32.partialorder %v2776_v20, 8.507059e+37 }
0x2bb7   :  { %v3727_v46 = vpop.eup %3726 }
0x2bb8   :  { %v2768_v30 = vmul.f32 %v3727_v46, %v2766_v37  ;;  %vm2773_vm6 = vweird.f32 %v3727_v46  ;;  %v2649_v37 = vadd.f32 %v5101_v48, %v2648_v9 }
0x2bb9   :  { %vm2774_vm8 = vmor %vm2772_vm7, %vm2773_vm6 }
0x2bba   :  { %v2769_v45 = vsub.f32 1.0, %v2768_v30 }
0x2bbc   :  { %v2770_v5 = vmul.f32 %v3727_v46, %v2769_v45 }
0x2bbe   :  { %v2771_v39 = vadd.f32 %v3727_v46, %v2770_v5 }
0x2bc0   :  { %v2775_v8 = vsel %vm2774_vm8, %v3727_v46, %v2771_v39 }
0x2bc1   :  { %v2780_v43 = vsel %vm2777_vm9, %v2779_v24, %v2775_v8 }
0x2bc2   :  { %v2783_v57 = vmul.f32 %v2780_v43, %v2749_v3 }
0x2c1f   :  { %v2786_v60 = vpop.permute.xlu1 %2785 }
0x2c20   :  { %v2788_v10 = vmul.f32 %v2786_v60, %v2780_v43 }
0x2c22   :  { %2790 = vrot.lane.b32.xlu0 %v2788_v10, %s3928_s14 }
0x2c94   :  { %v2791_v26 = vpop.permute.xlu0 %2790 }
0x2c95   :  { %v2793_v56 = vadd.f32 %v2791_v26, %v2783_v57 }
0x2c97   :  { %3728 = vtanh.f32 %v2793_v56 }
0x2c9d   :  { %v3729_v17 = vpop.eup %3728 }
0x2c9e   :  { %2796 = vrot.lane.b32.xlu2 %v3729_v17, %s3929_s13 }
0x2cf8   :  { %v2797_v15 = vpop.permute.xlu2 %2796 }
0x2cf9   :  { %v5133_v22 = vmul.f32 %v2797_v15, %v2780_v43 }
0x2cfb   :  { %2802 = vperm.xlu1 %3438, %v5133_v22  }
0x2d03   :  { %3440 = vset.pattern.permute.xlu1 %v3926_v7 }
0x2d6d   :  { %v2803_v58 = vpop.permute.xlu1 %2802 }
0x2d6e   :  { %v2805_v51 = vmul.f32 %v5106_v12, %v2803_v58 }
0x2d70   :  { %v2806_v31 = vadd.f32 %v2805_v51, %v2646_v62 }
0x2d72   :  { %3730 = vtanh.f32 %v2806_v31  ;;  %v3386_v21 = vmul.f32 -1.442695, %v2806_v31 }
0x2d74   :  { %3732 = vpow2.f32 %v3386_v21 }
0x2d78   :  { %v3731_v14 = vpop.eup %3730 }
0x2d79   :  { %2829 = vrot.lane.b32.xlu0 %v3731_v14, %s3927_s22  ;;  %v3373_v14 = vmul.f32 -1.442695, %v5030_v13 }
0x2d7a   :  { %v3733_v35 = vpop.eup %3732 }
0x2d7b   :  { %v2810_v53 = vadd.f32 1.0, %v3733_v35 }
0x2d7d   :  { %3734 = vrcp.f32 %v2810_v53  ;;  %v2822_v6 = vand.u32 2147483648, %v2810_v53  ;;  %vm2816_vm11 = vweird.f32 %v2810_v53  ;;  %v2820_v4 = vand.u32 2147483647, %v2810_v53 }
0x2d7f   :  { %v2823_v41 = vor.u32 1.1754944e-38, %v2822_v6  ;;  %vm2821_vm15 = vcmp.eq.f32.partialorder %v2820_v4, 8.507059e+37 }
0x2d83   :  { %v3735_v50 = vpop.eup %3734 }
0x2d84   :  { %v2812_v63 = vmul.f32 %v3735_v50, %v2810_v53  ;;  %vm2817_vm10 = vweird.f32 %v3735_v50 }
0x2d85   :  { %vm2818_vm14 = vmor %vm2816_vm11, %vm2817_vm10 }
0x2d86   :  { %v2813_v44 = vsub.f32 1.0, %v2812_v63 }
0x2d88   :  { %v2814_v7 = vmul.f32 %v3735_v50, %v2813_v44 }
0x2d8a   :  { %v2815_v59 = vadd.f32 %v3735_v50, %v2814_v7 }
0x2d8c   :  { %v2819_v28 = vsel %vm2818_vm14, %v3735_v50, %v2815_v59 }
0x2d8d   :  { %v2824_v2 = vsel %vm2821_vm15, %v2823_v41, %v2819_v28 }
0x2d8e   :  { %v2827_v1 = vmul.f32 %v2824_v2, %v2793_v56 }
0x2deb   :  { %v2830_v3 = vpop.permute.xlu0 %2829 }
0x2dec   :  { %v2832_v36 = vmul.f32 %v2830_v3, %v2824_v2 }
0x2dee   :  { %2834 = vrot.lane.b32.xlu2 %v2832_v36, %s3928_s14 }
0x2e48   :  { %v2835_v38 = vpop.permute.xlu2 %2834 }
0x2e49   :  { %v2837_v16 = vadd.f32 %v2835_v38, %v2827_v1  ;;  %v2651_v38 = vpop.f32.mrf.mxu0 }
0x2e4b   :  { %3736 = vtanh.f32 %v2837_v16 }
0x2e51   :  { %v3737_v32 = vpop.eup %3736 }
0x2e52   :  { %2840 = vrot.lane.b32.xlu1 %v3737_v32, %s3929_s13  ;;  %v2652_v32 = vadd.f32 %v5101_v48, %v2651_v38 }
0x2ec4   :  { %v2841_v52 = vpop.permute.xlu1 %2840 }
0x2ec5   :  { %v5142_v18 = vmul.f32 %v2841_v52, %v2824_v2 }
0x2ec7   :  { %2846 = vperm.xlu0 %3437, %v5142_v18  }
0x2f39   :  { %v2847_v49 = vpop.permute.xlu0 %2846 }
0x2f3a   :  { %v2849_v46 = vmul.f32 %v5106_v12, %v2847_v49 }
0x2f3c   :  { %v2850_v30 = vadd.f32 %v2849_v46, %v2649_v37 }
0x2f3e   :  { %3738 = vtanh.f32 %v2850_v30  ;;  %v3387_v5 = vmul.f32 -1.442695, %v2850_v30 }
0x2f40   :  { %3740 = vpow2.f32 %v3387_v5 }
0x2f44   :  { %v3739_v45 = vpop.eup %3738 }
0x2f45   :  { %2873 = vrot.lane.b32.xlu2 %v3739_v45, %s3927_s22 }
0x2f46   :  { %v3741_v39 = vpop.eup %3740 }
0x2f47   :  { %v2854_v61 = vadd.f32 1.0, %v3741_v39 }
0x2f49   :  { %3742 = vrcp.f32 %v2854_v61  ;;  %v2866_v10 = vand.u32 2147483648, %v2854_v61  ;;  %vm2860_vm1 = vweird.f32 %v2854_v61  ;;  %v2864_v57 = vand.u32 2147483647, %v2854_v61 }
0x2f4b   :  { %v2867_v56 = vor.u32 1.1754944e-38, %v2866_v10  ;;  %vm2865_vm4 = vcmp.eq.f32.partialorder %v2864_v57, 8.507059e+37 }
0x2f4f   :  { %v3743_v20 = vpop.eup %3742 }
0x2f50   :  { %v2856_v8 = vmul.f32 %v3743_v20, %v2854_v61  ;;  %vm2861_vm0 = vweird.f32 %v3743_v20 }
0x2f51   :  { %vm2862_vm2 = vmor %vm2860_vm1, %vm2861_vm0 }
0x2f52   :  { %v2857_v24 = vsub.f32 1.0, %v2856_v8 }
0x2f54   :  { %v2858_v60 = vmul.f32 %v3743_v20, %v2857_v24 }
0x2f56   :  { %v2859_v43 = vadd.f32 %v3743_v20, %v2858_v60 }
0x2f58   :  { %v2863_v26 = vsel %vm2862_vm2, %v3743_v20, %v2859_v43 }
0x2f59   :  { %v2868_v15 = vsel %vm2865_vm4, %v2867_v56, %v2863_v26 }
0x2f5a   :  { %v2871_v58 = vmul.f32 %v2868_v15, %v2837_v16 }
0x2f9f   :  { %v2874_v17 = vpop.permute.xlu2 %2873 }
0x2fa0   :  { %v2876_v54 = vmul.f32 %v2874_v17, %v2868_v15 }
0x2fa2   :  { %2878 = vrot.lane.b32.xlu1 %v2876_v54, %s3928_s14 }
0x3014   :  { %v2879_v62 = vpop.permute.xlu1 %2878 }
0x3015   :  { %v5149_v51 = vadd.f32 %v2879_v62, %v2871_v58 }
0x3017   :  { %3744 = vtanh.f32 %v5149_v51 }
0x3018   :  { %3746 = vpow2.f32 %v3373_v14 }
0x301d   :  { %v3745_v31 = vpop.eup %3744 }
0x301e   :  { %2884 = vrot.lane.b32.xlu0 %v3745_v31, %s3929_s13  ;;  %v3747_v21 = vpop.eup %3746 }
0x301f   :  { %v2461_v35 = vadd.f32 1.0, %v3747_v21 }
0x3021   :  { %3748 = vrcp.f32 %v2461_v35  ;;  %v2474_v4 = vand.u32 2147483648, %v2461_v35  ;;  %vm2468_vm6 = vweird.f32 %v2461_v35  ;;  %v2472_v28 = vand.u32 2147483647, %v2461_v35 }
0x3022   :  { %3750 = vtanh.f32 %v5030_v13 }
0x3023   :  { %v2475_v3 = vor.u32 1.1754944e-38, %v2474_v4  ;;  %vm2473_vm8 = vcmp.eq.f32.partialorder %v2472_v28, 8.507059e+37 }
0x3027   :  { %v3749_v53 = vpop.eup %3748 }
0x3028   :  { %v2464_v50 = vmul.f32 %v3749_v53, %v2461_v35  ;;  %vm2469_vm5 = vweird.f32 %v3749_v53  ;;  %v3751_v36 = vpop.eup %3750 }
0x3029   :  { %vm2470_vm7 = vmor %vm2468_vm6, %vm2469_vm5  ;;  %vm3042_vm6 = vcmask 7168  }
0x302a   :  { %v2465_v63 = vsub.f32 1.0, %v2464_v50  ;;  %v2654_v50 = vpop.f32.mrf.mxu0 }
0x302c   :  { %v2466_v44 = vmul.f32 %v3749_v53, %v2465_v63  ;;  %v2655_v63 = vadd.f32 %v5101_v48, %v2654_v50 }
0x302e   :  { %v2467_v59 = vadd.f32 %v3749_v53, %v2466_v44 }
0x3030   :  { %v2471_v41 = vsel %vm2470_vm7, %v3749_v53, %v2467_v59  ;;  %vm3044_vm7 = vcmask 15360  }
0x3031   :  { %v2476_v2 = vsel %vm2473_vm8, %v2475_v3, %v2471_v41  ;;  %vm3046_vm8 = vcmask 23552  }
0x3032   :  { %v2493_v1 = vsel %vm4307_vm3, %v3751_v36, %v2476_v2 }
0x3033   :  { %v2495_v54 = vmul.f32 %v2493_v1, %v5007_v0 }
0x3090   :  { %v2885_v7 = vpop.permute.xlu0 %2884 }
0x3091   :  { %v5154_v6 = vmul.f32 %v2885_v7, %v2868_v15 }
0x3093   :  { %2890 = vperm.xlu2 %3439, %v5154_v6  }
0x309b   :  { %2499 = vrot.lane.b32.xlu2 %v2493_v1, %s3923_s5 }
0x30ed   :  { %v2891_v16 = vpop.permute.xlu2 %2890 }
0x30ee   :  { %v2893_v52 = vmul.f32 %v5106_v12, %v2891_v16 }
0x30f0   :  { %v2894_v13 = vadd.f32 %v2893_v52, %v2652_v32 }
0x30f2   :  { %3752 = vtanh.f32 %v2894_v13  ;;  %v3388_v49 = vmul.f32 -1.442695, %v2894_v13 }
0x30f4   :  { %3754 = vpow2.f32 %v3388_v49 }
0x30f5   :  { %v2500_v57 = vpop.permute.xlu2 %2499 }
0x30f6   :  { %v2505_v26 = vmul.f32 %v2500_v57, %v2493_v1 }
0x30f8   :  { %v3753_v9 = vpop.eup %3752 }
0x30f9   :  { %2917 = vrot.lane.b32.xlu1 %v3753_v9, %s3927_s22 }
0x30fa   :  { %v3755_v37 = vpop.eup %3754 }
0x30fb   :  { %v2898_v46 = vadd.f32 1.0, %v3755_v37 }
0x30fd   :  { %3756 = vrcp.f32 %v2898_v46  ;;  %v2910_v61 = vand.u32 2147483648, %v2898_v46  ;;  %vm2904_vm9 = vweird.f32 %v2898_v46  ;;  %v2908_v20 = vand.u32 2147483647, %v2898_v46 }
0x30ff   :  { %v2911_v24 = vor.u32 1.1754944e-38, %v2910_v61  ;;  %vm2909_vm11 = vcmp.eq.f32.partialorder %v2908_v20, 8.507059e+37 }
0x3103   :  { %v3757_v33 = vpop.eup %3756 }
0x3104   :  { %v2900_v30 = vmul.f32 %v3757_v33, %v2898_v46  ;;  %vm2905_vm3 = vweird.f32 %v3757_v33 }
0x3105   :  { %vm2906_vm10 = vmor %vm2904_vm9, %vm2905_vm3  ;;  %vm3048_vm3 = vcmask 31744   ;;  %vm3050_vm9 = vcmask 39936  }
0x3106   :  { %v2901_v45 = vsub.f32 1.0, %v2900_v30 }
0x3108   :  { %v2902_v5 = vmul.f32 %v3757_v33, %v2901_v45 }
0x310a   :  { %v2903_v39 = vadd.f32 %v3757_v33, %v2902_v5 }
0x310c   :  { %v2907_v8 = vsel %vm2906_vm10, %v3757_v33, %v2903_v39  ;;  %vm3052_vm10 = vcmask 48128  }
0x310d   :  { %v2912_v43 = vsel %vm2909_vm11, %v2911_v24, %v2907_v8  ;;  %vm3054_vm11 = vcmask 56320  }
0x310e   :  { %v2915_v56 = vmul.f32 %v2912_v43, %v5149_v51 }
0x316b   :  { %v2918_v60 = vpop.permute.xlu1 %2917 }
0x316c   :  { %v2920_v10 = vmul.f32 %v2918_v60, %v2912_v43 }
0x316e   :  { %2922 = vrot.lane.b32.xlu0 %v2920_v10, %s3928_s14 }
0x3176   :  { %2509 = vrot.lane.b32.xlu0 %v2505_v26, %s3924_s30 }
0x31e0   :  { %v2923_v17 = vpop.permute.xlu0 %2922 }
0x31e1   :  { %v2925_v15 = vadd.f32 %v2923_v17, %v2915_v56 }
0x31e3   :  { %3758 = vtanh.f32 %v2925_v15 }
0x31e8   :  { %v2510_v58 = vpop.permute.xlu0 %2509 }
0x31e9   :  { %v3759_v62 = vpop.eup %3758  ;;  %v2515_v31 = vadd.f32 %v2510_v58, %v2495_v54 }
0x31ea   :  { %2928 = vrot.lane.b32.xlu1 %v3759_v62, %s3929_s13 }
0x31eb   :  { %3760 = vtanh.f32 %v2515_v31 }
0x31f1   :  { %v3761_v14 = vpop.eup %3760 }
0x31f2   :  { %2521 = vrot.lane.b32.xlu1 %v3761_v14, %s3923_s5 }
0x325c   :  { %v2929_v21 = vpop.permute.xlu1 %2928 }
0x325d   :  { %v5170_v35 = vmul.f32 %v2929_v21, %v2912_v43 }
0x325f   :  { %2934 = vperm.xlu2 %3439, %v5170_v35  }
0x3264   :  { %v2522_v51 = vpop.permute.xlu1 %2521 }
0x3265   :  { %v2527_v53 = vmul.f32 %v2522_v51, %v2493_v1 }
0x3267   :  { %2530 = vrot.lane.b32.xlu2 %v2527_v53, %s3924_s30  ;;  %s3931_s30 = smov 125  }
0x32b9   :  { %v2935_v0 = vpop.permute.xlu2 %2934 }
0x32ba   :  { %v2937_v44 = vmul.f32 %v5106_v12, %v2935_v0 }
0x32bc   :  { %v2938_v7 = vadd.f32 %v2937_v44, %v2655_v63 }
0x32be   :  { %3762 = vtanh.f32 %v2938_v7  ;;  %v3389_v41 = vmul.f32 -1.442695, %v2938_v7 }
0x32c0   :  { %3764 = vpow2.f32 %v3389_v41 }
0x32c1   :  { %v2531_v59 = vpop.permute.xlu2 %2530 }
0x32c2   :  { %v5178_v4 = vsel %vm539_vm12, %v2531_v59, %v4794_v55 }
0x32c3   :  { %3382 = vmatmul.msk.f32.gmra.mxu0 %vm420_vm13, %v5178_v4 }
0x32c4   :  { %v3763_v28 = vpop.eup %3762 }
0x32c5   :  { %2961 = vrot.lane.b32.xlu0 %v3763_v28, %s3927_s22 }
0x32c6   :  { %v3765_v3 = vpop.eup %3764 }
0x32c7   :  { %v2942_v2 = vadd.f32 1.0, %v3765_v3 }
0x32c9   :  { %3766 = vrcp.f32 %v2942_v2  ;;  %v2954_v52 = vand.u32 2147483648, %v2942_v2  ;;  %vm2948_vm12 = vweird.f32 %v2942_v2  ;;  %v2952_v55 = vand.u32 2147483647, %v2942_v2 }
0x32cb   :  { %v2955_v9 = vor.u32 1.1754944e-38, %v2954_v52  ;;  %vm2953_vm0 = vcmp.eq.f32.partialorder %v2952_v55, 8.507059e+37 }
0x32cf   :  { %v3767_v36 = vpop.eup %3766 }
0x32d0   :  { %v2944_v1 = vmul.f32 %v3767_v36, %v2942_v2  ;;  %vm2949_vm14 = vweird.f32 %v3767_v36 }
0x32d1   :  { %vm2950_vm15 = vmor %vm2948_vm12, %vm2949_vm14  ;;  %vm3056_vm14 = vcmask 64512  }
0x32d2   :  { %v2945_v38 = vsub.f32 1.0, %v2944_v1 }
0x32d4   :  { %v2946_v16 = vmul.f32 %v3767_v36, %v2945_v38 }
0x32d6   :  { %v2947_v32 = vadd.f32 %v3767_v36, %v2946_v16 }
0x32d8   :  { %v2951_v13 = vsel %vm2950_vm15, %v3767_v36, %v2947_v32 }
0x32d9   :  { %v2956_v37 = vsel %vm2953_vm0, %v2955_v9, %v2951_v13 }
0x32da   :  { %v2959_v33 = vmul.f32 %v2956_v37, %v2925_v15 }
0x3337   :  { %v2962_v49 = vpop.permute.xlu0 %2961 }
0x3338   :  { %v2964_v46 = vmul.f32 %v2962_v49, %v2956_v37 }
0x333a   :  { %2966 = vrot.lane.b32.xlu1 %v2964_v46, %s3928_s14  ;;  %v3936_v46 = vmov 6  }
0x3340   :  { %v2657_v20 = vpop.f32.mrf.mxu0 }
0x3341   :  { %v2658_v24 = vadd.f32 %v5101_v48, %v2657_v20 }
0x33ac   :  { %v2967_v30 = vpop.permute.xlu1 %2966 }
0x33ad   :  { %v2969_v45 = vadd.f32 %v2967_v30, %v2959_v33 }
0x33af   :  { %3768 = vtanh.f32 %v2969_v45 }
0x33b5   :  { %v3769_v5 = vpop.eup %3768 }
0x33b6   :  { %2972 = vrot.lane.b32.xlu0 %v3769_v5, %s3929_s13 }
0x3428   :  { %v2973_v39 = vpop.permute.xlu0 %2972 }
0x3429   :  { %v2975_v61 = vmul.f32 %v2973_v39, %v2956_v37  ;;  %v3935_v37 = vmov 5  }
0x342a   :  { %3445 = vset.pattern.permute.xlu0 %v3935_v37  ;;  %v3183_v37 = vld [vmem:[#allocation10 + $0x30] sm:$0xff] }
0x342b   :  { %2978 = vperm.xlu2 %3439, %v2975_v61  }
0x3433   :  { %3446 = vset.pattern.permute.xlu2 %v3936_v46 }
0x3485   :  { %v2979_v8 = vpop.permute.xlu2 %2978 }
0x3486   :  { %v2981_v60 = vmul.f32 %v5106_v12, %v2979_v8 }
0x3488   :  { %v2982_v43 = vadd.f32 %v2981_v60, %v2658_v24 }
0x348a   :  { %3770 = vtanh.f32 %v2982_v43  ;;  %v3390_v57 = vmul.f32 -1.442695, %v2982_v43 }
0x348c   :  { %3772 = vpow2.f32 %v3390_v57  ;;  %v3937_v57 = vmov 7  }
0x3490   :  { %v3771_v10 = vpop.eup %3770 }
0x3491   :  { %3005 = vrot.lane.b32.xlu1 %v3771_v10, %s3927_s22 }
0x3492   :  { %v3773_v26 = vpop.eup %3772 }
0x3493   :  { %v2986_v56 = vadd.f32 1.0, %v3773_v26  ;;  %v3938_v26 = vmov 1  }
0x3495   :  { %3774 = vrcp.f32 %v2986_v56  ;;  %v2998_v58 = vand.u32 2147483648, %v2986_v56  ;;  %vm2992_vm2 = vweird.f32 %v2986_v56  ;;  %v2996_v62 = vand.u32 2147483647, %v2986_v56 }
0x3497   :  { %vm2997_vm5 = vcmp.eq.f32.partialorder %v2996_v62, 8.507059e+37  ;;  %v3146_v62 = vld [vmem:[%s5335_s15 + $0x50] sm:$0xff] }
0x3499   :  { %3020 = vrot.lane.b32.xlu1 %v5117_v11, %s3931_s30  ;;  %v2999_v11 = vor.u32 1.1754944e-38, %v2998_v58  ;;  %v3147_v58 = vld [vmem:[%s5335_s15 + $0x58] sm:$0xff] }
0x349b   :  { %v3775_v17 = vpop.eup %3774 }
0x349c   :  { %v2988_v48 = vmul.f32 %v3775_v17, %v2986_v56  ;;  %vm2993_vm1 = vweird.f32 %v3775_v17  ;;  %v3939_v56 = vmov 2  }
0x349d   :  { %vm2994_vm4 = vmor %vm2992_vm2, %vm2993_vm1 }
0x349e   :  { %v2989_v15 = vsub.f32 1.0, %v2988_v48  ;;  %v3130_v48 = vld [vmem:[%s5359_s7] sm:$0xff] }
0x34a0   :  { %v2990_v12 = vmul.f32 %v3775_v17, %v2989_v15  ;;  %v3151_v15 = vld [vmem:[%s5335_s15 + $0x78] sm:$0xff] }
0x34a1   :  { %3029 = vrot.lane.b32.xlu1 %v5154_v6, %s3928_s14  ;;  %3156 = vmatpush.msrb.mxu1 %v3151_v15  ;;  %v3226_v15 = vld [vmem:[%s5339_s19 + $0x40] sm:$0xff] }
0x34a2   :  { %v2991_v54 = vadd.f32 %v3775_v17, %v2990_v12  ;;  %v3149_v12 = vld [vmem:[%s5335_s15 + $0x68] sm:$0xff] }
0x34a4   :  { %v2995_v31 = vsel %vm2994_vm4, %v3775_v17, %v2991_v54  ;;  %v3940_v17 = vmov 4   ;;  %v3148_v54 = vld [vmem:[%s5335_s15 + $0x60] sm:$0xff] }
0x34a5   :  { %v3000_v6 = vsel %vm2997_vm5, %v2999_v11, %v2995_v31  ;;  %v3145_v31 = vld [vmem:[%s5335_s15 + $0x48] sm:$0xff]  ;;  %v3144_v11 = vld [vmem:[%s5335_s15 + $0x40] sm:$0xff]  ;;  %vm3277_vm5 = vcmask 123904  }
0x34a6   :  { %v3003_v51 = vmul.f32 %v3000_v6, %v2969_v45 }
0x3503   :  { %v3006_v14 = vpop.permute.xlu1 %3005 }
0x3504   :  { %v3008_v21 = vmul.f32 %v3006_v14, %v3000_v6  ;;  %v3143_v14 = vld [vmem:[%s5335_s15 + $0x38] sm:$0xff] }
0x3506   :  { %3010 = vrot.lane.b32.xlu0 %v3008_v21, %s3928_s14  ;;  %v3141_v21 = vld [vmem:[%s5335_s15 + $0x28] sm:$0xff] }
0x350e   :  { %3023 = vrot.lane.b32.xlu0 %v5125_v27, %s3927_s22  ;;  %v3021_v27 = vpop.permute.xlu1 %3020 }
0x3516   :  { %3032 = vrot.lane.b32.xlu0 %v5170_v35, %s3929_s13  ;;  %v3030_v41 = vpop.permute.xlu1 %3029 }
0x3578   :  { %v3011_v53 = vpop.permute.xlu0 %3010 }
0x3579   :  { %v3013_v50 = vadd.f32 %v3011_v53, %v3003_v51  ;;  %v3140_v51 = vld [vmem:[%s5335_s15 + $0x20] sm:$0xff] }
0x357b   :  { %3776 = vtanh.f32 %v3013_v50 }
0x3580   :  { %v3024_v7 = vpop.permute.xlu0 %3023 }
0x3581   :  { %v3777_v0 = vpop.eup %3776  ;;  %v3043_v59 = vsel %vm3042_vm6, %v3021_v27, %v3024_v7  ;;  %v3136_v27 = vld [vmem:[%s5335_s15] sm:$0xff] }
0x3582   :  { %3016 = vrot.lane.b32.xlu2 %v3777_v0, %s3929_s13  ;;  %v3139_v0 = vld [vmem:[%s5335_s15 + $0x18] sm:$0xff] }
0x3588   :  { %v3033_v36 = vpop.permute.xlu0 %3032 }
0x358a   :  { %3026 = vrot.lane.b32.xlu2 %v5133_v22, %s3932_s23 }
0x3592   :  { %3035 = vrot.lane.b32.xlu2 %v2975_v61, %s3933_s11 }
0x35dc   :  { %v3017_v63 = vpop.permute.xlu2 %3016 }
0x35dd   :  { %v3019_v44 = vmul.f32 %v3017_v63, %v3000_v6  ;;  %v3142_v6 = vld [vmem:[%s5335_s15 + $0x30] sm:$0xff] }
0x35de   :  { %v3138_v63 = vld [vmem:[%s5335_s15 + $0x10] sm:$0xff] }
0x35df   :  { %3039 = vrot.lane.b32.xlu1 %v3019_v44, %s3934_s1  ;;  %v3137_v44 = vld [vmem:[%s5335_s15 + $0x8] sm:$0xff] }
0x35e4   :  { %v3027_v35 = vpop.permute.xlu2 %3026 }
0x35e5   :  { %v3045_v28 = vsel %vm3044_vm7, %v3043_v59, %v3027_v35  ;;  %v3192_v35 = vld [vmem:[#allocation10 + $0x78] sm:$0xff]  ;;  %v3191_v59 = vld [vmem:[#allocation10 + $0x70] sm:$0xff] }
0x35e6   :  { %v3047_v3 = vsel %vm3046_vm8, %v3045_v28, %v5142_v18  ;;  %3197 = vmatpush.msrb.mxu2 %v3192_v35  ;;  %v3190_v28 = vld [vmem:[#allocation10 + $0x68] sm:$0xff] }
0x35e7   :  { %v3049_v2 = vsel %vm3048_vm3, %v3047_v3, %v3030_v41  ;;  %v3189_v3 = vld [vmem:[#allocation10 + $0x60] sm:$0xff] }
0x35e8   :  { %v3051_v1 = vsel %vm3050_vm9, %v3049_v2, %v3033_v36  ;;  %3198 = vmatpush.msrb.mxu2 %v3191_v59  ;;  %v3188_v2 = vld [vmem:[#allocation10 + $0x58] sm:$0xff] }
0x35ea   :  { %3199 = vmatpush.msrb.mxu2 %v3190_v28 }
0x35ec   :  { %v3036_v22 = vpop.permute.xlu2 %3035  ;;  %3200 = vmatpush.msrb.mxu2 %v3189_v3 }
0x35ed   :  { %v3053_v38 = vsel %vm3052_vm10, %v3051_v1, %v3036_v22  ;;  %v3187_v22 = vld [vmem:[#allocation10 + $0x50] sm:$0xff]  ;;  %v3186_v1 = vld [vmem:[#allocation10 + $0x48] sm:$0xff] }
0x35ee   :  { %3201 = vmatpush.msrb.mxu2 %v3188_v2 }
0x35f0   :  { %3202 = vmatpush.msrb.mxu2 %v3187_v22 }
0x35f2   :  { %3203 = vmatpush.msrb.mxu2 %v3186_v1 }
0x3651   :  { %v3040_v16 = vpop.permute.xlu1 %3039 }
0x3652   :  { %v3055_v32 = vsel %vm3054_vm11, %v3053_v38, %v3040_v16 }
0x3653   :  { %v3057_v52 = vsel %vm3056_vm14, %v3055_v32, -inf }
0x3654   :  { %3058 = vmax.xlane.f32.xlu0 %v3057_v52 }
0x36c7   :  { %v3059_v55 = vpop.xlane.xlu0 %3058 }
0x36c8   :  { %v3060_v13 = vsub.f32 %v3055_v32, %v3059_v55  ;;  %v3185_v32 = vld [vmem:[#allocation10 + $0x40] sm:$0xff] }
0x36c9   :  { %3204 = vmatpush.msrb.mxu2 %v3185_v32 }
0x36ca   :  { %v3061_v9 = vmul.f32 1.442695, %v3060_v13 }
0x36cc   :  { %3778 = vpow2.f32 %v3061_v9  ;;  %v3184_v9 = vld [vmem:[#allocation10 + $0x38] sm:$0xff] }
0x36cd   :  { %3205 = vmatpush.msrb.mxu2 %v3184_v9 }
0x36cf   :  { %3206 = vmatpush.msrb.mxu2 %v3183_v37 }
0x36d2   :  { %v3779_v49 = vpop.eup %3778 }
0x36d3   :  { %v3063_v18 = vsel %vm3056_vm14, %v3779_v49, 0.0 }
0x36d4   :  { %3064 = vadd.xlane.f32.xlu2 %v3063_v18 }
0x3747   :  { %v3065_v33 = vpop.xlane.xlu2 %3064 }
0x3748   :  { %3780 = vrcp.f32 %v3065_v33  ;;  %v3077_v39 = vand.u32 2147483648, %v3065_v33  ;;  %v3075_v20 = vand.u32 2147483647, %v3065_v33  ;;  %vm3071_vm15 = vweird.f32 %v3065_v33 }
0x374a   :  { %v3078_v24 = vor.u32 1.1754944e-38, %v3077_v39  ;;  %vm3076_vm1 = vcmp.eq.f32.partialorder %v3075_v20, 8.507059e+37 }
0x374e   :  { %v3781_v30 = vpop.eup %3780 }
0x374f   :  { %v3067_v45 = vmul.f32 %v3781_v30, %v3065_v33  ;;  %vm3072_vm12 = vweird.f32 %v3781_v30  ;;  %v3182_v33 = vld [vmem:[#allocation10 + $0x28] sm:$0xff] }
0x3750   :  { %vm3073_vm0 = vmor %vm3071_vm15, %vm3072_vm12  ;;  %3207 = vmatpush.msrb.mxu2 %v3182_v33 }
0x3751   :  { %v3068_v5 = vsub.f32 1.0, %v3067_v45 }
0x3753   :  { %v3069_v61 = vmul.f32 %v3781_v30, %v3068_v5  ;;  %v3180_v5 = vld [vmem:[#allocation10 + $0x18] sm:$0xff] }
0x3755   :  { %v3070_v8 = vadd.f32 %v3781_v30, %v3069_v61 }
0x3757   :  { %v3074_v60 = vsel %vm3073_vm0, %v3781_v30, %v3070_v8 }
0x3758   :  { %v3079_v43 = vsel %vm3076_vm1, %v3078_v24, %v3074_v60 }
0x3759   :  { %v3080_v10 = vmul.f32 %v3779_v49, %v3079_v43  ;;  %v3179_v43 = vld [vmem:[#allocation10 + $0x10] sm:$0xff] }
0x375b   :  { %3119 = vperm.xlu2 %3446, %v3080_v10   ;;  %3113 = vperm.xlu0 %3445, %v3080_v10  }
0x375c   :  { %3083 = vperm.xlu1 %3440, %v3080_v10  }
0x3763   :  { %3448 = vset.pattern.permute.xlu0 %v3937_v57 }
0x3764   :  { %3441 = vset.pattern.permute.xlu1 %v3938_v26  ;;  %v3230_v26 = vld [vmem:[%s5339_s19 + $0x60] sm:$0xff] }
0x3765   :  { %3089 = vperm.xlu1 %3441, %v3080_v10  }
0x376d   :  { %3442 = vset.pattern.permute.xlu1 %v3939_v56  ;;  %v3229_v56 = vld [vmem:[%s5339_s19 + $0x58] sm:$0xff] }
0x376e   :  { %3095 = vperm.xlu1 %3442, %v3080_v10  }
0x3776   :  { %3443 = vset.pattern.permute.xlu1 %v3930_v29  ;;  %v3150_v29 = vld [vmem:[%s5335_s15 + $0x70] sm:$0xff] }
0x3777   :  { %3101 = vperm.xlu1 %3443, %v3080_v10   ;;  %3157 = vmatpush.msrb.mxu1 %v3150_v29  ;;  %v3225_v29 = vld [vmem:[%s5339_s19 + $0x38] sm:$0xff] }
0x3779   :  { %3158 = vmatpush.msrb.mxu1 %v3149_v12  ;;  %v3224_v12 = vld [vmem:[%s5339_s19 + $0x30] sm:$0xff] }
0x377b   :  { %3159 = vmatpush.msrb.mxu1 %v3148_v54  ;;  %v3223_v54 = vld [vmem:[%s5339_s19 + $0x28] sm:$0xff] }
0x377d   :  { %3160 = vmatpush.msrb.mxu1 %v3147_v58  ;;  %v3222_v58 = vld [vmem:[%s5339_s19 + $0x20] sm:$0xff] }
0x377f   :  { %3444 = vset.pattern.permute.xlu1 %v3940_v17  ;;  %3161 = vmatpush.msrb.mxu1 %v3146_v62  ;;  %v3228_v17 = vld [vmem:[%s5339_s19 + $0x50] sm:$0xff]  ;;  %v3221_v62 = vld [vmem:[%s5339_s19 + $0x18] sm:$0xff] }
0x3780   :  { %3107 = vperm.xlu1 %3444, %v3080_v10  }
0x3781   :  { %3162 = vmatpush.msrb.mxu1 %v3145_v31  ;;  %v3455_v31 = vld [vmem:[%s5336_s16] ss:$0 sm:$0xff] }
0x3783   :  { %3163 = vmatpush.msrb.mxu1 %v3144_v11 }
0x3785   :  { %3164 = vmatpush.msrb.mxu1 %v3143_v14 }
0x3787   :  { %3165 = vmatpush.msrb.mxu1 %v3142_v6 }
0x3788   :  { %3447 = vset.pattern.permute.xlu1 %v3937_v57  ;;  %v3233_v57 = vld [vmem:[%s5339_s19 + $0x78] sm:$0xff] }
0x3789   :  { %3125 = vperm.xlu1 %3447, %v3080_v10   ;;  %3166 = vmatpush.msrb.mxu1 %v3141_v21  ;;  %v3177_v10 = vld [vmem:[#allocation10] sm:$0xff]  ;;  %v3220_v21 = vld [vmem:[%s5339_s19 + $0x10] sm:$0xff] }
0x378a   :  { %3238 = vmatpush.msrb.mxu3 %v3233_v57 }
0x378b   :  { %3167 = vmatpush.msrb.mxu1 %v3140_v51  ;;  %v3219_v51 = vld [vmem:[%s5339_s19 + $0x8] sm:$0xff] }
0x378d   :  { %3168 = vmatpush.msrb.mxu1 %v3139_v0 }
0x378f   :  { %3169 = vmatpush.msrb.mxu1 %v3138_v63 }
0x3791   :  { %3132 = vrot.lane.b32.xlu1 %v3130_v48, %s3923_s5  ;;  %3170 = vmatpush.msrb.mxu1 %v3137_v44  ;;  %v3227_v48 = vld [vmem:[%s5339_s19 + $0x48] sm:$0xff] }
0x3793   :  { %3171 = vmatpush.msrb.mxu1 %v3136_v27  ;;  %v3457_v27 = vld [vmem:[%s5340_s20] ss:$0 sm:$0xff]  ;;  %s3286_s20 = sshll.u32 %s5341_s21, 4  ;;  %s3287_s20 = int_to_ptr.hbm [resolvable:$true] %s3286_s20 }
0x37b5   :  { %v3120_v45 = vpop.permute.xlu2 %3119 }
0x37b6   :  { %v3122_v61 = vmul.f32 %v3120_v45, %v5093_v34  ;;  %v3232_v34 = vld [vmem:[%s5339_s19 + $0x70] sm:$0xff] }
0x37b7   :  { %3239 = vmatpush.msrb.mxu3 %v3232_v34 }
0x37cd   :  { %v3114_v46 = vpop.permute.xlu0 %3113 }
0x37ce   :  { %v3084_v53 = vpop.permute.xlu1 %3083  ;;  %v3116_v30 = vmul.f32 %v3114_v46, %v5086_v40  ;;  %v3178_v40 = vld [vmem:[#allocation10 + $0x8] sm:$0xff] }
0x37cf   :  { %v3086_v38 = vmul.f32 %v3084_v53, %v5050_v25  ;;  %v3218_v53 = vld [vmem:[%s5339_s19] sm:$0xff] }
0x37d7   :  { %v3090_v50 = vpop.permute.xlu1 %3089 }
0x37d8   :  { %v3092_v36 = vmul.f32 %v3090_v50, %v5058_v19  ;;  %v3456_v50 = vld [vmem:[%s5338_s18] ss:$0 sm:$0xff]  ;;  %s3941_s18 = smov [#allocation12]  }
0x37da   :  { %v3093_v52 = vadd.f32 %v3092_v36, %v3086_v38 }
0x37e0   :  { %v3096_v7 = vpop.permute.xlu1 %3095 }
0x37e1   :  { %v3098_v16 = vmul.f32 %v3096_v7, %v5065_v47  ;;  %v3181_v47 = vld [vmem:[#allocation10 + $0x20] sm:$0xff] }
0x37e2   :  { %3208 = vmatpush.msrb.mxu2 %v3181_v47 }
0x37e3   :  { %v3099_v49 = vadd.f32 %v3098_v16, %v3093_v52 }
0x37e4   :  { %3209 = vmatpush.msrb.mxu2 %v3180_v5 }
0x37e6   :  { %3210 = vmatpush.msrb.mxu2 %v3179_v43 }
0x37e8   :  { %3211 = vmatpush.msrb.mxu2 %v3178_v40 }
0x37e9   :  { %v3102_v41 = vpop.permute.xlu1 %3101 }
0x37ea   :  { %v3104_v55 = vmul.f32 %v3102_v41, %v5072_v42  ;;  %3212 = vmatpush.msrb.mxu2 %v3177_v10 }
0x37ec   :  { %v3105_v19 = vadd.f32 %v3104_v55, %v3099_v49 }
0x37f2   :  { %v3108_v13 = vpop.permute.xlu1 %3107 }
0x37f3   :  { %v3110_v18 = vmul.f32 %v3108_v13, %v5079_v23 }
0x37f5   :  { %v3111_v25 = vadd.f32 %v3110_v18, %v3105_v19 }
0x37f7   :  { %v3117_v39 = vadd.f32 %v3116_v30, %v3111_v25 }
0x37f9   :  { %v3123_v20 = vadd.f32 %v3122_v61, %v3117_v39 }
0x37fb   :  { %v3126_v42 = vpop.permute.xlu1 %3125 }
0x37fc   :  { %v3128_v23 = vmul.f32 %v3126_v42, %v5178_v4  ;;  %v3231_v4 = vld [vmem:[%s5339_s19 + $0x68] sm:$0xff]  ;;  %s3284_s19 = sshll.u32 %s3941_s18, 4  ;;  %s3285_s19 = int_to_ptr.vmem [resolvable:$true] %s3284_s19 }
0x37fd   :  { %3240 = vmatpush.msrb.mxu3 %v3231_v4 }
0x37fe   :  { %v3129_v8 = vadd.f32 %v3128_v23, %v3123_v20 }
0x37ff   :  { %3241 = vmatpush.msrb.mxu3 %v3230_v26 }
0x3801   :  { %3242 = vmatpush.msrb.mxu3 %v3229_v56 }
0x3803   :  { %v3133_v24 = vpop.permute.xlu1 %3132  ;;  %3243 = vmatpush.msrb.mxu3 %v3228_v17 }
0x3804   :  { %v3135_v60 = vsel %vm420_vm13, %v3129_v8, %v3133_v24 }
0x3805   :  { %3172 = vmatmul.f32.vlgmr.msrb.gmra.mxu1 %v3135_v60  ;;  %3244 = vmatpush.msrb.mxu3 %v3227_v48 }
0x3807   :  { %3245 = vmatpush.msrb.mxu3 %v3226_v15 }
0x3809   :  { %3246 = vmatpush.msrb.mxu3 %v3225_v29 }
0x380b   :  { %3247 = vmatpush.msrb.mxu3 %v3224_v12 }
0x380d   :  { %3248 = vmatpush.msrb.mxu3 %v3223_v54 }
0x380f   :  { %3249 = vmatpush.msrb.mxu3 %v3222_v58 }
0x3811   :  { %3250 = vmatpush.msrb.mxu3 %v3221_v62 }
0x3813   :  { %3251 = vmatpush.msrb.mxu3 %v3220_v21 }
0x3815   :  { %3252 = vmatpush.msrb.mxu3 %v3219_v51 }
0x3817   :  { %3253 = vmatpush.msrb.mxu3 %v3218_v53 }
0x3882   :  { %v3173_v11 = vpop.f32.mrf.mxu1 }
0x3883   :  { %v3174_v14 = vadd.f32 %v3455_v31, %v3173_v11 }
0x3885   :  { %v3176_v6 = vmax.f32 %v3174_v14, 0.0 }
0x3887   :  { %3213 = vmatmul.f32.vlgmr.msrb.gmra.mxu2 %v3176_v6 }
0x390a   :  { %v3214_v0 = vpop.f32.mrf.mxu2 }
0x390b   :  { %v3215_v63 = vadd.f32 %v3456_v50, %v3214_v0 }
0x390d   :  { %v3217_v44 = vmax.f32 %v3215_v63, 0.0 }
0x390f   :  { %3254 = vmatmul.f32.vlgmr.msrb.gmra.mxu3 %v3217_v44 }
0x3992   :  { %v3255_v7 = vpop.f32.mrf.mxu3 }
0x3993   :  { %v3256_v35 = vadd.f32 %v3457_v27, %v3255_v7 }
0x3995   :  { %v3391_v59 = vmul.f32 -1.442695, %v3256_v35 }
0x3997   :  { %3782 = vpow2.f32 %v3391_v59 }
0x399d   :  { %v3783_v28 = vpop.eup %3782 }
0x399e   :  { %v3261_v41 = vadd.f32 1.0, %v3783_v28 }
0x39a0   :  { %3784 = vrcp.f32 %v3261_v41  ;;  %v3273_v36 = vand.u32 2147483648, %v3261_v41  ;;  %v3271_v38 = vand.u32 2147483647, %v3261_v41  ;;  %vm3267_vm2 = vweird.f32 %v3261_v41 }
0x39a2   :  { %v3274_v32 = vor.u32 1.1754944e-38, %v3273_v36  ;;  %vm3272_vm6 = vcmp.eq.f32.partialorder %v3271_v38, 8.507059e+37 }
0x39a6   :  { %v3785_v3 = vpop.eup %3784 }
0x39a7   :  { %v3263_v2 = vmul.f32 %v3785_v3, %v3261_v41  ;;  %vm3268_vm13 = vweird.f32 %v3785_v3 }
0x39a8   :  { %vm3269_vm4 = vmor %vm3267_vm2, %vm3268_vm13 }
0x39a9   :  { %v3264_v22 = vsub.f32 1.0, %v3263_v2 }
0x39ab   :  { %v3265_v1 = vmul.f32 %v3785_v3, %v3264_v22 }
0x39ad   :  { %v3266_v16 = vadd.f32 %v3785_v3, %v3265_v1 }
0x39af   :  { %v3270_v52 = vsel %vm3269_vm4, %v3785_v3, %v3266_v16 }
0x39b0   :  { %v3275_v55 = vsel %vm3272_vm6, %v3274_v32, %v3270_v52 }
0x39b1   :  { %3278 = vst.msk [vmem:[#allocation12] sm:$0x3] %vm3277_vm5, %v3275_v55 }
0x39b2   :  { %3289 = dma.vmem_to_hbm [thread:$0]  %s3285_s19, 32, %s3287_s20, [#allocation6]  }
0x39b3   :  { %3912 = dma.done.wait [#allocation6], 32  }
0x39b4   :  { %3913 = vsyncadd [#allocation6], 4294967264 }
0x39b5   :  { %3294 = vsyncpa [#allocation5], 1 }
0x39b6   :  { %3295 = vsyncpa [#allocation8], 1 }
0x39b7   :  { %3296 = vsyncpa [#allocation11], 1 }
0x39b8   :  { %3297 = vsyncpa [#allocation6], 1 }

</bundles_post_ra>
